<compile_context>
chip_gen: v6e
topology: v6e:2x2x1
jax: 0.10.0
libtpu: 0.0.40
codegen_flags: <defaults>
</compile_context>

<pallas_src>
import math
import numpy as np

import jax
import jax.numpy as jnp
from jax import lax
from jax.experimental import pallas as pl
from jax.experimental.pallas import tpu as pltpu

# ---- static configuration ---------------------------------------------------
CIN = 4                  # input_size
CPAD = 8                 # channels padded to one full sublane group
COUT = 4                 # n_kernels
NCONV = 4                # n_conv (column dilations 1..4)
KH = KW = 3              # kernel_size
PADH = 1                 # row padding = (KH-1)//2 (reference only)
H = W = 16               # powers of two (bit-decode of flat index relies on it)
B = 2
N = B * H * W            # 512 flattened positions -> 4x128 lanes, lane dense
KTAPS = KH * KW * CPAD   # 72 rows of the in-kernel tap matrix


# ---- host-side precomputation of the hard-coded per-row dilation weights ----
def compute_final_weights(h, n_convs):
    """Faithful replication of the numpy/torch weight hard-coding loop."""
    hw = np.zeros((h, n_convs))
    phi = np.linspace(-np.pi / 2, np.pi / 2, num=h, endpoint=True)
    ideal = 1.0 / np.cos(phi)
    dilation_rates = [1, 2, 3, 4]
    for i in range(h):
        value = ideal[i]
        if value >= 4:
            hw[i, 3] = 1.0
            hw[i, :3] = 0.0
            hw[-1] = hw[0]
        else:
            differences = np.array([abs(value - d) for d in dilation_rates])
            idx = np.argsort(differences)[:2]
            smallest = differences[idx]
            inv = 1.0 / smallest
            if math.isinf(inv[0]):
                inv[0] = 10.0
            normalized = inv / inv.sum()
            hw[i, idx[0]] = normalized[0]
            hw[i, idx[1]] = normalized[1]
            for j in range(1, 4):
                hw[-j] = hw[j - 1]
    return hw.astype(np.float32)


# ---- Pallas kernel -----------------------------------------------------------
def swhdc_kernel(x_ref, fw_ref, w_ref, b_ref, o_ref, taps_ref):
    """In-kernel im2col via lane rolls + one MXU matmul.

    x_ref   : (CPAD, N)    VMEM  flattened input; rows 0..3 = channels, 4..7 = 0
    fw_ref  : (NCONV, N)   VMEM  per-dilation, per-position row weight
    w_ref   : (COUT, KTAPS)VMEM  conv weights reordered to (kh, kw, ci-padded)
    b_ref   : (COUT, 1)    VMEM  conv bias
    o_ref   : (COUT, N)    VMEM  output (512 lanes -> unmasked stores)
    taps_ref: (KTAPS, N)   VMEM  scratch: dilation-combined tap matrix
    """
    n = x_ref.shape[-1]
    x = x_ref[...]                                   # (8, N), hoisted once

    # Image row / column of every flattened (b, i, j) position (H, W = 2^k).
    lane = lax.broadcasted_iota(jnp.int32, (1, n), 1)
    col = lane & (W - 1)
    row = (lane >> 4) & (H - 1)

    # Hoisted per-dilation weight rows and their sum (== 1 by construction,
    # but recomputed rather than assumed).
    fw = [fw_ref[d:d + 1, :] for d in range(NCONV)]
    fw_sum = fw[0] + fw[1] + fw[2] + fw[3]

    def tap(dh, dw):
        """x shifted by (dh rows, dw cols) on the image grid, zero outside."""
        delta = dh * W + dw
        shifted = x if delta == 0 else pltpu.roll(x, (-delta) % n, axis=1)
        valid = ((row + dh >= 0) & (row + dh < H) &
                 (col + dw >= 0) & (col + dw < W))
        return shifted * valid.astype(jnp.float32)    # (8, N) * (1, N)

    # Fold the dilation sum into each tap BEFORE the matmul:
    #   t[kh, kw] = sum_d fw_d * shift(kh-1, (kw-1)*d)
    for kh in range(KH):
        dh = kh - 1
        for kw in range(KW):
            if kw == 1:                       # centre column: shift is d-free
                t = fw_sum * tap(dh, 0)
            else:
                t = fw[0] * tap(dh, (kw - 1) * 1)
                for d in range(2, NCONV + 1):
                    t = t + fw[d - 1] * tap(dh, (kw - 1) * d)
            g = kh * KW + kw
            taps_ref[g * CPAD:(g + 1) * CPAD, :] = t  # aligned 8-row store

    # Single MXU push: (COUT, 72) @ (72, N), then the bias broadcast FMA.
    conv = jnp.dot(w_ref[...], taps_ref[...],
                   preferred_element_type=jnp.float32)          # (COUT, N)
    o_ref[...] = conv + b_ref[...] * fw_sum                     # (4,1)*(1,N)


# ---- wrapper -----------------------------------------------------------------
def swhdc_forward(x, conv_w, conv_b, final_w):
    b, c, h, w = x.shape
    assert (b, c, h, w) == (B, CIN, H, W)

    @jax.jit
    def run(x, conv_w, conv_b, final_w):
        # -- tiny layout plumbing (~16 KiB total; no im2col inflation) --------
        x_flat = jnp.transpose(x, (1, 0, 2, 3)).reshape(CIN, N)
        x_flat = jnp.pad(x_flat, ((0, CPAD - CIN), (0, 0))).astype(jnp.float32)

        fwmap = jnp.broadcast_to(final_w.T[:, None, :, None],
                                 (NCONV, B, H, W)).reshape(NCONV, N)
        fwmap = fwmap.astype(jnp.float32)

        # (co, ci, kh, kw) -> (co, kh, kw, ci) -> pad ci to 8 -> (co, 72)
        w_r = jnp.transpose(conv_w, (0, 2, 3, 1))
        w_r = jnp.pad(w_r, ((0, 0), (0, 0), (0, 0), (0, CPAD - CIN)))
        w_r = w_r.reshape(COUT, KTAPS).astype(jnp.float32)

        b_col = conv_b.reshape(COUT, 1).astype(jnp.float32)

        out_flat = pl.pallas_call(
            swhdc_kernel,
            out_shape=jax.ShapeDtypeStruct((COUT, N), jnp.float32),
            in_specs=[pl.BlockSpec(memory_space=pltpu.MemorySpace.VMEM)] * 4,
            out_specs=pl.BlockSpec(memory_space=pltpu.MemorySpace.VMEM),
            scratch_shapes=[pltpu.VMEM((KTAPS, N), jnp.float32)],
        )(x_flat, fwmap, w_r, b_col)

        return out_flat.reshape(COUT, B, H, W).transpose(1, 0, 2, 3)

    return run(x, conv_w, conv_b, final_w)


# ---- plain-JAX reference for verification ------------------------------------
def swhdc_reference(x, conv_w, conv_b, final_w):
    total = 0.0
    for d_idx in range(NCONV):
        d = d_idx + 1
        y = lax.conv_general_dilated(
            x, conv_w, window_strides=(1, 1),
            padding=((PADH, PADH), (d, d)),
            rhs_dilation=(1, d),
            dimension_numbers=("NCHW", "OIHW", "NCHW"))
        y = y + conv_b[None, :, None, None]
        total = total + y * final_w[:, d_idx][None, None, :, None]
    return total


if __name__ == "__main__":
    key = jax.random.PRNGKey(0)
    k1, k2, k3 = jax.random.split(key, 3)

    # deterministic parameter init mirroring _ConvNd.reset_parameters
    stdv = 1.0 / math.sqrt(CIN * KH * KW)
    conv_w = jax.random.uniform(k1, (COUT, CIN, KH, KW), jnp.float32,
                                minval=-stdv, maxval=stdv)
    conv_b = jax.random.uniform(k2, (COUT,), jnp.float32,
                                minval=-stdv, maxval=stdv)

    x = jax.random.normal(k3, (B, CIN, H, W), jnp.float32)
    final_w = jnp.asarray(compute_final_weights(H, NCONV))

    out = jax.block_until_ready(swhdc_forward(x, conv_w, conv_b, final_w))
    ref = jax.block_until_ready(swhdc_reference(x, conv_w, conv_b, final_w))

    np.testing.assert_allclose(np.asarray(out), np.asarray(ref),
                               rtol=1e-4, atol=1e-4)
    print("KERNEL_OK")
</pallas_src>

<mosaic_0001>
module attributes {stable_mosaic.version = 11 : i64} {
  func.func @swhdc_kernel(%arg0: memref<8x512xf32, #tpu.memory_space<vmem>>, %arg1: memref<4x512xf32, #tpu.memory_space<vmem>>, %arg2: memref<4x72xf32, #tpu.memory_space<vmem>>, %arg3: memref<4x1xf32, #tpu.memory_space<vmem>>, %arg4: memref<4x512xf32, #tpu.memory_space<vmem>>, %arg5: memref<72x512xf32, #tpu.memory_space<vmem>>) attributes {dimension_semantics = [], scalar_prefetch = 0 : i64, scratch_operands = 1 : i64, tpu.core_type = #tpu.core_type<tc>} {
    %c0 = arith.constant 0 : index
    %c0_0 = arith.constant 0 : index
    %0 = vector.load %arg0[%c0, %c0_0] : memref<8x512xf32, #tpu.memory_space<vmem>>, vector<8x512xf32>
    %1 = tpu.iota {dimensions = array<i32: 1>} : vector<1x512xi32>
    %c15_i32 = arith.constant 15 : i32
    %2 = vector.broadcast %c15_i32 : i32 to vector<1x512xi32>
    %3 = arith.andi %1, %2 : vector<1x512xi32>
    %c4_i32 = arith.constant 4 : i32
    %4 = vector.broadcast %c4_i32 : i32 to vector<1x512xi32>
    %5 = arith.shrsi %1, %4 : vector<1x512xi32>
    %c15_i32_1 = arith.constant 15 : i32
    %6 = vector.broadcast %c15_i32_1 : i32 to vector<1x512xi32>
    %7 = arith.andi %5, %6 : vector<1x512xi32>
    %c0_2 = arith.constant 0 : index
    %c0_3 = arith.constant 0 : index
    %8 = vector.load %arg1[%c0_2, %c0_3] : memref<4x512xf32, #tpu.memory_space<vmem>>, vector<1x512xf32>
    %c1 = arith.constant 1 : index
    %c0_4 = arith.constant 0 : index
    %9 = vector.load %arg1[%c1, %c0_4] : memref<4x512xf32, #tpu.memory_space<vmem>>, vector<1x512xf32>
    %c2 = arith.constant 2 : index
    %c0_5 = arith.constant 0 : index
    %10 = vector.load %arg1[%c2, %c0_5] : memref<4x512xf32, #tpu.memory_space<vmem>>, vector<1x512xf32>
    %c3 = arith.constant 3 : index
    %c0_6 = arith.constant 0 : index
    %11 = vector.load %arg1[%c3, %c0_6] : memref<4x512xf32, #tpu.memory_space<vmem>>, vector<1x512xf32>
    %12 = arith.addf %8, %9 : vector<1x512xf32>
    %13 = arith.addf %12, %10 : vector<1x512xf32>
    %14 = arith.addf %13, %11 : vector<1x512xf32>
    %c17_i32 = arith.constant 17 : i32
    %15 = tpu.dynamic_rotate %0 by %c17_i32 dim 1 : vector<8x512xf32>, i32 -> vector<8x512xf32>
    %c-1_i32 = arith.constant -1 : i32
    %16 = vector.broadcast %c-1_i32 : i32 to vector<1x512xi32>
    %17 = arith.addi %7, %16 : vector<1x512xi32>
    %c0_i32 = arith.constant 0 : i32
    %18 = vector.broadcast %c0_i32 : i32 to vector<1x512xi32>
    %19 = arith.cmpi sge, %17, %18 : vector<1x512xi32>
    %c-1_i32_7 = arith.constant -1 : i32
    %20 = vector.broadcast %c-1_i32_7 : i32 to vector<1x512xi32>
    %21 = arith.addi %7, %20 : vector<1x512xi32>
    %c16_i32 = arith.constant 16 : i32
    %22 = vector.broadcast %c16_i32 : i32 to vector<1x512xi32>
    %23 = arith.cmpi slt, %21, %22 : vector<1x512xi32>
    %24 = arith.andi %19, %23 : vector<1x512xi1>
    %c-1_i32_8 = arith.constant -1 : i32
    %25 = vector.broadcast %c-1_i32_8 : i32 to vector<1x512xi32>
    %26 = arith.addi %3, %25 : vector<1x512xi32>
    %c0_i32_9 = arith.constant 0 : i32
    %27 = vector.broadcast %c0_i32_9 : i32 to vector<1x512xi32>
    %28 = arith.cmpi sge, %26, %27 : vector<1x512xi32>
    %29 = arith.andi %24, %28 : vector<1x512xi1>
    %c-1_i32_10 = arith.constant -1 : i32
    %30 = vector.broadcast %c-1_i32_10 : i32 to vector<1x512xi32>
    %31 = arith.addi %3, %30 : vector<1x512xi32>
    %c16_i32_11 = arith.constant 16 : i32
    %32 = vector.broadcast %c16_i32_11 : i32 to vector<1x512xi32>
    %33 = arith.cmpi slt, %31, %32 : vector<1x512xi32>
    %34 = arith.andi %29, %33 : vector<1x512xi1>
    %35 = arith.extui %34 : vector<1x512xi1> to vector<1x512xi32>
    %36 = arith.sitofp %35 : vector<1x512xi32> to vector<1x512xf32>
    %37 = vector.broadcast %36 : vector<1x512xf32> to vector<8x512xf32>
    %38 = arith.mulf %15, %37 : vector<8x512xf32>
    %39 = vector.broadcast %8 : vector<1x512xf32> to vector<8x512xf32>
    %40 = arith.mulf %39, %38 : vector<8x512xf32>
    %c18_i32 = arith.constant 18 : i32
    %41 = tpu.dynamic_rotate %0 by %c18_i32 dim 1 : vector<8x512xf32>, i32 -> vector<8x512xf32>
    %c-1_i32_12 = arith.constant -1 : i32
    %42 = vector.broadcast %c-1_i32_12 : i32 to vector<1x512xi32>
    %43 = arith.addi %7, %42 : vector<1x512xi32>
    %c0_i32_13 = arith.constant 0 : i32
    %44 = vector.broadcast %c0_i32_13 : i32 to vector<1x512xi32>
    %45 = arith.cmpi sge, %43, %44 : vector<1x512xi32>
    %c-1_i32_14 = arith.constant -1 : i32
    %46 = vector.broadcast %c-1_i32_14 : i32 to vector<1x512xi32>
    %47 = arith.addi %7, %46 : vector<1x512xi32>
    %c16_i32_15 = arith.constant 16 : i32
    %48 = vector.broadcast %c16_i32_15 : i32 to vector<1x512xi32>
    %49 = arith.cmpi slt, %47, %48 : vector<1x512xi32>
    %50 = arith.andi %45, %49 : vector<1x512xi1>
    %c-2_i32 = arith.constant -2 : i32
    %51 = vector.broadcast %c-2_i32 : i32 to vector<1x512xi32>
    %52 = arith.addi %3, %51 : vector<1x512xi32>
    %c0_i32_16 = arith.constant 0 : i32
    %53 = vector.broadcast %c0_i32_16 : i32 to vector<1x512xi32>
    %54 = arith.cmpi sge, %52, %53 : vector<1x512xi32>
    %55 = arith.andi %50, %54 : vector<1x512xi1>
    %c-2_i32_17 = arith.constant -2 : i32
    %56 = vector.broadcast %c-2_i32_17 : i32 to vector<1x512xi32>
    %57 = arith.addi %3, %56 : vector<1x512xi32>
    %c16_i32_18 = arith.constant 16 : i32
    %58 = vector.broadcast %c16_i32_18 : i32 to vector<1x512xi32>
    %59 = arith.cmpi slt, %57, %58 : vector<1x512xi32>
    %60 = arith.andi %55, %59 : vector<1x512xi1>
    %61 = arith.extui %60 : vector<1x512xi1> to vector<1x512xi32>
    %62 = arith.sitofp %61 : vector<1x512xi32> to vector<1x512xf32>
    %63 = vector.broadcast %62 : vector<1x512xf32> to vector<8x512xf32>
    %64 = arith.mulf %41, %63 : vector<8x512xf32>
    %65 = vector.broadcast %9 : vector<1x512xf32> to vector<8x512xf32>
    %66 = arith.mulf %65, %64 : vector<8x512xf32>
    %67 = arith.addf %40, %66 : vector<8x512xf32>
    %c19_i32 = arith.constant 19 : i32
    %68 = tpu.dynamic_rotate %0 by %c19_i32 dim 1 : vector<8x512xf32>, i32 -> vector<8x512xf32>
    %c-1_i32_19 = arith.constant -1 : i32
    %69 = vector.broadcast %c-1_i32_19 : i32 to vector<1x512xi32>
    %70 = arith.addi %7, %69 : vector<1x512xi32>
    %c0_i32_20 = arith.constant 0 : i32
    %71 = vector.broadcast %c0_i32_20 : i32 to vector<1x512xi32>
    %72 = arith.cmpi sge, %70, %71 : vector<1x512xi32>
    %c-1_i32_21 = arith.constant -1 : i32
    %73 = vector.broadcast %c-1_i32_21 : i32 to vector<1x512xi32>
    %74 = arith.addi %7, %73 : vector<1x512xi32>
    %c16_i32_22 = arith.constant 16 : i32
    %75 = vector.broadcast %c16_i32_22 : i32 to vector<1x512xi32>
    %76 = arith.cmpi slt, %74, %75 : vector<1x512xi32>
    %77 = arith.andi %72, %76 : vector<1x512xi1>
    %c-3_i32 = arith.constant -3 : i32
    %78 = vector.broadcast %c-3_i32 : i32 to vector<1x512xi32>
    %79 = arith.addi %3, %78 : vector<1x512xi32>
    %c0_i32_23 = arith.constant 0 : i32
    %80 = vector.broadcast %c0_i32_23 : i32 to vector<1x512xi32>
    %81 = arith.cmpi sge, %79, %80 : vector<1x512xi32>
    %82 = arith.andi %77, %81 : vector<1x512xi1>
    %c-3_i32_24 = arith.constant -3 : i32
    %83 = vector.broadcast %c-3_i32_24 : i32 to vector<1x512xi32>
    %84 = arith.addi %3, %83 : vector<1x512xi32>
    %c16_i32_25 = arith.constant 16 : i32
    %85 = vector.broadcast %c16_i32_25 : i32 to vector<1x512xi32>
    %86 = arith.cmpi slt, %84, %85 : vector<1x512xi32>
    %87 = arith.andi %82, %86 : vector<1x512xi1>
    %88 = arith.extui %87 : vector<1x512xi1> to vector<1x512xi32>
    %89 = arith.sitofp %88 : vector<1x512xi32> to vector<1x512xf32>
    %90 = vector.broadcast %89 : vector<1x512xf32> to vector<8x512xf32>
    %91 = arith.mulf %68, %90 : vector<8x512xf32>
    %92 = vector.broadcast %10 : vector<1x512xf32> to vector<8x512xf32>
    %93 = arith.mulf %92, %91 : vector<8x512xf32>
    %94 = arith.addf %67, %93 : vector<8x512xf32>
    %c20_i32 = arith.constant 20 : i32
    %95 = tpu.dynamic_rotate %0 by %c20_i32 dim 1 : vector<8x512xf32>, i32 -> vector<8x512xf32>
    %c-1_i32_26 = arith.constant -1 : i32
    %96 = vector.broadcast %c-1_i32_26 : i32 to vector<1x512xi32>
    %97 = arith.addi %7, %96 : vector<1x512xi32>
    %c0_i32_27 = arith.constant 0 : i32
    %98 = vector.broadcast %c0_i32_27 : i32 to vector<1x512xi32>
    %99 = arith.cmpi sge, %97, %98 : vector<1x512xi32>
    %c-1_i32_28 = arith.constant -1 : i32
    %100 = vector.broadcast %c-1_i32_28 : i32 to vector<1x512xi32>
    %101 = arith.addi %7, %100 : vector<1x512xi32>
    %c16_i32_29 = arith.constant 16 : i32
    %102 = vector.broadcast %c16_i32_29 : i32 to vector<1x512xi32>
    %103 = arith.cmpi slt, %101, %102 : vector<1x512xi32>
    %104 = arith.andi %99, %103 : vector<1x512xi1>
    %c-4_i32 = arith.constant -4 : i32
    %105 = vector.broadcast %c-4_i32 : i32 to vector<1x512xi32>
    %106 = arith.addi %3, %105 : vector<1x512xi32>
    %c0_i32_30 = arith.constant 0 : i32
    %107 = vector.broadcast %c0_i32_30 : i32 to vector<1x512xi32>
    %108 = arith.cmpi sge, %106, %107 : vector<1x512xi32>
    %109 = arith.andi %104, %108 : vector<1x512xi1>
    %c-4_i32_31 = arith.constant -4 : i32
    %110 = vector.broadcast %c-4_i32_31 : i32 to vector<1x512xi32>
    %111 = arith.addi %3, %110 : vector<1x512xi32>
    %c16_i32_32 = arith.constant 16 : i32
    %112 = vector.broadcast %c16_i32_32 : i32 to vector<1x512xi32>
    %113 = arith.cmpi slt, %111, %112 : vector<1x512xi32>
    %114 = arith.andi %109, %113 : vector<1x512xi1>
    %115 = arith.extui %114 : vector<1x512xi1> to vector<1x512xi32>
    %116 = arith.sitofp %115 : vector<1x512xi32> to vector<1x512xf32>
    %117 = vector.broadcast %116 : vector<1x512xf32> to vector<8x512xf32>
    %118 = arith.mulf %95, %117 : vector<8x512xf32>
    %119 = vector.broadcast %11 : vector<1x512xf32> to vector<8x512xf32>
    %120 = arith.mulf %119, %118 : vector<8x512xf32>
    %121 = arith.addf %94, %120 : vector<8x512xf32>
    %c0_33 = arith.constant 0 : index
    %c0_34 = arith.constant 0 : index
    %122 = vector.load %arg5[%c0_33, %c0_34] : memref<72x512xf32, #tpu.memory_space<vmem>>, vector<8x512xf32>
    tpu.vector_store %arg5[%c0_33, %c0_34], %121 {strides = array<i32>} : memref<72x512xf32, #tpu.memory_space<vmem>>, vector<8x512xf32>,
    %c16_i32_35 = arith.constant 16 : i32
    %123 = tpu.dynamic_rotate %0 by %c16_i32_35 dim 1 : vector<8x512xf32>, i32 -> vector<8x512xf32>
    %c-1_i32_36 = arith.constant -1 : i32
    %124 = vector.broadcast %c-1_i32_36 : i32 to vector<1x512xi32>
    %125 = arith.addi %7, %124 : vector<1x512xi32>
    %c0_i32_37 = arith.constant 0 : i32
    %126 = vector.broadcast %c0_i32_37 : i32 to vector<1x512xi32>
    %127 = arith.cmpi sge, %125, %126 : vector<1x512xi32>
    %c-1_i32_38 = arith.constant -1 : i32
    %128 = vector.broadcast %c-1_i32_38 : i32 to vector<1x512xi32>
    %129 = arith.addi %7, %128 : vector<1x512xi32>
    %c16_i32_39 = arith.constant 16 : i32
    %130 = vector.broadcast %c16_i32_39 : i32 to vector<1x512xi32>
    %131 = arith.cmpi slt, %129, %130 : vector<1x512xi32>
    %132 = arith.andi %127, %131 : vector<1x512xi1>
    %c0_i32_40 = arith.constant 0 : i32
    %133 = vector.broadcast %c0_i32_40 : i32 to vector<1x512xi32>
    %134 = arith.addi %3, %133 : vector<1x512xi32>
    %c0_i32_41 = arith.constant 0 : i32
    %135 = vector.broadcast %c0_i32_41 : i32 to vector<1x512xi32>
    %136 = arith.cmpi sge, %134, %135 : vector<1x512xi32>
    %137 = arith.andi %132, %136 : vector<1x512xi1>
    %c0_i32_42 = arith.constant 0 : i32
    %138 = vector.broadcast %c0_i32_42 : i32 to vector<1x512xi32>
    %139 = arith.addi %3, %138 : vector<1x512xi32>
    %c16_i32_43 = arith.constant 16 : i32
    %140 = vector.broadcast %c16_i32_43 : i32 to vector<1x512xi32>
    %141 = arith.cmpi slt, %139, %140 : vector<1x512xi32>
    %142 = arith.andi %137, %141 : vector<1x512xi1>
    %143 = arith.extui %142 : vector<1x512xi1> to vector<1x512xi32>
    %144 = arith.sitofp %143 : vector<1x512xi32> to vector<1x512xf32>
    %145 = vector.broadcast %144 : vector<1x512xf32> to vector<8x512xf32>
    %146 = arith.mulf %123, %145 : vector<8x512xf32>
    %147 = vector.broadcast %14 : vector<1x512xf32> to vector<8x512xf32>
    %148 = arith.mulf %147, %146 : vector<8x512xf32>
    %c8 = arith.constant 8 : index
    %c0_44 = arith.constant 0 : index
    %149 = vector.load %arg5[%c8, %c0_44] : memref<72x512xf32, #tpu.memory_space<vmem>>, vector<8x512xf32>
    tpu.vector_store %arg5[%c8, %c0_44], %148 {strides = array<i32>} : memref<72x512xf32, #tpu.memory_space<vmem>>, vector<8x512xf32>,
    %c15_i32_45 = arith.constant 15 : i32
    %150 = tpu.dynamic_rotate %0 by %c15_i32_45 dim 1 : vector<8x512xf32>, i32 -> vector<8x512xf32>
    %c-1_i32_46 = arith.constant -1 : i32
    %151 = vector.broadcast %c-1_i32_46 : i32 to vector<1x512xi32>
    %152 = arith.addi %7, %151 : vector<1x512xi32>
    %c0_i32_47 = arith.constant 0 : i32
    %153 = vector.broadcast %c0_i32_47 : i32 to vector<1x512xi32>
    %154 = arith.cmpi sge, %152, %153 : vector<1x512xi32>
    %c-1_i32_48 = arith.constant -1 : i32
    %155 = vector.broadcast %c-1_i32_48 : i32 to vector<1x512xi32>
    %156 = arith.addi %7, %155 : vector<1x512xi32>
    %c16_i32_49 = arith.constant 16 : i32
    %157 = vector.broadcast %c16_i32_49 : i32 to vector<1x512xi32>
    %158 = arith.cmpi slt, %156, %157 : vector<1x512xi32>
    %159 = arith.andi %154, %158 : vector<1x512xi1>
    %c1_i32 = arith.constant 1 : i32
    %160 = vector.broadcast %c1_i32 : i32 to vector<1x512xi32>
    %161 = arith.addi %3, %160 : vector<1x512xi32>
    %c0_i32_50 = arith.constant 0 : i32
    %162 = vector.broadcast %c0_i32_50 : i32 to vector<1x512xi32>
    %163 = arith.cmpi sge, %161, %162 : vector<1x512xi32>
    %164 = arith.andi %159, %163 : vector<1x512xi1>
    %c1_i32_51 = arith.constant 1 : i32
    %165 = vector.broadcast %c1_i32_51 : i32 to vector<1x512xi32>
    %166 = arith.addi %3, %165 : vector<1x512xi32>
    %c16_i32_52 = arith.constant 16 : i32
    %167 = vector.broadcast %c16_i32_52 : i32 to vector<1x512xi32>
    %168 = arith.cmpi slt, %166, %167 : vector<1x512xi32>
    %169 = arith.andi %164, %168 : vector<1x512xi1>
    %170 = arith.extui %169 : vector<1x512xi1> to vector<1x512xi32>
    %171 = arith.sitofp %170 : vector<1x512xi32> to vector<1x512xf32>
    %172 = vector.broadcast %171 : vector<1x512xf32> to vector<8x512xf32>
    %173 = arith.mulf %150, %172 : vector<8x512xf32>
    %174 = vector.broadcast %8 : vector<1x512xf32> to vector<8x512xf32>
    %175 = arith.mulf %174, %173 : vector<8x512xf32>
    %c14_i32 = arith.constant 14 : i32
    %176 = tpu.dynamic_rotate %0 by %c14_i32 dim 1 : vector<8x512xf32>, i32 -> vector<8x512xf32>
    %c-1_i32_53 = arith.constant -1 : i32
    %177 = vector.broadcast %c-1_i32_53 : i32 to vector<1x512xi32>
    %178 = arith.addi %7, %177 : vector<1x512xi32>
    %c0_i32_54 = arith.constant 0 : i32
    %179 = vector.broadcast %c0_i32_54 : i32 to vector<1x512xi32>
    %180 = arith.cmpi sge, %178, %179 : vector<1x512xi32>
    %c-1_i32_55 = arith.constant -1 : i32
    %181 = vector.broadcast %c-1_i32_55 : i32 to vector<1x512xi32>
    %182 = arith.addi %7, %181 : vector<1x512xi32>
    %c16_i32_56 = arith.constant 16 : i32
    %183 = vector.broadcast %c16_i32_56 : i32 to vector<1x512xi32>
    %184 = arith.cmpi slt, %182, %183 : vector<1x512xi32>
    %185 = arith.andi %180, %184 : vector<1x512xi1>
    %c2_i32 = arith.constant 2 : i32
    %186 = vector.broadcast %c2_i32 : i32 to vector<1x512xi32>
    %187 = arith.addi %3, %186 : vector<1x512xi32>
    %c0_i32_57 = arith.constant 0 : i32
    %188 = vector.broadcast %c0_i32_57 : i32 to vector<1x512xi32>
    %189 = arith.cmpi sge, %187, %188 : vector<1x512xi32>
    %190 = arith.andi %185, %189 : vector<1x512xi1>
    %c2_i32_58 = arith.constant 2 : i32
    %191 = vector.broadcast %c2_i32_58 : i32 to vector<1x512xi32>
    %192 = arith.addi %3, %191 : vector<1x512xi32>
    %c16_i32_59 = arith.constant 16 : i32
    %193 = vector.broadcast %c16_i32_59 : i32 to vector<1x512xi32>
    %194 = arith.cmpi slt, %192, %193 : vector<1x512xi32>
    %195 = arith.andi %190, %194 : vector<1x512xi1>
    %196 = arith.extui %195 : vector<1x512xi1> to vector<1x512xi32>
    %197 = arith.sitofp %196 : vector<1x512xi32> to vector<1x512xf32>
    %198 = vector.broadcast %197 : vector<1x512xf32> to vector<8x512xf32>
    %199 = arith.mulf %176, %198 : vector<8x512xf32>
    %200 = vector.broadcast %9 : vector<1x512xf32> to vector<8x512xf32>
    %201 = arith.mulf %200, %199 : vector<8x512xf32>
    %202 = arith.addf %175, %201 : vector<8x512xf32>
    %c13_i32 = arith.constant 13 : i32
    %203 = tpu.dynamic_rotate %0 by %c13_i32 dim 1 : vector<8x512xf32>, i32 -> vector<8x512xf32>
    %c-1_i32_60 = arith.constant -1 : i32
    %204 = vector.broadcast %c-1_i32_60 : i32 to vector<1x512xi32>
    %205 = arith.addi %7, %204 : vector<1x512xi32>
    %c0_i32_61 = arith.constant 0 : i32
    %206 = vector.broadcast %c0_i32_61 : i32 to vector<1x512xi32>
    %207 = arith.cmpi sge, %205, %206 : vector<1x512xi32>
    %c-1_i32_62 = arith.constant -1 : i32
    %208 = vector.broadcast %c-1_i32_62 : i32 to vector<1x512xi32>
    %209 = arith.addi %7, %208 : vector<1x512xi32>
    %c16_i32_63 = arith.constant 16 : i32
    %210 = vector.broadcast %c16_i32_63 : i32 to vector<1x512xi32>
    %211 = arith.cmpi slt, %209, %210 : vector<1x512xi32>
    %212 = arith.andi %207, %211 : vector<1x512xi1>
    %c3_i32 = arith.constant 3 : i32
    %213 = vector.broadcast %c3_i32 : i32 to vector<1x512xi32>
    %214 = arith.addi %3, %213 : vector<1x512xi32>
    %c0_i32_64 = arith.constant 0 : i32
    %215 = vector.broadcast %c0_i32_64 : i32 to vector<1x512xi32>
    %216 = arith.cmpi sge, %214, %215 : vector<1x512xi32>
    %217 = arith.andi %212, %216 : vector<1x512xi1>
    %c3_i32_65 = arith.constant 3 : i32
    %218 = vector.broadcast %c3_i32_65 : i32 to vector<1x512xi32>
    %219 = arith.addi %3, %218 : vector<1x512xi32>
    %c16_i32_66 = arith.constant 16 : i32
    %220 = vector.broadcast %c16_i32_66 : i32 to vector<1x512xi32>
    %221 = arith.cmpi slt, %219, %220 : vector<1x512xi32>
    %222 = arith.andi %217, %221 : vector<1x512xi1>
    %223 = arith.extui %222 : vector<1x512xi1> to vector<1x512xi32>
    %224 = arith.sitofp %223 : vector<1x512xi32> to vector<1x512xf32>
    %225 = vector.broadcast %224 : vector<1x512xf32> to vector<8x512xf32>
    %226 = arith.mulf %203, %225 : vector<8x512xf32>
    %227 = vector.broadcast %10 : vector<1x512xf32> to vector<8x512xf32>
    %228 = arith.mulf %227, %226 : vector<8x512xf32>
    %229 = arith.addf %202, %228 : vector<8x512xf32>
    %c12_i32 = arith.constant 12 : i32
    %230 = tpu.dynamic_rotate %0 by %c12_i32 dim 1 : vector<8x512xf32>, i32 -> vector<8x512xf32>
    %c-1_i32_67 = arith.constant -1 : i32
    %231 = vector.broadcast %c-1_i32_67 : i32 to vector<1x512xi32>
    %232 = arith.addi %7, %231 : vector<1x512xi32>
    %c0_i32_68 = arith.constant 0 : i32
    %233 = vector.broadcast %c0_i32_68 : i32 to vector<1x512xi32>
    %234 = arith.cmpi sge, %232, %233 : vector<1x512xi32>
    %c-1_i32_69 = arith.constant -1 : i32
    %235 = vector.broadcast %c-1_i32_69 : i32 to vector<1x512xi32>
    %236 = arith.addi %7, %235 : vector<1x512xi32>
    %c16_i32_70 = arith.constant 16 : i32
    %237 = vector.broadcast %c16_i32_70 : i32 to vector<1x512xi32>
    %238 = arith.cmpi slt, %236, %237 : vector<1x512xi32>
    %239 = arith.andi %234, %238 : vector<1x512xi1>
    %c4_i32_71 = arith.constant 4 : i32
    %240 = vector.broadcast %c4_i32_71 : i32 to vector<1x512xi32>
    %241 = arith.addi %3, %240 : vector<1x512xi32>
    %c0_i32_72 = arith.constant 0 : i32
    %242 = vector.broadcast %c0_i32_72 : i32 to vector<1x512xi32>
    %243 = arith.cmpi sge, %241, %242 : vector<1x512xi32>
    %244 = arith.andi %239, %243 : vector<1x512xi1>
    %c4_i32_73 = arith.constant 4 : i32
    %245 = vector.broadcast %c4_i32_73 : i32 to vector<1x512xi32>
    %246 = arith.addi %3, %245 : vector<1x512xi32>
    %c16_i32_74 = arith.constant 16 : i32
    %247 = vector.broadcast %c16_i32_74 : i32 to vector<1x512xi32>
    %248 = arith.cmpi slt, %246, %247 : vector<1x512xi32>
    %249 = arith.andi %244, %248 : vector<1x512xi1>
    %250 = arith.extui %249 : vector<1x512xi1> to vector<1x512xi32>
    %251 = arith.sitofp %250 : vector<1x512xi32> to vector<1x512xf32>
    %252 = vector.broadcast %251 : vector<1x512xf32> to vector<8x512xf32>
    %253 = arith.mulf %230, %252 : vector<8x512xf32>
    %254 = vector.broadcast %11 : vector<1x512xf32> to vector<8x512xf32>
    %255 = arith.mulf %254, %253 : vector<8x512xf32>
    %256 = arith.addf %229, %255 : vector<8x512xf32>
    %c16 = arith.constant 16 : index
    %c0_75 = arith.constant 0 : index
    %257 = vector.load %arg5[%c16, %c0_75] : memref<72x512xf32, #tpu.memory_space<vmem>>, vector<8x512xf32>
    tpu.vector_store %arg5[%c16, %c0_75], %256 {strides = array<i32>} : memref<72x512xf32, #tpu.memory_space<vmem>>, vector<8x512xf32>,
    %c1_i32_76 = arith.constant 1 : i32
    %258 = tpu.dynamic_rotate %0 by %c1_i32_76 dim 1 : vector<8x512xf32>, i32 -> vector<8x512xf32>
    %c0_i32_77 = arith.constant 0 : i32
    %259 = vector.broadcast %c0_i32_77 : i32 to vector<1x512xi32>
    %260 = arith.addi %7, %259 : vector<1x512xi32>
    %c0_i32_78 = arith.constant 0 : i32
    %261 = vector.broadcast %c0_i32_78 : i32 to vector<1x512xi32>
    %262 = arith.cmpi sge, %260, %261 : vector<1x512xi32>
    %c0_i32_79 = arith.constant 0 : i32
    %263 = vector.broadcast %c0_i32_79 : i32 to vector<1x512xi32>
    %264 = arith.addi %7, %263 : vector<1x512xi32>
    %c16_i32_80 = arith.constant 16 : i32
    %265 = vector.broadcast %c16_i32_80 : i32 to vector<1x512xi32>
    %266 = arith.cmpi slt, %264, %265 : vector<1x512xi32>
    %267 = arith.andi %262, %266 : vector<1x512xi1>
    %c-1_i32_81 = arith.constant -1 : i32
    %268 = vector.broadcast %c-1_i32_81 : i32 to vector<1x512xi32>
    %269 = arith.addi %3, %268 : vector<1x512xi32>
    %c0_i32_82 = arith.constant 0 : i32
    %270 = vector.broadcast %c0_i32_82 : i32 to vector<1x512xi32>
    %271 = arith.cmpi sge, %269, %270 : vector<1x512xi32>
    %272 = arith.andi %267, %271 : vector<1x512xi1>
    %c-1_i32_83 = arith.constant -1 : i32
    %273 = vector.broadcast %c-1_i32_83 : i32 to vector<1x512xi32>
    %274 = arith.addi %3, %273 : vector<1x512xi32>
    %c16_i32_84 = arith.constant 16 : i32
    %275 = vector.broadcast %c16_i32_84 : i32 to vector<1x512xi32>
    %276 = arith.cmpi slt, %274, %275 : vector<1x512xi32>
    %277 = arith.andi %272, %276 : vector<1x512xi1>
    %278 = arith.extui %277 : vector<1x512xi1> to vector<1x512xi32>
    %279 = arith.sitofp %278 : vector<1x512xi32> to vector<1x512xf32>
    %280 = vector.broadcast %279 : vector<1x512xf32> to vector<8x512xf32>
    %281 = arith.mulf %258, %280 : vector<8x512xf32>
    %282 = vector.broadcast %8 : vector<1x512xf32> to vector<8x512xf32>
    %283 = arith.mulf %282, %281 : vector<8x512xf32>
    %c2_i32_85 = arith.constant 2 : i32
    %284 = tpu.dynamic_rotate %0 by %c2_i32_85 dim 1 : vector<8x512xf32>, i32 -> vector<8x512xf32>
    %c0_i32_86 = arith.constant 0 : i32
    %285 = vector.broadcast %c0_i32_86 : i32 to vector<1x512xi32>
    %286 = arith.addi %7, %285 : vector<1x512xi32>
    %c0_i32_87 = arith.constant 0 : i32
    %287 = vector.broadcast %c0_i32_87 : i32 to vector<1x512xi32>
    %288 = arith.cmpi sge, %286, %287 : vector<1x512xi32>
    %c0_i32_88 = arith.constant 0 : i32
    %289 = vector.broadcast %c0_i32_88 : i32 to vector<1x512xi32>
    %290 = arith.addi %7, %289 : vector<1x512xi32>
    %c16_i32_89 = arith.constant 16 : i32
    %291 = vector.broadcast %c16_i32_89 : i32 to vector<1x512xi32>
    %292 = arith.cmpi slt, %290, %291 : vector<1x512xi32>
    %293 = arith.andi %288, %292 : vector<1x512xi1>
    %c-2_i32_90 = arith.constant -2 : i32
    %294 = vector.broadcast %c-2_i32_90 : i32 to vector<1x512xi32>
    %295 = arith.addi %3, %294 : vector<1x512xi32>
    %c0_i32_91 = arith.constant 0 : i32
    %296 = vector.broadcast %c0_i32_91 : i32 to vector<1x512xi32>
    %297 = arith.cmpi sge, %295, %296 : vector<1x512xi32>
    %298 = arith.andi %293, %297 : vector<1x512xi1>
    %c-2_i32_92 = arith.constant -2 : i32
    %299 = vector.broadcast %c-2_i32_92 : i32 to vector<1x512xi32>
    %300 = arith.addi %3, %299 : vector<1x512xi32>
    %c16_i32_93 = arith.constant 16 : i32
    %301 = vector.broadcast %c16_i32_93 : i32 to vector<1x512xi32>
    %302 = arith.cmpi slt, %300, %301 : vector<1x512xi32>
    %303 = arith.andi %298, %302 : vector<1x512xi1>
    %304 = arith.extui %303 : vector<1x512xi1> to vector<1x512xi32>
    %305 = arith.sitofp %304 : vector<1x512xi32> to vector<1x512xf32>
    %306 = vector.broadcast %305 : vector<1x512xf32> to vector<8x512xf32>
    %307 = arith.mulf %284, %306 : vector<8x512xf32>
    %308 = vector.broadcast %9 : vector<1x512xf32> to vector<8x512xf32>
    %309 = arith.mulf %308, %307 : vector<8x512xf32>
    %310 = arith.addf %283, %309 : vector<8x512xf32>
    %c3_i32_94 = arith.constant 3 : i32
    %311 = tpu.dynamic_rotate %0 by %c3_i32_94 dim 1 : vector<8x512xf32>, i32 -> vector<8x512xf32>
    %c0_i32_95 = arith.constant 0 : i32
    %312 = vector.broadcast %c0_i32_95 : i32 to vector<1x512xi32>
    %313 = arith.addi %7, %312 : vector<1x512xi32>
    %c0_i32_96 = arith.constant 0 : i32
    %314 = vector.broadcast %c0_i32_96 : i32 to vector<1x512xi32>
    %315 = arith.cmpi sge, %313, %314 : vector<1x512xi32>
    %c0_i32_97 = arith.constant 0 : i32
    %316 = vector.broadcast %c0_i32_97 : i32 to vector<1x512xi32>
    %317 = arith.addi %7, %316 : vector<1x512xi32>
    %c16_i32_98 = arith.constant 16 : i32
    %318 = vector.broadcast %c16_i32_98 : i32 to vector<1x512xi32>
    %319 = arith.cmpi slt, %317, %318 : vector<1x512xi32>
    %320 = arith.andi %315, %319 : vector<1x512xi1>
    %c-3_i32_99 = arith.constant -3 : i32
    %321 = vector.broadcast %c-3_i32_99 : i32 to vector<1x512xi32>
    %322 = arith.addi %3, %321 : vector<1x512xi32>
    %c0_i32_100 = arith.constant 0 : i32
    %323 = vector.broadcast %c0_i32_100 : i32 to vector<1x512xi32>
    %324 = arith.cmpi sge, %322, %323 : vector<1x512xi32>
    %325 = arith.andi %320, %324 : vector<1x512xi1>
    %c-3_i32_101 = arith.constant -3 : i32
    %326 = vector.broadcast %c-3_i32_101 : i32 to vector<1x512xi32>
    %327 = arith.addi %3, %326 : vector<1x512xi32>
    %c16_i32_102 = arith.constant 16 : i32
    %328 = vector.broadcast %c16_i32_102 : i32 to vector<1x512xi32>
    %329 = arith.cmpi slt, %327, %328 : vector<1x512xi32>
    %330 = arith.andi %325, %329 : vector<1x512xi1>
    %331 = arith.extui %330 : vector<1x512xi1> to vector<1x512xi32>
    %332 = arith.sitofp %331 : vector<1x512xi32> to vector<1x512xf32>
    %333 = vector.broadcast %332 : vector<1x512xf32> to vector<8x512xf32>
    %334 = arith.mulf %311, %333 : vector<8x512xf32>
    %335 = vector.broadcast %10 : vector<1x512xf32> to vector<8x512xf32>
    %336 = arith.mulf %335, %334 : vector<8x512xf32>
    %337 = arith.addf %310, %336 : vector<8x512xf32>
    %c4_i32_103 = arith.constant 4 : i32
    %338 = tpu.dynamic_rotate %0 by %c4_i32_103 dim 1 : vector<8x512xf32>, i32 -> vector<8x512xf32>
    %c0_i32_104 = arith.constant 0 : i32
    %339 = vector.broadcast %c0_i32_104 : i32 to vector<1x512xi32>
    %340 = arith.addi %7, %339 : vector<1x512xi32>
    %c0_i32_105 = arith.constant 0 : i32
    %341 = vector.broadcast %c0_i32_105 : i32 to vector<1x512xi32>
    %342 = arith.cmpi sge, %340, %341 : vector<1x512xi32>
    %c0_i32_106 = arith.constant 0 : i32
    %343 = vector.broadcast %c0_i32_106 : i32 to vector<1x512xi32>
    %344 = arith.addi %7, %343 : vector<1x512xi32>
    %c16_i32_107 = arith.constant 16 : i32
    %345 = vector.broadcast %c16_i32_107 : i32 to vector<1x512xi32>
    %346 = arith.cmpi slt, %344, %345 : vector<1x512xi32>
    %347 = arith.andi %342, %346 : vector<1x512xi1>
    %c-4_i32_108 = arith.constant -4 : i32
    %348 = vector.broadcast %c-4_i32_108 : i32 to vector<1x512xi32>
    %349 = arith.addi %3, %348 : vector<1x512xi32>
    %c0_i32_109 = arith.constant 0 : i32
    %350 = vector.broadcast %c0_i32_109 : i32 to vector<1x512xi32>
    %351 = arith.cmpi sge, %349, %350 : vector<1x512xi32>
    %352 = arith.andi %347, %351 : vector<1x512xi1>
    %c-4_i32_110 = arith.constant -4 : i32
    %353 = vector.broadcast %c-4_i32_110 : i32 to vector<1x512xi32>
    %354 = arith.addi %3, %353 : vector<1x512xi32>
    %c16_i32_111 = arith.constant 16 : i32
    %355 = vector.broadcast %c16_i32_111 : i32 to vector<1x512xi32>
    %356 = arith.cmpi slt, %354, %355 : vector<1x512xi32>
    %357 = arith.andi %352, %356 : vector<1x512xi1>
    %358 = arith.extui %357 : vector<1x512xi1> to vector<1x512xi32>
    %359 = arith.sitofp %358 : vector<1x512xi32> to vector<1x512xf32>
    %360 = vector.broadcast %359 : vector<1x512xf32> to vector<8x512xf32>
    %361 = arith.mulf %338, %360 : vector<8x512xf32>
    %362 = vector.broadcast %11 : vector<1x512xf32> to vector<8x512xf32>
    %363 = arith.mulf %362, %361 : vector<8x512xf32>
    %364 = arith.addf %337, %363 : vector<8x512xf32>
    %c24 = arith.constant 24 : index
    %c0_112 = arith.constant 0 : index
    %365 = vector.load %arg5[%c24, %c0_112] : memref<72x512xf32, #tpu.memory_space<vmem>>, vector<8x512xf32>
    tpu.vector_store %arg5[%c24, %c0_112], %364 {strides = array<i32>} : memref<72x512xf32, #tpu.memory_space<vmem>>, vector<8x512xf32>,
    %c0_i32_113 = arith.constant 0 : i32
    %366 = vector.broadcast %c0_i32_113 : i32 to vector<1x512xi32>
    %367 = arith.addi %7, %366 : vector<1x512xi32>
    %c0_i32_114 = arith.constant 0 : i32
    %368 = vector.broadcast %c0_i32_114 : i32 to vector<1x512xi32>
    %369 = arith.cmpi sge, %367, %368 : vector<1x512xi32>
    %c0_i32_115 = arith.constant 0 : i32
    %370 = vector.broadcast %c0_i32_115 : i32 to vector<1x512xi32>
    %371 = arith.addi %7, %370 : vector<1x512xi32>
    %c16_i32_116 = arith.constant 16 : i32
    %372 = vector.broadcast %c16_i32_116 : i32 to vector<1x512xi32>
    %373 = arith.cmpi slt, %371, %372 : vector<1x512xi32>
    %374 = arith.andi %369, %373 : vector<1x512xi1>
    %c0_i32_117 = arith.constant 0 : i32
    %375 = vector.broadcast %c0_i32_117 : i32 to vector<1x512xi32>
    %376 = arith.addi %3, %375 : vector<1x512xi32>
    %c0_i32_118 = arith.constant 0 : i32
    %377 = vector.broadcast %c0_i32_118 : i32 to vector<1x512xi32>
    %378 = arith.cmpi sge, %376, %377 : vector<1x512xi32>
    %379 = arith.andi %374, %378 : vector<1x512xi1>
    %c0_i32_119 = arith.constant 0 : i32
    %380 = vector.broadcast %c0_i32_119 : i32 to vector<1x512xi32>
    %381 = arith.addi %3, %380 : vector<1x512xi32>
    %c16_i32_120 = arith.constant 16 : i32
    %382 = vector.broadcast %c16_i32_120 : i32 to vector<1x512xi32>
    %383 = arith.cmpi slt, %381, %382 : vector<1x512xi32>
    %384 = arith.andi %379, %383 : vector<1x512xi1>
    %385 = arith.extui %384 : vector<1x512xi1> to vector<1x512xi32>
    %386 = arith.sitofp %385 : vector<1x512xi32> to vector<1x512xf32>
    %387 = vector.broadcast %386 : vector<1x512xf32> to vector<8x512xf32>
    %388 = arith.mulf %0, %387 : vector<8x512xf32>
    %389 = vector.broadcast %14 : vector<1x512xf32> to vector<8x512xf32>
    %390 = arith.mulf %389, %388 : vector<8x512xf32>
    %c32 = arith.constant 32 : index
    %c0_121 = arith.constant 0 : index
    %391 = vector.load %arg5[%c32, %c0_121] : memref<72x512xf32, #tpu.memory_space<vmem>>, vector<8x512xf32>
    tpu.vector_store %arg5[%c32, %c0_121], %390 {strides = array<i32>} : memref<72x512xf32, #tpu.memory_space<vmem>>, vector<8x512xf32>,
    %c511_i32 = arith.constant 511 : i32
    %392 = tpu.dynamic_rotate %0 by %c511_i32 dim 1 : vector<8x512xf32>, i32 -> vector<8x512xf32>
    %c0_i32_122 = arith.constant 0 : i32
    %393 = vector.broadcast %c0_i32_122 : i32 to vector<1x512xi32>
    %394 = arith.addi %7, %393 : vector<1x512xi32>
    %c0_i32_123 = arith.constant 0 : i32
    %395 = vector.broadcast %c0_i32_123 : i32 to vector<1x512xi32>
    %396 = arith.cmpi sge, %394, %395 : vector<1x512xi32>
    %c0_i32_124 = arith.constant 0 : i32
    %397 = vector.broadcast %c0_i32_124 : i32 to vector<1x512xi32>
    %398 = arith.addi %7, %397 : vector<1x512xi32>
    %c16_i32_125 = arith.constant 16 : i32
    %399 = vector.broadcast %c16_i32_125 : i32 to vector<1x512xi32>
    %400 = arith.cmpi slt, %398, %399 : vector<1x512xi32>
    %401 = arith.andi %396, %400 : vector<1x512xi1>
    %c1_i32_126 = arith.constant 1 : i32
    %402 = vector.broadcast %c1_i32_126 : i32 to vector<1x512xi32>
    %403 = arith.addi %3, %402 : vector<1x512xi32>
    %c0_i32_127 = arith.constant 0 : i32
    %404 = vector.broadcast %c0_i32_127 : i32 to vector<1x512xi32>
    %405 = arith.cmpi sge, %403, %404 : vector<1x512xi32>
    %406 = arith.andi %401, %405 : vector<1x512xi1>
    %c1_i32_128 = arith.constant 1 : i32
    %407 = vector.broadcast %c1_i32_128 : i32 to vector<1x512xi32>
    %408 = arith.addi %3, %407 : vector<1x512xi32>
    %c16_i32_129 = arith.constant 16 : i32
    %409 = vector.broadcast %c16_i32_129 : i32 to vector<1x512xi32>
    %410 = arith.cmpi slt, %408, %409 : vector<1x512xi32>
    %411 = arith.andi %406, %410 : vector<1x512xi1>
    %412 = arith.extui %411 : vector<1x512xi1> to vector<1x512xi32>
    %413 = arith.sitofp %412 : vector<1x512xi32> to vector<1x512xf32>
    %414 = vector.broadcast %413 : vector<1x512xf32> to vector<8x512xf32>
    %415 = arith.mulf %392, %414 : vector<8x512xf32>
    %416 = vector.broadcast %8 : vector<1x512xf32> to vector<8x512xf32>
    %417 = arith.mulf %416, %415 : vector<8x512xf32>
    %c510_i32 = arith.constant 510 : i32
    %418 = tpu.dynamic_rotate %0 by %c510_i32 dim 1 : vector<8x512xf32>, i32 -> vector<8x512xf32>
    %c0_i32_130 = arith.constant 0 : i32
    %419 = vector.broadcast %c0_i32_130 : i32 to vector<1x512xi32>
    %420 = arith.addi %7, %419 : vector<1x512xi32>
    %c0_i32_131 = arith.constant 0 : i32
    %421 = vector.broadcast %c0_i32_131 : i32 to vector<1x512xi32>
    %422 = arith.cmpi sge, %420, %421 : vector<1x512xi32>
    %c0_i32_132 = arith.constant 0 : i32
    %423 = vector.broadcast %c0_i32_132 : i32 to vector<1x512xi32>
    %424 = arith.addi %7, %423 : vector<1x512xi32>
    %c16_i32_133 = arith.constant 16 : i32
    %425 = vector.broadcast %c16_i32_133 : i32 to vector<1x512xi32>
    %426 = arith.cmpi slt, %424, %425 : vector<1x512xi32>
    %427 = arith.andi %422, %426 : vector<1x512xi1>
    %c2_i32_134 = arith.constant 2 : i32
    %428 = vector.broadcast %c2_i32_134 : i32 to vector<1x512xi32>
    %429 = arith.addi %3, %428 : vector<1x512xi32>
    %c0_i32_135 = arith.constant 0 : i32
    %430 = vector.broadcast %c0_i32_135 : i32 to vector<1x512xi32>
    %431 = arith.cmpi sge, %429, %430 : vector<1x512xi32>
    %432 = arith.andi %427, %431 : vector<1x512xi1>
    %c2_i32_136 = arith.constant 2 : i32
    %433 = vector.broadcast %c2_i32_136 : i32 to vector<1x512xi32>
    %434 = arith.addi %3, %433 : vector<1x512xi32>
    %c16_i32_137 = arith.constant 16 : i32
    %435 = vector.broadcast %c16_i32_137 : i32 to vector<1x512xi32>
    %436 = arith.cmpi slt, %434, %435 : vector<1x512xi32>
    %437 = arith.andi %432, %436 : vector<1x512xi1>
    %438 = arith.extui %437 : vector<1x512xi1> to vector<1x512xi32>
    %439 = arith.sitofp %438 : vector<1x512xi32> to vector<1x512xf32>
    %440 = vector.broadcast %439 : vector<1x512xf32> to vector<8x512xf32>
    %441 = arith.mulf %418, %440 : vector<8x512xf32>
    %442 = vector.broadcast %9 : vector<1x512xf32> to vector<8x512xf32>
    %443 = arith.mulf %442, %441 : vector<8x512xf32>
    %444 = arith.addf %417, %443 : vector<8x512xf32>
    %c509_i32 = arith.constant 509 : i32
    %445 = tpu.dynamic_rotate %0 by %c509_i32 dim 1 : vector<8x512xf32>, i32 -> vector<8x512xf32>
    %c0_i32_138 = arith.constant 0 : i32
    %446 = vector.broadcast %c0_i32_138 : i32 to vector<1x512xi32>
    %447 = arith.addi %7, %446 : vector<1x512xi32>
    %c0_i32_139 = arith.constant 0 : i32
    %448 = vector.broadcast %c0_i32_139 : i32 to vector<1x512xi32>
    %449 = arith.cmpi sge, %447, %448 : vector<1x512xi32>
    %c0_i32_140 = arith.constant 0 : i32
    %450 = vector.broadcast %c0_i32_140 : i32 to vector<1x512xi32>
    %451 = arith.addi %7, %450 : vector<1x512xi32>
    %c16_i32_141 = arith.constant 16 : i32
    %452 = vector.broadcast %c16_i32_141 : i32 to vector<1x512xi32>
    %453 = arith.cmpi slt, %451, %452 : vector<1x512xi32>
    %454 = arith.andi %449, %453 : vector<1x512xi1>
    %c3_i32_142 = arith.constant 3 : i32
    %455 = vector.broadcast %c3_i32_142 : i32 to vector<1x512xi32>
    %456 = arith.addi %3, %455 : vector<1x512xi32>
    %c0_i32_143 = arith.constant 0 : i32
    %457 = vector.broadcast %c0_i32_143 : i32 to vector<1x512xi32>
    %458 = arith.cmpi sge, %456, %457 : vector<1x512xi32>
    %459 = arith.andi %454, %458 : vector<1x512xi1>
    %c3_i32_144 = arith.constant 3 : i32
    %460 = vector.broadcast %c3_i32_144 : i32 to vector<1x512xi32>
    %461 = arith.addi %3, %460 : vector<1x512xi32>
    %c16_i32_145 = arith.constant 16 : i32
    %462 = vector.broadcast %c16_i32_145 : i32 to vector<1x512xi32>
    %463 = arith.cmpi slt, %461, %462 : vector<1x512xi32>
    %464 = arith.andi %459, %463 : vector<1x512xi1>
    %465 = arith.extui %464 : vector<1x512xi1> to vector<1x512xi32>
    %466 = arith.sitofp %465 : vector<1x512xi32> to vector<1x512xf32>
    %467 = vector.broadcast %466 : vector<1x512xf32> to vector<8x512xf32>
    %468 = arith.mulf %445, %467 : vector<8x512xf32>
    %469 = vector.broadcast %10 : vector<1x512xf32> to vector<8x512xf32>
    %470 = arith.mulf %469, %468 : vector<8x512xf32>
    %471 = arith.addf %444, %470 : vector<8x512xf32>
    %c508_i32 = arith.constant 508 : i32
    %472 = tpu.dynamic_rotate %0 by %c508_i32 dim 1 : vector<8x512xf32>, i32 -> vector<8x512xf32>
    %c0_i32_146 = arith.constant 0 : i32
    %473 = vector.broadcast %c0_i32_146 : i32 to vector<1x512xi32>
    %474 = arith.addi %7, %473 : vector<1x512xi32>
    %c0_i32_147 = arith.constant 0 : i32
    %475 = vector.broadcast %c0_i32_147 : i32 to vector<1x512xi32>
    %476 = arith.cmpi sge, %474, %475 : vector<1x512xi32>
    %c0_i32_148 = arith.constant 0 : i32
    %477 = vector.broadcast %c0_i32_148 : i32 to vector<1x512xi32>
    %478 = arith.addi %7, %477 : vector<1x512xi32>
    %c16_i32_149 = arith.constant 16 : i32
    %479 = vector.broadcast %c16_i32_149 : i32 to vector<1x512xi32>
    %480 = arith.cmpi slt, %478, %479 : vector<1x512xi32>
    %481 = arith.andi %476, %480 : vector<1x512xi1>
    %c4_i32_150 = arith.constant 4 : i32
    %482 = vector.broadcast %c4_i32_150 : i32 to vector<1x512xi32>
    %483 = arith.addi %3, %482 : vector<1x512xi32>
    %c0_i32_151 = arith.constant 0 : i32
    %484 = vector.broadcast %c0_i32_151 : i32 to vector<1x512xi32>
    %485 = arith.cmpi sge, %483, %484 : vector<1x512xi32>
    %486 = arith.andi %481, %485 : vector<1x512xi1>
    %c4_i32_152 = arith.constant 4 : i32
    %487 = vector.broadcast %c4_i32_152 : i32 to vector<1x512xi32>
    %488 = arith.addi %3, %487 : vector<1x512xi32>
    %c16_i32_153 = arith.constant 16 : i32
    %489 = vector.broadcast %c16_i32_153 : i32 to vector<1x512xi32>
    %490 = arith.cmpi slt, %488, %489 : vector<1x512xi32>
    %491 = arith.andi %486, %490 : vector<1x512xi1>
    %492 = arith.extui %491 : vector<1x512xi1> to vector<1x512xi32>
    %493 = arith.sitofp %492 : vector<1x512xi32> to vector<1x512xf32>
    %494 = vector.broadcast %493 : vector<1x512xf32> to vector<8x512xf32>
    %495 = arith.mulf %472, %494 : vector<8x512xf32>
    %496 = vector.broadcast %11 : vector<1x512xf32> to vector<8x512xf32>
    %497 = arith.mulf %496, %495 : vector<8x512xf32>
    %498 = arith.addf %471, %497 : vector<8x512xf32>
    %c40 = arith.constant 40 : index
    %c0_154 = arith.constant 0 : index
    %499 = vector.load %arg5[%c40, %c0_154] : memref<72x512xf32, #tpu.memory_space<vmem>>, vector<8x512xf32>
    tpu.vector_store %arg5[%c40, %c0_154], %498 {strides = array<i32>} : memref<72x512xf32, #tpu.memory_space<vmem>>, vector<8x512xf32>,
    %c497_i32 = arith.constant 497 : i32
    %500 = tpu.dynamic_rotate %0 by %c497_i32 dim 1 : vector<8x512xf32>, i32 -> vector<8x512xf32>
    %c1_i32_155 = arith.constant 1 : i32
    %501 = vector.broadcast %c1_i32_155 : i32 to vector<1x512xi32>
    %502 = arith.addi %7, %501 : vector<1x512xi32>
    %c0_i32_156 = arith.constant 0 : i32
    %503 = vector.broadcast %c0_i32_156 : i32 to vector<1x512xi32>
    %504 = arith.cmpi sge, %502, %503 : vector<1x512xi32>
    %c1_i32_157 = arith.constant 1 : i32
    %505 = vector.broadcast %c1_i32_157 : i32 to vector<1x512xi32>
    %506 = arith.addi %7, %505 : vector<1x512xi32>
    %c16_i32_158 = arith.constant 16 : i32
    %507 = vector.broadcast %c16_i32_158 : i32 to vector<1x512xi32>
    %508 = arith.cmpi slt, %506, %507 : vector<1x512xi32>
    %509 = arith.andi %504, %508 : vector<1x512xi1>
    %c-1_i32_159 = arith.constant -1 : i32
    %510 = vector.broadcast %c-1_i32_159 : i32 to vector<1x512xi32>
    %511 = arith.addi %3, %510 : vector<1x512xi32>
    %c0_i32_160 = arith.constant 0 : i32
    %512 = vector.broadcast %c0_i32_160 : i32 to vector<1x512xi32>
    %513 = arith.cmpi sge, %511, %512 : vector<1x512xi32>
    %514 = arith.andi %509, %513 : vector<1x512xi1>
    %c-1_i32_161 = arith.constant -1 : i32
    %515 = vector.broadcast %c-1_i32_161 : i32 to vector<1x512xi32>
    %516 = arith.addi %3, %515 : vector<1x512xi32>
    %c16_i32_162 = arith.constant 16 : i32
    %517 = vector.broadcast %c16_i32_162 : i32 to vector<1x512xi32>
    %518 = arith.cmpi slt, %516, %517 : vector<1x512xi32>
    %519 = arith.andi %514, %518 : vector<1x512xi1>
    %520 = arith.extui %519 : vector<1x512xi1> to vector<1x512xi32>
    %521 = arith.sitofp %520 : vector<1x512xi32> to vector<1x512xf32>
    %522 = vector.broadcast %521 : vector<1x512xf32> to vector<8x512xf32>
    %523 = arith.mulf %500, %522 : vector<8x512xf32>
    %524 = vector.broadcast %8 : vector<1x512xf32> to vector<8x512xf32>
    %525 = arith.mulf %524, %523 : vector<8x512xf32>
    %c498_i32 = arith.constant 498 : i32
    %526 = tpu.dynamic_rotate %0 by %c498_i32 dim 1 : vector<8x512xf32>, i32 -> vector<8x512xf32>
    %c1_i32_163 = arith.constant 1 : i32
    %527 = vector.broadcast %c1_i32_163 : i32 to vector<1x512xi32>
    %528 = arith.addi %7, %527 : vector<1x512xi32>
    %c0_i32_164 = arith.constant 0 : i32
    %529 = vector.broadcast %c0_i32_164 : i32 to vector<1x512xi32>
    %530 = arith.cmpi sge, %528, %529 : vector<1x512xi32>
    %c1_i32_165 = arith.constant 1 : i32
    %531 = vector.broadcast %c1_i32_165 : i32 to vector<1x512xi32>
    %532 = arith.addi %7, %531 : vector<1x512xi32>
    %c16_i32_166 = arith.constant 16 : i32
    %533 = vector.broadcast %c16_i32_166 : i32 to vector<1x512xi32>
    %534 = arith.cmpi slt, %532, %533 : vector<1x512xi32>
    %535 = arith.andi %530, %534 : vector<1x512xi1>
    %c-2_i32_167 = arith.constant -2 : i32
    %536 = vector.broadcast %c-2_i32_167 : i32 to vector<1x512xi32>
    %537 = arith.addi %3, %536 : vector<1x512xi32>
    %c0_i32_168 = arith.constant 0 : i32
    %538 = vector.broadcast %c0_i32_168 : i32 to vector<1x512xi32>
    %539 = arith.cmpi sge, %537, %538 : vector<1x512xi32>
    %540 = arith.andi %535, %539 : vector<1x512xi1>
    %c-2_i32_169 = arith.constant -2 : i32
    %541 = vector.broadcast %c-2_i32_169 : i32 to vector<1x512xi32>
    %542 = arith.addi %3, %541 : vector<1x512xi32>
    %c16_i32_170 = arith.constant 16 : i32
    %543 = vector.broadcast %c16_i32_170 : i32 to vector<1x512xi32>
    %544 = arith.cmpi slt, %542, %543 : vector<1x512xi32>
    %545 = arith.andi %540, %544 : vector<1x512xi1>
    %546 = arith.extui %545 : vector<1x512xi1> to vector<1x512xi32>
    %547 = arith.sitofp %546 : vector<1x512xi32> to vector<1x512xf32>
    %548 = vector.broadcast %547 : vector<1x512xf32> to vector<8x512xf32>
    %549 = arith.mulf %526, %548 : vector<8x512xf32>
    %550 = vector.broadcast %9 : vector<1x512xf32> to vector<8x512xf32>
    %551 = arith.mulf %550, %549 : vector<8x512xf32>
    %552 = arith.addf %525, %551 : vector<8x512xf32>
    %c499_i32 = arith.constant 499 : i32
    %553 = tpu.dynamic_rotate %0 by %c499_i32 dim 1 : vector<8x512xf32>, i32 -> vector<8x512xf32>
    %c1_i32_171 = arith.constant 1 : i32
    %554 = vector.broadcast %c1_i32_171 : i32 to vector<1x512xi32>
    %555 = arith.addi %7, %554 : vector<1x512xi32>
    %c0_i32_172 = arith.constant 0 : i32
    %556 = vector.broadcast %c0_i32_172 : i32 to vector<1x512xi32>
    %557 = arith.cmpi sge, %555, %556 : vector<1x512xi32>
    %c1_i32_173 = arith.constant 1 : i32
    %558 = vector.broadcast %c1_i32_173 : i32 to vector<1x512xi32>
    %559 = arith.addi %7, %558 : vector<1x512xi32>
    %c16_i32_174 = arith.constant 16 : i32
    %560 = vector.broadcast %c16_i32_174 : i32 to vector<1x512xi32>
    %561 = arith.cmpi slt, %559, %560 : vector<1x512xi32>
    %562 = arith.andi %557, %561 : vector<1x512xi1>
    %c-3_i32_175 = arith.constant -3 : i32
    %563 = vector.broadcast %c-3_i32_175 : i32 to vector<1x512xi32>
    %564 = arith.addi %3, %563 : vector<1x512xi32>
    %c0_i32_176 = arith.constant 0 : i32
    %565 = vector.broadcast %c0_i32_176 : i32 to vector<1x512xi32>
    %566 = arith.cmpi sge, %564, %565 : vector<1x512xi32>
    %567 = arith.andi %562, %566 : vector<1x512xi1>
    %c-3_i32_177 = arith.constant -3 : i32
    %568 = vector.broadcast %c-3_i32_177 : i32 to vector<1x512xi32>
    %569 = arith.addi %3, %568 : vector<1x512xi32>
    %c16_i32_178 = arith.constant 16 : i32
    %570 = vector.broadcast %c16_i32_178 : i32 to vector<1x512xi32>
    %571 = arith.cmpi slt, %569, %570 : vector<1x512xi32>
    %572 = arith.andi %567, %571 : vector<1x512xi1>
    %573 = arith.extui %572 : vector<1x512xi1> to vector<1x512xi32>
    %574 = arith.sitofp %573 : vector<1x512xi32> to vector<1x512xf32>
    %575 = vector.broadcast %574 : vector<1x512xf32> to vector<8x512xf32>
    %576 = arith.mulf %553, %575 : vector<8x512xf32>
    %577 = vector.broadcast %10 : vector<1x512xf32> to vector<8x512xf32>
    %578 = arith.mulf %577, %576 : vector<8x512xf32>
    %579 = arith.addf %552, %578 : vector<8x512xf32>
    %c500_i32 = arith.constant 500 : i32
    %580 = tpu.dynamic_rotate %0 by %c500_i32 dim 1 : vector<8x512xf32>, i32 -> vector<8x512xf32>
    %c1_i32_179 = arith.constant 1 : i32
    %581 = vector.broadcast %c1_i32_179 : i32 to vector<1x512xi32>
    %582 = arith.addi %7, %581 : vector<1x512xi32>
    %c0_i32_180 = arith.constant 0 : i32
    %583 = vector.broadcast %c0_i32_180 : i32 to vector<1x512xi32>
    %584 = arith.cmpi sge, %582, %583 : vector<1x512xi32>
    %c1_i32_181 = arith.constant 1 : i32
    %585 = vector.broadcast %c1_i32_181 : i32 to vector<1x512xi32>
    %586 = arith.addi %7, %585 : vector<1x512xi32>
    %c16_i32_182 = arith.constant 16 : i32
    %587 = vector.broadcast %c16_i32_182 : i32 to vector<1x512xi32>
    %588 = arith.cmpi slt, %586, %587 : vector<1x512xi32>
    %589 = arith.andi %584, %588 : vector<1x512xi1>
    %c-4_i32_183 = arith.constant -4 : i32
    %590 = vector.broadcast %c-4_i32_183 : i32 to vector<1x512xi32>
    %591 = arith.addi %3, %590 : vector<1x512xi32>
    %c0_i32_184 = arith.constant 0 : i32
    %592 = vector.broadcast %c0_i32_184 : i32 to vector<1x512xi32>
    %593 = arith.cmpi sge, %591, %592 : vector<1x512xi32>
    %594 = arith.andi %589, %593 : vector<1x512xi1>
    %c-4_i32_185 = arith.constant -4 : i32
    %595 = vector.broadcast %c-4_i32_185 : i32 to vector<1x512xi32>
    %596 = arith.addi %3, %595 : vector<1x512xi32>
    %c16_i32_186 = arith.constant 16 : i32
    %597 = vector.broadcast %c16_i32_186 : i32 to vector<1x512xi32>
    %598 = arith.cmpi slt, %596, %597 : vector<1x512xi32>
    %599 = arith.andi %594, %598 : vector<1x512xi1>
    %600 = arith.extui %599 : vector<1x512xi1> to vector<1x512xi32>
    %601 = arith.sitofp %600 : vector<1x512xi32> to vector<1x512xf32>
    %602 = vector.broadcast %601 : vector<1x512xf32> to vector<8x512xf32>
    %603 = arith.mulf %580, %602 : vector<8x512xf32>
    %604 = vector.broadcast %11 : vector<1x512xf32> to vector<8x512xf32>
    %605 = arith.mulf %604, %603 : vector<8x512xf32>
    %606 = arith.addf %579, %605 : vector<8x512xf32>
    %c48 = arith.constant 48 : index
    %c0_187 = arith.constant 0 : index
    %607 = vector.load %arg5[%c48, %c0_187] : memref<72x512xf32, #tpu.memory_space<vmem>>, vector<8x512xf32>
    tpu.vector_store %arg5[%c48, %c0_187], %606 {strides = array<i32>} : memref<72x512xf32, #tpu.memory_space<vmem>>, vector<8x512xf32>,
    %c496_i32 = arith.constant 496 : i32
    %608 = tpu.dynamic_rotate %0 by %c496_i32 dim 1 : vector<8x512xf32>, i32 -> vector<8x512xf32>
    %c1_i32_188 = arith.constant 1 : i32
    %609 = vector.broadcast %c1_i32_188 : i32 to vector<1x512xi32>
    %610 = arith.addi %7, %609 : vector<1x512xi32>
    %c0_i32_189 = arith.constant 0 : i32
    %611 = vector.broadcast %c0_i32_189 : i32 to vector<1x512xi32>
    %612 = arith.cmpi sge, %610, %611 : vector<1x512xi32>
    %c1_i32_190 = arith.constant 1 : i32
    %613 = vector.broadcast %c1_i32_190 : i32 to vector<1x512xi32>
    %614 = arith.addi %7, %613 : vector<1x512xi32>
    %c16_i32_191 = arith.constant 16 : i32
    %615 = vector.broadcast %c16_i32_191 : i32 to vector<1x512xi32>
    %616 = arith.cmpi slt, %614, %615 : vector<1x512xi32>
    %617 = arith.andi %612, %616 : vector<1x512xi1>
    %c0_i32_192 = arith.constant 0 : i32
    %618 = vector.broadcast %c0_i32_192 : i32 to vector<1x512xi32>
    %619 = arith.addi %3, %618 : vector<1x512xi32>
    %c0_i32_193 = arith.constant 0 : i32
    %620 = vector.broadcast %c0_i32_193 : i32 to vector<1x512xi32>
    %621 = arith.cmpi sge, %619, %620 : vector<1x512xi32>
    %622 = arith.andi %617, %621 : vector<1x512xi1>
    %c0_i32_194 = arith.constant 0 : i32
    %623 = vector.broadcast %c0_i32_194 : i32 to vector<1x512xi32>
    %624 = arith.addi %3, %623 : vector<1x512xi32>
    %c16_i32_195 = arith.constant 16 : i32
    %625 = vector.broadcast %c16_i32_195 : i32 to vector<1x512xi32>
    %626 = arith.cmpi slt, %624, %625 : vector<1x512xi32>
    %627 = arith.andi %622, %626 : vector<1x512xi1>
    %628 = arith.extui %627 : vector<1x512xi1> to vector<1x512xi32>
    %629 = arith.sitofp %628 : vector<1x512xi32> to vector<1x512xf32>
    %630 = vector.broadcast %629 : vector<1x512xf32> to vector<8x512xf32>
    %631 = arith.mulf %608, %630 : vector<8x512xf32>
    %632 = vector.broadcast %14 : vector<1x512xf32> to vector<8x512xf32>
    %633 = arith.mulf %632, %631 : vector<8x512xf32>
    %c56 = arith.constant 56 : index
    %c0_196 = arith.constant 0 : index
    %634 = vector.load %arg5[%c56, %c0_196] : memref<72x512xf32, #tpu.memory_space<vmem>>, vector<8x512xf32>
    tpu.vector_store %arg5[%c56, %c0_196], %633 {strides = array<i32>} : memref<72x512xf32, #tpu.memory_space<vmem>>, vector<8x512xf32>,
    %c495_i32 = arith.constant 495 : i32
    %635 = tpu.dynamic_rotate %0 by %c495_i32 dim 1 : vector<8x512xf32>, i32 -> vector<8x512xf32>
    %c1_i32_197 = arith.constant 1 : i32
    %636 = vector.broadcast %c1_i32_197 : i32 to vector<1x512xi32>
    %637 = arith.addi %7, %636 : vector<1x512xi32>
    %c0_i32_198 = arith.constant 0 : i32
    %638 = vector.broadcast %c0_i32_198 : i32 to vector<1x512xi32>
    %639 = arith.cmpi sge, %637, %638 : vector<1x512xi32>
    %c1_i32_199 = arith.constant 1 : i32
    %640 = vector.broadcast %c1_i32_199 : i32 to vector<1x512xi32>
    %641 = arith.addi %7, %640 : vector<1x512xi32>
    %c16_i32_200 = arith.constant 16 : i32
    %642 = vector.broadcast %c16_i32_200 : i32 to vector<1x512xi32>
    %643 = arith.cmpi slt, %641, %642 : vector<1x512xi32>
    %644 = arith.andi %639, %643 : vector<1x512xi1>
    %c1_i32_201 = arith.constant 1 : i32
    %645 = vector.broadcast %c1_i32_201 : i32 to vector<1x512xi32>
    %646 = arith.addi %3, %645 : vector<1x512xi32>
    %c0_i32_202 = arith.constant 0 : i32
    %647 = vector.broadcast %c0_i32_202 : i32 to vector<1x512xi32>
    %648 = arith.cmpi sge, %646, %647 : vector<1x512xi32>
    %649 = arith.andi %644, %648 : vector<1x512xi1>
    %c1_i32_203 = arith.constant 1 : i32
    %650 = vector.broadcast %c1_i32_203 : i32 to vector<1x512xi32>
    %651 = arith.addi %3, %650 : vector<1x512xi32>
    %c16_i32_204 = arith.constant 16 : i32
    %652 = vector.broadcast %c16_i32_204 : i32 to vector<1x512xi32>
    %653 = arith.cmpi slt, %651, %652 : vector<1x512xi32>
    %654 = arith.andi %649, %653 : vector<1x512xi1>
    %655 = arith.extui %654 : vector<1x512xi1> to vector<1x512xi32>
    %656 = arith.sitofp %655 : vector<1x512xi32> to vector<1x512xf32>
    %657 = vector.broadcast %656 : vector<1x512xf32> to vector<8x512xf32>
    %658 = arith.mulf %635, %657 : vector<8x512xf32>
    %659 = vector.broadcast %8 : vector<1x512xf32> to vector<8x512xf32>
    %660 = arith.mulf %659, %658 : vector<8x512xf32>
    %c494_i32 = arith.constant 494 : i32
    %661 = tpu.dynamic_rotate %0 by %c494_i32 dim 1 : vector<8x512xf32>, i32 -> vector<8x512xf32>
    %c1_i32_205 = arith.constant 1 : i32
    %662 = vector.broadcast %c1_i32_205 : i32 to vector<1x512xi32>
    %663 = arith.addi %7, %662 : vector<1x512xi32>
    %c0_i32_206 = arith.constant 0 : i32
    %664 = vector.broadcast %c0_i32_206 : i32 to vector<1x512xi32>
    %665 = arith.cmpi sge, %663, %664 : vector<1x512xi32>
    %c1_i32_207 = arith.constant 1 : i32
    %666 = vector.broadcast %c1_i32_207 : i32 to vector<1x512xi32>
    %667 = arith.addi %7, %666 : vector<1x512xi32>
    %c16_i32_208 = arith.constant 16 : i32
    %668 = vector.broadcast %c16_i32_208 : i32 to vector<1x512xi32>
    %669 = arith.cmpi slt, %667, %668 : vector<1x512xi32>
    %670 = arith.andi %665, %669 : vector<1x512xi1>
    %c2_i32_209 = arith.constant 2 : i32
    %671 = vector.broadcast %c2_i32_209 : i32 to vector<1x512xi32>
    %672 = arith.addi %3, %671 : vector<1x512xi32>
    %c0_i32_210 = arith.constant 0 : i32
    %673 = vector.broadcast %c0_i32_210 : i32 to vector<1x512xi32>
    %674 = arith.cmpi sge, %672, %673 : vector<1x512xi32>
    %675 = arith.andi %670, %674 : vector<1x512xi1>
    %c2_i32_211 = arith.constant 2 : i32
    %676 = vector.broadcast %c2_i32_211 : i32 to vector<1x512xi32>
    %677 = arith.addi %3, %676 : vector<1x512xi32>
    %c16_i32_212 = arith.constant 16 : i32
    %678 = vector.broadcast %c16_i32_212 : i32 to vector<1x512xi32>
    %679 = arith.cmpi slt, %677, %678 : vector<1x512xi32>
    %680 = arith.andi %675, %679 : vector<1x512xi1>
    %681 = arith.extui %680 : vector<1x512xi1> to vector<1x512xi32>
    %682 = arith.sitofp %681 : vector<1x512xi32> to vector<1x512xf32>
    %683 = vector.broadcast %682 : vector<1x512xf32> to vector<8x512xf32>
    %684 = arith.mulf %661, %683 : vector<8x512xf32>
    %685 = vector.broadcast %9 : vector<1x512xf32> to vector<8x512xf32>
    %686 = arith.mulf %685, %684 : vector<8x512xf32>
    %687 = arith.addf %660, %686 : vector<8x512xf32>
    %c493_i32 = arith.constant 493 : i32
    %688 = tpu.dynamic_rotate %0 by %c493_i32 dim 1 : vector<8x512xf32>, i32 -> vector<8x512xf32>
    %c1_i32_213 = arith.constant 1 : i32
    %689 = vector.broadcast %c1_i32_213 : i32 to vector<1x512xi32>
    %690 = arith.addi %7, %689 : vector<1x512xi32>
    %c0_i32_214 = arith.constant 0 : i32
    %691 = vector.broadcast %c0_i32_214 : i32 to vector<1x512xi32>
    %692 = arith.cmpi sge, %690, %691 : vector<1x512xi32>
    %c1_i32_215 = arith.constant 1 : i32
    %693 = vector.broadcast %c1_i32_215 : i32 to vector<1x512xi32>
    %694 = arith.addi %7, %693 : vector<1x512xi32>
    %c16_i32_216 = arith.constant 16 : i32
    %695 = vector.broadcast %c16_i32_216 : i32 to vector<1x512xi32>
    %696 = arith.cmpi slt, %694, %695 : vector<1x512xi32>
    %697 = arith.andi %692, %696 : vector<1x512xi1>
    %c3_i32_217 = arith.constant 3 : i32
    %698 = vector.broadcast %c3_i32_217 : i32 to vector<1x512xi32>
    %699 = arith.addi %3, %698 : vector<1x512xi32>
    %c0_i32_218 = arith.constant 0 : i32
    %700 = vector.broadcast %c0_i32_218 : i32 to vector<1x512xi32>
    %701 = arith.cmpi sge, %699, %700 : vector<1x512xi32>
    %702 = arith.andi %697, %701 : vector<1x512xi1>
    %c3_i32_219 = arith.constant 3 : i32
    %703 = vector.broadcast %c3_i32_219 : i32 to vector<1x512xi32>
    %704 = arith.addi %3, %703 : vector<1x512xi32>
    %c16_i32_220 = arith.constant 16 : i32
    %705 = vector.broadcast %c16_i32_220 : i32 to vector<1x512xi32>
    %706 = arith.cmpi slt, %704, %705 : vector<1x512xi32>
    %707 = arith.andi %702, %706 : vector<1x512xi1>
    %708 = arith.extui %707 : vector<1x512xi1> to vector<1x512xi32>
    %709 = arith.sitofp %708 : vector<1x512xi32> to vector<1x512xf32>
    %710 = vector.broadcast %709 : vector<1x512xf32> to vector<8x512xf32>
    %711 = arith.mulf %688, %710 : vector<8x512xf32>
    %712 = vector.broadcast %10 : vector<1x512xf32> to vector<8x512xf32>
    %713 = arith.mulf %712, %711 : vector<8x512xf32>
    %714 = arith.addf %687, %713 : vector<8x512xf32>
    %c492_i32 = arith.constant 492 : i32
    %715 = tpu.dynamic_rotate %0 by %c492_i32 dim 1 : vector<8x512xf32>, i32 -> vector<8x512xf32>
    %c1_i32_221 = arith.constant 1 : i32
    %716 = vector.broadcast %c1_i32_221 : i32 to vector<1x512xi32>
    %717 = arith.addi %7, %716 : vector<1x512xi32>
    %c0_i32_222 = arith.constant 0 : i32
    %718 = vector.broadcast %c0_i32_222 : i32 to vector<1x512xi32>
    %719 = arith.cmpi sge, %717, %718 : vector<1x512xi32>
    %c1_i32_223 = arith.constant 1 : i32
    %720 = vector.broadcast %c1_i32_223 : i32 to vector<1x512xi32>
    %721 = arith.addi %7, %720 : vector<1x512xi32>
    %c16_i32_224 = arith.constant 16 : i32
    %722 = vector.broadcast %c16_i32_224 : i32 to vector<1x512xi32>
    %723 = arith.cmpi slt, %721, %722 : vector<1x512xi32>
    %724 = arith.andi %719, %723 : vector<1x512xi1>
    %c4_i32_225 = arith.constant 4 : i32
    %725 = vector.broadcast %c4_i32_225 : i32 to vector<1x512xi32>
    %726 = arith.addi %3, %725 : vector<1x512xi32>
    %c0_i32_226 = arith.constant 0 : i32
    %727 = vector.broadcast %c0_i32_226 : i32 to vector<1x512xi32>
    %728 = arith.cmpi sge, %726, %727 : vector<1x512xi32>
    %729 = arith.andi %724, %728 : vector<1x512xi1>
    %c4_i32_227 = arith.constant 4 : i32
    %730 = vector.broadcast %c4_i32_227 : i32 to vector<1x512xi32>
    %731 = arith.addi %3, %730 : vector<1x512xi32>
    %c16_i32_228 = arith.constant 16 : i32
    %732 = vector.broadcast %c16_i32_228 : i32 to vector<1x512xi32>
    %733 = arith.cmpi slt, %731, %732 : vector<1x512xi32>
    %734 = arith.andi %729, %733 : vector<1x512xi1>
    %735 = arith.extui %734 : vector<1x512xi1> to vector<1x512xi32>
    %736 = arith.sitofp %735 : vector<1x512xi32> to vector<1x512xf32>
    %737 = vector.broadcast %736 : vector<1x512xf32> to vector<8x512xf32>
    %738 = arith.mulf %715, %737 : vector<8x512xf32>
    %739 = vector.broadcast %11 : vector<1x512xf32> to vector<8x512xf32>
    %740 = arith.mulf %739, %738 : vector<8x512xf32>
    %741 = arith.addf %714, %740 : vector<8x512xf32>
    %c64 = arith.constant 64 : index
    %c0_229 = arith.constant 0 : index
    %742 = vector.load %arg5[%c64, %c0_229] : memref<72x512xf32, #tpu.memory_space<vmem>>, vector<8x512xf32>
    tpu.vector_store %arg5[%c64, %c0_229], %741 {strides = array<i32>} : memref<72x512xf32, #tpu.memory_space<vmem>>, vector<8x512xf32>,
    %c0_230 = arith.constant 0 : index
    %c0_231 = arith.constant 0 : index
    %743 = vector.load %arg2[%c0_230, %c0_231] : memref<4x72xf32, #tpu.memory_space<vmem>>, vector<4x72xf32>
    %c0_232 = arith.constant 0 : index
    %c0_233 = arith.constant 0 : index
    %744 = vector.load %arg5[%c0_232, %c0_233] : memref<72x512xf32, #tpu.memory_space<vmem>>, vector<72x512xf32>
    %cst = arith.constant dense<0.000000e+00> : vector<4x512xf32>
    %745 = tpu.matmul %743, %744, %cst {dimension_numbers = #tpu.dot_dimension_numbers<[1], [0], [0], [1], [0, 0, 1, 1], [], []>} : vector<4x72xf32>, vector<72x512xf32>, vector<4x512xf32> -> vector<4x512xf32>
    %c0_234 = arith.constant 0 : index
    %c0_235 = arith.constant 0 : index
    %746 = vector.load %arg3[%c0_234, %c0_235] : memref<4x1xf32, #tpu.memory_space<vmem>>, vector<4x1xf32>
    %747 = vector.broadcast %746 : vector<4x1xf32> to vector<4x512xf32>
    %748 = vector.broadcast %14 : vector<1x512xf32> to vector<4x512xf32>
    %749 = arith.mulf %747, %748 : vector<4x512xf32>
    %750 = arith.addf %745, %749 : vector<4x512xf32>
    %c0_236 = arith.constant 0 : index
    %c0_237 = arith.constant 0 : index
    %751 = vector.load %arg4[%c0_236, %c0_237] : memref<4x512xf32, #tpu.memory_space<vmem>>, vector<4x512xf32>
    tpu.vector_store %arg4[%c0_236, %c0_237], %750 {strides = array<i32>} : memref<4x512xf32, #tpu.memory_space<vmem>>, vector<4x512xf32>,
    return
  }
}

</mosaic_0001>

<bundles_post_ra>
// kernel: run.1
= control target key start
LH: loop header
LB: loop body
LE: loop exit
PB: predicated region body
PF: predicated region fallthrough
CT: control target
= control target key end

     0   :  { %v4067_v2 = vmov 0.0   ;;  %s1749_s19 = smov 111   ;;  %s1750_s24 = smov 110   ;;  %v21_v5 = vlaneseq  ;;  %v4231_v46 = vmov 0  ;;  %s4032_s0 = inlined_call_operand.vmem [shape: f32[8,512], index: 0, kind: input, shape index: {}]   ;;  %s4033_s1 = inlined_call_operand.vmem [shape: f32[4,512], index: 1, kind: input, shape index: {}]   ;;  %s4034_s3 = inlined_call_operand.vmem [shape: f32[4,1], index: 3, kind: input, shape index: {}]   ;;  %s4035_s2 = inlined_call_operand.vmem [shape: f32[4,72], index: 2, kind: input, shape index: {}]   ;;  %s4036_s4 = inlined_call_operand.vmem [shape: f32[4,512], index: 4, kind: output, shape index: {}]  }
   0x1   :  { %v1804_v0 = vld [vmem:[%s4032_s0 + $0x10] sm:$0xff]  ;;  %v1809_v1 = vld [vmem:[%s4032_s0] sm:$0xff]  ;;  %1510 = vmatprep.mubr.f32.mxu0 %v4067_v2  ;;  %1581 = vmatprep.mubr.f32.mxu1 %v4067_v2  ;;  %v1818_v3 = vld [vmem:[%s4032_s0 + $0x18] sm:$0xff]  ;;  %s1751_s25 = smov 109   ;;  %s1752_s26 = smov 113  }
   0x2   :  { %1235 = vrot.lane.b32.xlu1 %v1804_v0, %s1749_s19  ;;  %1231 = vrot.lane.b32.xlu0 %v1809_v1, %s1749_s19  ;;  %v1823_v4 = vld [vmem:[%s4032_s0 + $0x8] sm:$0xff]  ;;  %s1753_s27 = smov 114   ;;  %s1754_s28 = smov 108   ;;  %v1877_v6 = vand.u32 127, %v21_v5  ;;  %v1948_v39 = vshrl.u32 %v21_v5, 7 }
   0x3   :  { %s1755_s29 = smov 127   ;;  %s1756_s30 = smov 126   ;;  %v2015_v54 = vld [vmem:[%s4033_s1] ss:$4 sm:$0xf] }
   0x4   :  { %s1757_s5 = smov 115   ;;  %s1758_s6 = smov 125   ;;  %v24_v7 = vadd.s32 256, %v1877_v6  ;;  %v25_v8 = vadd.s32 384, %v1877_v6  ;;  %v23_v10 = vadd.s32 128, %v1877_v6  ;;  %v30_v15 = vshra.s32 %v1877_v6, 4 }
   0x5   :  { %s1759_s7 = smov 116   ;;  %s1760_s8 = smov 112   ;;  %v1921_v29 = vand.u32 15, %v1877_v6  ;;  %v1994_v50 = vsub.s32 2, %v1948_v39  ;;  %v2005_v52 = vsub.s32 0, %v1948_v39  ;;  %4243 = vst [vmem:[#allocation21_spill] sm:$0xff] %v2015_v54 }
   0x6   :  { %1237 = vrot.lane.b32.xlu1 %v1818_v3, %s1749_s19  ;;  %1233 = vrot.lane.b32.xlu0 %v1823_v4, %s1749_s19  ;;  %s1761_s9 = smov 1   ;;  %s1762_s10 = smov 2   ;;  %v32_v9 = vshra.s32 %v24_v7, 4  ;;  %v33_v13 = vshra.s32 %v25_v8, 4  ;;  %v31_v16 = vshra.s32 %v23_v10, 4  ;;  %v1901_v20 = vand.u32 15, %v24_v7 }
   0x7   :  { %s1763_s11 = smov 124   ;;  %v1904_v22 = vand.u32 15, %v30_v15  ;;  %s1764_s12 = smov 15   ;;  %v1910_v24 = vand.u32 15, %v25_v8  ;;  %v1923_v30 = vand.u32 15, %v23_v10  ;;  %v1942_v37 = vadd.s32 1, %v1921_v29 }
   0x8   :  { %v1892_v14 = vand.u32 15, %v32_v9  ;;  %v1895_v17 = vand.u32 15, %v33_v13  ;;  %4215 = vst [vmem:[#allocation5_spill] sm:$0xff] %v1901_v20  ;;  %v1907_v23 = vand.u32 15, %v31_v16  ;;  %v1918_v28 = vadd.s32 1, %v1901_v20  ;;  %s1765_s13 = smov 14  }
   0x9   :  { %4216 = vst [vmem:[#allocation6_spill] sm:$0xff] %v1904_v22  ;;  %4219 = vst [vmem:[#allocation9_spill] sm:$0xff] %v1923_v30  ;;  %v1023_v31 = vadd.s32 1, %v1904_v22  ;;  %v1930_v33 = vadd.s32 1, %v1910_v24  ;;  %v1945_v38 = vadd.s32 1, %v1923_v30  ;;  %v1955_v41 = vadd.s32 2, %v1921_v29 }
   0xa   :  { %1270 = vrot.lane.b32.xlu1 %v1823_v4, %s1750_s24  ;;  %1268 = vrot.lane.b32.xlu0 %v1809_v1, %s1750_s24  ;;  %4213 = vst [vmem:[#allocation3_spill] sm:$0xff] %v1892_v14  ;;  %4214 = vst [vmem:[#allocation4_spill] sm:$0xff] %v1895_v17  ;;  %v1025_v21 = vadd.s32 1, %v1892_v14  ;;  %v1026_v25 = vadd.s32 1, %v1895_v17  ;;  %v1024_v32 = vadd.s32 1, %v1907_v23  ;;  %vm4037_vm4 = vcmp.lt.s32.totalorder %v1918_v28, 16 }
   0xb   :  { %4217 = vst [vmem:[#allocation7_spill] sm:$0xff] %v1907_v23  ;;  %4218 = vst [vmem:[#allocation8_spill] sm:$0xff] %v1918_v28  ;;  %vm1027_vm6 = vcmp.ge.s32.totalorder %v1023_v31, 0  ;;  %vm1031_vm7 = vcmp.lt.s32.totalorder %v1023_v31, 16  ;;  %vm4040_vm11 = vcmp.lt.s32.totalorder %v1930_v33, 16  ;;  %v1968_v43 = vadd.s32 2, %v1910_v24 }
   0xc   :  { %vm1029_vm0 = vcmp.ge.s32.totalorder %v1025_v21, 0  ;;  %vm1033_vm1 = vcmp.lt.s32.totalorder %v1025_v21, 16  ;;  %4220 = vst [vmem:[#allocation10_spill] sm:$0xff] %v1930_v33  ;;  %vm1030_vm2 = vcmp.ge.s32.totalorder %v1026_v25, 0  ;;  %vm1034_vm3 = vcmp.lt.s32.totalorder %v1026_v25, 16  ;;  %4223 = vst [vmem:[#allocation11_spill] sm:$0xff] %v1942_v37 }
   0xd   :  { %vm1937_vm5 = vmand %vm1029_vm0, %vm1033_vm1  ;;  %4224 = vst [vmem:[#allocation12_spill] sm:$0xff] %v1945_v38  ;;  %vm1028_vm9 = vcmp.ge.s32.totalorder %v1024_v32, 0  ;;  %vm1032_vm10 = vcmp.lt.s32.totalorder %v1024_v32, 16  ;;  %vm4041_vm13 = vcmp.lt.s32.totalorder %v1942_v37, 16  ;;  %v1982_v47 = vadd.s32 2, %v1923_v30  ;;  %s1766_s18 = smov 3  }
   0xe   :  { %1274 = vrot.lane.b32.xlu1 %v1818_v3, %s1750_s24  ;;  %1272 = vrot.lane.b32.xlu0 %v1804_v0, %s1750_s24  ;;  %vm1950_vm8 = vmand %vm1030_vm2, %vm1034_vm3  ;;  %4227 = vst [vmem:[#allocation13_spill] sm:$0xff] %v1955_v41  ;;  %vm4038_vm15 = vcmp.lt.s32.totalorder %v1945_v38, 16  ;;  %v1990_v49 = vadd.s32 2, %v1901_v20  ;;  %vm4039_vm2 = vcmp.lt.s32.totalorder %v1955_v41, 16  ;;  %v2009_v53 = vadd.s32 3, %v1921_v29  ;;  %s1767_s21 = smov 13  }
   0xf   :  { %vm1963_vm12 = vmand %vm1937_vm5, %vm4037_vm4  ;;  %4230 = vst [vmem:[#allocation14_spill] sm:$0xff] %v1968_v43  ;;  %v2027_v56 = vadd.s32 3, %v1910_v24  ;;  %v2044_v60 = vld [vmem:[%s4033_s1 + $0x1] ss:$4 sm:$0xf]  ;;  %v2048_v61 = vadd.s32 3, %v1923_v30  ;;  %v2067_v5 = vrot.slane %v2015_v54, %v1994_v50  ;;  %v2072_v7 = vrot.slane %v2015_v54, %v2005_v52 }
  0x10   :  { %vm1977_vm14 = vmand %vm1027_vm6, %vm1031_vm7  ;;  %4234 = vst [vmem:[#allocation16_spill] sm:$0xff] %v1982_v47  ;;  %vm4042_vm6 = vcmp.lt.s32.totalorder %v1968_v43, 16  ;;  %vm4050_vm4 = vcmp.lt.s32.totalorder %v1990_v49, 16  ;;  %v2060_v63 = vadd.s32 3, %v1901_v20  ;;  %v2075_v8 = vsub.s32 3, %v1948_v39  ;;  %s1769_s24 = smov 17  }
  0x11   :  { %v4232_v46 = vsel %vm1977_vm14, 4294967295, %v4231_v46  ;;  %vm1985_vm0 = vmand %vm1028_vm9, %vm1032_vm10  ;;  %4237 = vst [vmem:[#allocation17_spill] sm:$0xff] %v1990_v49  ;;  %vm4043_vm9 = vcmp.lt.s32.totalorder %v1982_v47, 16  ;;  %v2088_v10 = vld [vmem:[%s4033_s1 + $0x2] ss:$4 sm:$0xf]  ;;  %v2095_v13 = vrot.slane %v2044_v60, %v2005_v52  ;;  %v2100_v15 = vrot.slane %v2044_v60, %v1994_v50 }
  0x12   :  { %1311 = vrot.lane.b32.xlu1 %v1823_v4, %s1751_s25  ;;  %1309 = vrot.lane.b32.xlu0 %v1809_v1, %s1751_s25  ;;  %4233 = vst [vmem:[#allocation15_spill] sm:$0xff] %v4232_v46  ;;  %4238 = vst [vmem:[#allocation18_spill] sm:$0xff] %v1994_v50  ;;  %v2118_v31 = vsel %vm1963_vm12, 1.0, %v4067_v2  ;;  %v2122_v32 = vrot.slane %v2044_v60, %v2075_v8  ;;  %v2146_v49 = vrot.slane %v2088_v10, %v2005_v52  ;;  %v2253_v41 = vld [vmem:[%s4033_s1 + $0x3] ss:$4 sm:$0xf] }
  0x13   :  { %vm2000_vm1 = vmand %vm1950_vm8, %vm4040_vm11  ;;  %4241 = vst [vmem:[#allocation19_spill] sm:$0xff] %v2005_v52  ;;  %vm4265_vm12 = vcmp.lt.s32.totalorder %v2009_v53, 16  ;;  %v2160_v51 = vsub.s32 1, %v1948_v39  ;;  %v2183_v39 = vrot.slane %v2088_v10, %v1994_v50  ;;  %v2188_v55 = vadd.s32 4, %v1921_v29  ;;  %s1768_s1 = smov 4  }
  0x14   :  { %4242 = vst [vmem:[#allocation20_spill] sm:$0xff] %v2009_v53  ;;  %vm2021_vm3 = vmand %vm1977_vm14, %vm4041_vm13  ;;  %vm4121_vm13 = vcmp.lt.s32.totalorder %v2027_v56, 16  ;;  %v2142_v43 = vsel %vm2000_vm1, 1.0, %v4067_v2  ;;  %vm1317_vm1 = vcmp.lt.s32.totalorder %v1877_v6, 109  ;;  %v2205_v33 = vrot.slane %v2015_v54, %v2075_v8 }
  0x15   :  { %4246 = vst [vmem:[#allocation22_spill] sm:$0xff] %v2027_v56  ;;  %vm2037_vm7 = vmand %vm1985_vm0, %vm4038_vm15  ;;  %vm4053_vm15 = vcmp.lt.s32.totalorder %v1877_v6, 113  ;;  %v2165_v28 = vsel %vm2021_vm3, 1.0, %v4067_v2  ;;  %v2212_v62 = vadd.s32 4, %v1910_v24  ;;  %v2243_v47 = vrot.slane %v2015_v54, %v2160_v51 }
  0x16   :  { %1315 = vrot.lane.b32.xlu1 %v1818_v3, %s1751_s25  ;;  %1313 = vrot.lane.b32.xlu0 %v1804_v0, %s1751_s25  ;;  %4249 = vst [vmem:[#allocation23_spill] sm:$0xff] %v2044_v60  ;;  %4250 = vst [vmem:[#allocation24_spill] sm:$0xff] %v2048_v61  ;;  %v2170_v53 = vsel %vm2037_vm7, 1.0, %v4067_v2  ;;  %v2262_v14 = vrot.slane %v2088_v10, %v2160_v51  ;;  %v2266_v23 = vrot.slane %v2088_v10, %v2075_v8  ;;  %s1770_s25 = smov 18  }
  0x17   :  { %vm2054_vm10 = vmand %vm1977_vm14, %vm4039_vm2  ;;  %4253 = vst [vmem:[#allocation25_spill] sm:$0xff] %v2060_v63  ;;  %vm4115_vm2 = vcmp.lt.s32.totalorder %v2048_v61, 16  ;;  %v4278_v61 = vmov 0.0  }
  0x18   :  { %4254 = vst [vmem:[#allocation26_spill] sm:$0xff] %v2075_v8  ;;  %vm2081_vm11 = vmand %vm1950_vm8, %vm4042_vm6  ;;  %v2193_v59 = vsel %vm2054_vm10, 1.0, %v4067_v2  ;;  %v2215_v2 = vadd.s32 4, %v1923_v30  ;;  %vm4285_vm10 = vcmp.lt.s32.totalorder %v1877_v6, 110  ;;  %v2312_v30 = vrot.slane %v2253_v41, %v1994_v50 }
  0x19   :  { %4257 = vst [vmem:[#allocation27_spill] sm:$0xff] %v2088_v10  ;;  %vm2106_vm6 = vmand %vm1985_vm0, %vm4043_vm9 }
  0x1a   :  { %1012 = vrot.lane.b32.xlu1 %v1823_v4, %s1752_s26  ;;  %1010 = vrot.lane.b32.xlu0 %v1809_v1, %s1752_s26  ;;  %vm2128_vm9 = vmand %vm1937_vm5, %vm4050_vm4  ;;  %4268 = vst [vmem:[#allocation31_spill] sm:$0xff] %v2160_v51 }
  0x1b   :  { %vm2152_vm4 = vmand %vm1977_vm14, %vm4265_vm12  ;;  %4271 = vst [vmem:[#allocation32_spill] sm:$0xff] %v2188_v55 }
  0x1c   :  { %vm2177_vm12 = vmand %vm1950_vm8, %vm4121_vm13  ;;  %4276 = vst [vmem:[#allocation35_spill] sm:$0xff] %v2212_v62  ;;  %v2236_v9 = vsel %vm2152_vm4, 1.0, %v4278_v61  ;;  %vm4098_vm4 = vcmp.lt.s32.totalorder %v2188_v55, 16 }
  0x1d   :  { %vm2199_vm3 = vmand %vm1985_vm0, %vm4115_vm2  ;;  %4277 = vst [vmem:[#allocation36_spill] sm:$0xff] %v2215_v2  ;;  %v1708_v16 = vsel %vm2177_vm12, 1.0, %v4278_v61 }
  0x1e   :  { %1016 = vrot.lane.b32.xlu1 %v1818_v3, %s1752_s26  ;;  %1014 = vrot.lane.b32.xlu0 %v1804_v0, %s1752_s26  ;;  %4281 = vst [vmem:[#allocation39_spill] sm:$0xff] %v2253_v41  ;;  %v1706_v38 = vsel %vm2199_vm3, 1.0, %v4278_v61  ;;  %4282 = vst [vmem:[#allocation40_spill] sm:$0xff] %v2266_v23  ;;  %s1771_s26 = smov 12  }
  0x1f   :  { %vm4286_vm12 = vmmov %vm4285_vm10  ;;  %4293 = vst [vmem:[#allocation46_spill] sm:$0xff] %v2312_v30  ;;  %v4406_v36 = vld [vmem:[#allocation26_spill] sm:$0xff] }
  0x22   :  { %1065 = vrot.lane.b32.xlu1 %v1823_v4, %s1753_s27  ;;  %1063 = vrot.lane.b32.xlu0 %v1809_v1, %s1753_s27 }
  0x26   :  { %1069 = vrot.lane.b32.xlu1 %v1818_v3, %s1753_s27  ;;  %1067 = vrot.lane.b32.xlu0 %v1804_v0, %s1753_s27  ;;  %s1772_s27 = smov 19  }
  0x2a   :  { %1352 = vrot.lane.b32.xlu1 %v1823_v4, %s1754_s28  ;;  %1350 = vrot.lane.b32.xlu0 %v1809_v1, %s1754_s28 }
  0x2e   :  { %1356 = vrot.lane.b32.xlu1 %v1818_v3, %s1754_s28  ;;  %1354 = vrot.lane.b32.xlu0 %v1804_v0, %s1754_s28  ;;  %s1773_s28 = smov 20  }
  0x32   :  { %848 = vrot.lane.b32.xlu1 %v1823_v4, %s1755_s29  ;;  %846 = vrot.lane.b32.xlu0 %v1809_v1, %s1755_s29 }
  0x36   :  { %852 = vrot.lane.b32.xlu1 %v1818_v3, %s1755_s29  ;;  %850 = vrot.lane.b32.xlu0 %v1804_v0, %s1755_s29  ;;  %s1774_s29 = smov 16  }
  0x3a   :  { %885 = vrot.lane.b32.xlu1 %v1823_v4, %s1756_s30  ;;  %883 = vrot.lane.b32.xlu0 %v1809_v1, %s1756_s30 }
  0x3e   :  { %889 = vrot.lane.b32.xlu1 %v1818_v3, %s1756_s30  ;;  %887 = vrot.lane.b32.xlu0 %v1804_v0, %s1756_s30 }
  0x42   :  { %1106 = vrot.lane.b32.xlu1 %v1823_v4, %s1757_s5  ;;  %1104 = vrot.lane.b32.xlu0 %v1809_v1, %s1757_s5 }
  0x46   :  { %1110 = vrot.lane.b32.xlu1 %v1818_v3, %s1757_s5  ;;  %1108 = vrot.lane.b32.xlu0 %v1804_v0, %s1757_s5 }
  0x4a   :  { %926 = vrot.lane.b32.xlu1 %v1823_v4, %s1758_s6  ;;  %924 = vrot.lane.b32.xlu0 %v1809_v1, %s1758_s6 }
  0x4e   :  { %930 = vrot.lane.b32.xlu1 %v1818_v3, %s1758_s6  ;;  %928 = vrot.lane.b32.xlu0 %v1804_v0, %s1758_s6 }
  0x52   :  { %1147 = vrot.lane.b32.xlu1 %v1823_v4, %s1759_s7  ;;  %1145 = vrot.lane.b32.xlu0 %v1809_v1, %s1759_s7 }
  0x56   :  { %1151 = vrot.lane.b32.xlu1 %v1818_v3, %s1759_s7  ;;  %1149 = vrot.lane.b32.xlu0 %v1804_v0, %s1759_s7 }
  0x5a   :  { %1192 = vrot.lane.b32.xlu1 %v1823_v4, %s1760_s8  ;;  %1190 = vrot.lane.b32.xlu0 %v1809_v1, %s1760_s8 }
  0x5e   :  { %1196 = vrot.lane.b32.xlu1 %v1818_v3, %s1760_s8  ;;  %1194 = vrot.lane.b32.xlu0 %v1804_v0, %s1760_s8 }
  0x62   :  { %644 = vrot.lane.b32.xlu1 %v1823_v4, %s1761_s9  ;;  %642 = vrot.lane.b32.xlu0 %v1809_v1, %s1761_s9 }
  0x66   :  { %648 = vrot.lane.b32.xlu1 %v1818_v3, %s1761_s9  ;;  %646 = vrot.lane.b32.xlu0 %v1804_v0, %s1761_s9 }
  0x6a   :  { %693 = vrot.lane.b32.xlu1 %v1823_v4, %s1762_s10  ;;  %691 = vrot.lane.b32.xlu0 %v1809_v1, %s1762_s10 }
  0x6e   :  { %697 = vrot.lane.b32.xlu1 %v1818_v3, %s1762_s10  ;;  %695 = vrot.lane.b32.xlu0 %v1804_v0, %s1762_s10 }
  0x72   :  { %967 = vrot.lane.b32.xlu1 %v1823_v4, %s1763_s11  ;;  %965 = vrot.lane.b32.xlu0 %v1809_v1, %s1763_s11 }
  0x74   :  { %v1886_v11 = vpop.permute.xlu1 %1235  ;;  %v1888_v12 = vpop.permute.xlu0 %1231 }
  0x76   :  { %971 = vrot.lane.b32.xlu1 %v1818_v3, %s1763_s11  ;;  %969 = vrot.lane.b32.xlu0 %v1804_v0, %s1763_s11 }
  0x78   :  { %v1897_v18 = vpop.permute.xlu1 %1237  ;;  %v1899_v19 = vpop.permute.xlu0 %1233 }
  0x7a   :  { %432 = vrot.lane.b32.xlu1 %v1823_v4, %s1764_s12  ;;  %430 = vrot.lane.b32.xlu0 %v1809_v1, %s1764_s12 }
  0x7c   :  { %v1913_v26 = vpop.permute.xlu1 %1270  ;;  %v1915_v27 = vpop.permute.xlu0 %1268 }
  0x7e   :  { %436 = vrot.lane.b32.xlu1 %v1818_v3, %s1764_s12  ;;  %434 = vrot.lane.b32.xlu0 %v1804_v0, %s1764_s12 }
  0x80   :  { %v1932_v34 = vpop.permute.xlu1 %1274  ;;  %v1934_v35 = vpop.permute.xlu0 %1272 }
  0x81   :  { %v1280_v56 = vsel %vm4285_vm10, %v1932_v34, %v1915_v27  ;;  %v1278_v10 = vsel %vm4286_vm12, %v1913_v26, %v1934_v35  ;;  %vm2298_vm10 = vmand %vm1977_vm14, %vm4098_vm4  ;;  %vm4295_vm4 = vcmp.lt.s32.totalorder %v1877_v6, 110 }
  0x82   :  { %481 = vrot.lane.b32.xlu1 %v1823_v4, %s1765_s13  ;;  %479 = vrot.lane.b32.xlu0 %v1809_v1, %s1765_s13 }
  0x84   :  { %v1970_v44 = vpop.permute.xlu1 %1311  ;;  %v1972_v45 = vpop.permute.xlu0 %1309 }
  0x86   :  { %485 = vrot.lane.b32.xlu1 %v1818_v3, %s1765_s13  ;;  %483 = vrot.lane.b32.xlu0 %v1804_v0, %s1765_s13 }
  0x88   :  { %v2029_v57 = vpop.permute.xlu1 %1315  ;;  %v2031_v58 = vpop.permute.xlu0 %1313 }
  0x8a   :  { %734 = vrot.lane.b32.xlu1 %v1823_v4, %s1766_s18  ;;  %732 = vrot.lane.b32.xlu0 %v1809_v1, %s1766_s18 }
  0x8c   :  { %v2111_v21 = vpop.permute.xlu1 %1012  ;;  %v2113_v25 = vpop.permute.xlu0 %1010 }
  0x8d   :  { %4260 = vst [vmem:[#allocation28_spill] sm:$0xff] %v2111_v21  ;;  %4261 = vst [vmem:[#allocation29_spill] sm:$0xff] %v2113_v25  ;;  %v2137_v42 = vsel %vm4053_vm15, %v2113_v25, %v2111_v21  ;;  %vm4100_vm15 = vcmp.lt.s32.totalorder %v2060_v63, 16  ;;  %v1702_v25 = vsel %vm2106_vm6, 1.0, %v4278_v61  ;;  %v2248_v63 = vrot.slane %v2044_v60, %v2160_v51 }
  0x8e   :  { %4264 = vst [vmem:[#allocation30_spill] sm:$0xff] %v2137_v42  ;;  %738 = vrot.lane.b32.xlu1 %v1818_v3, %s1766_s18  ;;  %736 = vrot.lane.b32.xlu0 %v1804_v0, %s1766_s18  ;;  %v1704_v42 = vsel %vm2081_vm11, 1.0, %v4278_v61  ;;  %vm1328_vm7 = vmand %vm1937_vm5, %vm4100_vm15  ;;  %vm1358_vm11 = vcmp.lt.s32.totalorder %v1877_v6, 108  ;;  %vm4113_vm6 = vcmp.lt.s32.totalorder %v2212_v62, 16 }
  0x8f   :  { %4280 = vst [vmem:[#allocation38_spill] sm:$0xff] %v2248_v63  ;;  %v1707_v17 = vsel %vm1328_vm7, 1.0, %v4278_v61  ;;  %vm4288_vm7 = vcmp.lt.s32.totalorder %v1877_v6, 111  ;;  %vm4296_vm15 = vmmov %vm4295_vm4 }
  0x90   :  { %v2207_v37 = vpop.permute.xlu1 %1016  ;;  %v2209_v21 = vpop.permute.xlu0 %1014  ;;  %vm4294_vm12 = vmmov %vm4288_vm7  ;;  %v1241_v46 = vsel %vm4288_vm7, %v1899_v19, %v1886_v11  ;;  %v1277_v50 = vsel %vm4296_vm15, %v1934_v35, %v1932_v34 }
  0x91   :  { %4274 = vst [vmem:[#allocation33_spill] sm:$0xff] %v2207_v37  ;;  %4275 = vst [vmem:[#allocation34_spill] sm:$0xff] %v2209_v21  ;;  %v1703_v37 = vsel %vm2128_vm9, 1.0, %v4278_v61  ;;  %v2231_v21 = vadd.s32 4, %v1901_v20  ;;  %vm4111_vm9 = vcmp.lt.s32.totalorder %v2215_v2, 16  ;;  %v2304_v20 = vrot.slane %v2253_v41, %v2160_v51 }
  0x92   :  { %534 = vrot.lane.b32.xlu1 %v1823_v4, %s1767_s21  ;;  %532 = vrot.lane.b32.xlu0 %v1809_v1, %s1767_s21  ;;  %v1243_v55 = vsel %vm4294_vm12, %v1897_v18, %v1888_v12  ;;  %v1300_v51 = vmul.f32 %v1704_v42, %v1280_v56  ;;  %vm2347_vm15 = vmand %vm1950_vm8, %vm4113_vm6  ;;  %v1709_v42 = vsel %vm2298_vm10, 1.0, %v4278_v61 }
  0x93   :  { %4279 = vst [vmem:[#allocation37_spill] sm:$0xff] %v2231_v21  ;;  %vm4108_vm3 = vcmp.lt.s32.totalorder %v2231_v21, 16  ;;  %4291 = vst [vmem:[#allocation44_spill] sm:$0xff] %v2304_v20 }
  0x94   :  { %v2269_v22 = vpop.permute.xlu1 %1065  ;;  %v2271_v60 = vpop.permute.xlu0 %1063  ;;  %vm2367_vm12 = vmand %vm1985_vm0, %vm4111_vm9 }
  0x95   :  { %4283 = vst [vmem:[#allocation41_spill] sm:$0xff] %v2269_v22  ;;  %4284 = vst [vmem:[#allocation42_spill] sm:$0xff] %v2271_v60  ;;  %v2287_v60 = vrot.slane %v2253_v41, %v2005_v52  ;;  %v1240_v22 = vsel %vm4288_vm7, %v1886_v11, %v1897_v18  ;;  %v2308_v52 = vrot.slane %v2253_v41, %v2075_v8 }
  0x96   :  { %538 = vrot.lane.b32.xlu1 %v1818_v3, %s1767_s21  ;;  %v1279_v8 = vsel %vm4295_vm4, %v1915_v27, %v1913_v26  ;;  %536 = vrot.lane.b32.xlu0 %v1804_v0, %s1767_s21  ;;  %v1298_v41 = vmul.f32 %v1702_v25, %v1278_v10  ;;  %v1321_v18 = vsel %vm1317_vm1, %v2029_v57, %v1972_v45  ;;  %vm4299_vm4 = vmmov %vm4288_vm7  ;;  %vm4106_vm7 = vcmp.lt.s32.totalorder %v1877_v6, 127 }
  0x97   :  { %4287 = vst [vmem:[#allocation43_spill] sm:$0xff] %v2287_v60  ;;  %4292 = vst [vmem:[#allocation45_spill] sm:$0xff] %v2308_v52  ;;  %v1319_v11 = vsel %vm1317_vm1, %v1970_v44, %v2031_v58  ;;  %v1262_v35 = vmul.f32 %v2118_v31, %v1240_v22  ;;  %v1242_v10 = vsel %vm4299_vm4, %v1888_v12, %v1899_v19 }
  0x98   :  { %v2339_v26 = vpop.permute.xlu1 %1069  ;;  %v2341_v27 = vpop.permute.xlu0 %1067  ;;  %v1318_v25 = vsel %vm1317_vm1, %v2031_v58, %v2029_v57  ;;  %v1263_v31 = vmul.f32 %v2142_v43, %v1243_v55  ;;  %v1261_v12 = vmul.f32 %v2170_v53, %v1241_v46  ;;  %v1299_v19 = vmul.f32 %v1703_v37, %v1277_v50  ;;  %vm2382_vm10 = vmand %vm1937_vm5, %vm4108_vm3 }
  0x99   :  { %v1320_v57 = vsel %vm1317_vm1, %v1972_v45, %v1970_v44  ;;  %v1297_v37 = vmul.f32 %v2193_v59, %v1279_v8  ;;  %v1341_v43 = vmul.f32 %v1708_v16, %v1321_v18  ;;  %v1339_v46 = vmul.f32 %v1706_v38, %v1319_v11 }
  0x9a   :  { %775 = vrot.lane.b32.xlu1 %v1823_v4, %s1768_s1  ;;  %773 = vrot.lane.b32.xlu0 %v1809_v1, %s1768_s1  ;;  %v1712_v44 = vsel %vm2347_vm15, 1.0, %v4278_v61  ;;  %v1260_v45 = vmul.f32 %v2165_v28, %v1242_v10  ;;  %v1304_v50 = vmul.f32 %v1300_v51, %v2122_v32  ;;  %v1340_v53 = vmul.f32 %v1707_v17, %v1318_v25 }
  0x9b   :  { %v1302_v56 = vmul.f32 %v1298_v41, %v2248_v63  ;;  %v1338_v21 = vmul.f32 %v2236_v9, %v1320_v57  ;;  %v1710_v59 = vsel %vm2367_vm12, 1.0, %v4278_v61  ;;  %v1711_v28 = vsel %vm2382_vm10, 1.0, %v4278_v61 }
  0x9c   :  { %v1353_v58 = vpop.permute.xlu1 %1352  ;;  %v1351_v55 = vpop.permute.xlu0 %1350  ;;  %v1266_v51 = vmul.f32 %v1262_v35, %v2067_v5  ;;  %v1303_v17 = vmul.f32 %v1299_v19, %v2100_v15  ;;  %v1265_v16 = vmul.f32 %v1261_v12, %v2243_v47  ;;  %v1267_v9 = vmul.f32 %v1263_v31, %v2205_v33 }
  0x9d   :  { %v1361_v8 = vsel %vm1358_vm11, %v1351_v55, %v1353_v58  ;;  %v1301_v41 = vmul.f32 %v1297_v37, %v2095_v13  ;;  %v1343_v18 = vmul.f32 %v1339_v46, %v2262_v14  ;;  %v1345_v11 = vmul.f32 %v1341_v43, %v2266_v23 }
  0x9e   :  { %779 = vrot.lane.b32.xlu1 %v1818_v3, %s1768_s1  ;;  %v1379_v38 = vmul.f32 %v1709_v42, %v1361_v8  ;;  %777 = vrot.lane.b32.xlu0 %v1804_v0, %s1768_s1  ;;  %v1264_v34 = vmul.f32 %v1260_v45, %v2072_v7  ;;  %v1344_v35 = vmul.f32 %v1340_v53, %v2183_v39 }
  0x9f   :  { %v1306_v22 = vadd.f32 %v1302_v56, %v1265_v16  ;;  %v1308_v19 = vadd.f32 %v1304_v50, %v1267_v9  ;;  %v1342_v12 = vmul.f32 %v1338_v21, %v2146_v49  ;;  %v1307_v46 = vadd.f32 %v1303_v17, %v1266_v51 }
  0xa0   :  { %v1357_v10 = vpop.permute.xlu1 %1356  ;;  %v1355_v25 = vpop.permute.xlu0 %1354  ;;  %v1305_v50 = vadd.f32 %v1301_v41, %v1264_v34  ;;  %v1383_v53 = vmul.f32 %v1379_v38, %v2287_v60  ;;  %v2449_v34 = vadd.s32 4294967295, %v1910_v24 }
  0xa1   :  { %v1362_v31 = vsel %vm1358_vm11, %v1357_v10, %v1351_v55  ;;  %v1359_v42 = vsel %vm1358_vm11, %v1355_v25, %v1357_v10  ;;  %v1360_v57 = vsel %vm1358_vm11, %v1353_v58, %v1355_v25  ;;  %v1347_v45 = vadd.f32 %v1343_v18, %v1306_v22  ;;  %v4313_v25 = vld [vmem:[#allocation5_spill] sm:$0xff] }
  0xa2   :  { %v1382_v54 = vmul.f32 %v1712_v44, %v1362_v31  ;;  %v1380_v37 = vmul.f32 %v1710_v59, %v1360_v57  ;;  %v1381_v43 = vmul.f32 %v1711_v28, %v1359_v42  ;;  %50 = vrot.lane.b32.xlu1 %v1823_v4, %s1769_s24  ;;  %48 = vrot.lane.b32.xlu0 %v1809_v1, %s1769_s24  ;;  %v2456_v22 = vadd.s32 4294967295, %v4313_v25 }
  0xa3   :  { %v1349_v21 = vadd.f32 %v1345_v11, %v1308_v19  ;;  %v1348_v8 = vadd.f32 %v1344_v35, %v1307_v46  ;;  %v1346_v51 = vadd.f32 %v1342_v12, %v1305_v50  ;;  %v2445_v11 = vadd.s32 4294967295, %v1921_v29  ;;  %4310 = vst [vmem:[#allocation53_spill] sm:$0xff] %v2449_v34  ;;  %v4311_v35 = vld [vmem:[#allocation9_spill] sm:$0xff] }
  0xa4   :  { %v2425_v55 = vpop.permute.xlu1 %848  ;;  %v2427_v56 = vpop.permute.xlu0 %846  ;;  %v1384_v58 = vmul.f32 %v1380_v37, %v2304_v20  ;;  %v1386_v44 = vmul.f32 %v1382_v54, %v2308_v52  ;;  %v1385_v59 = vmul.f32 %v1381_v43, %v2312_v30  ;;  %v2452_v10 = vadd.s32 4294967295, %v4311_v35  ;;  %4314 = vst [vmem:[#allocation5_spill] sm:$0xff] %v2456_v22  ;;  %v4399_v20 = vld [vmem:[#allocation34_spill] sm:$0xff] }
  0xa5   :  { %4304 = vst [vmem:[#allocation47_spill] sm:$0xff] %v2425_v55  ;;  %4305 = vst [vmem:[#allocation48_spill] sm:$0xff] %v2427_v56  ;;  %v2436_v28 = vsel %vm4106_vm7, %v2427_v56, %v2425_v55  ;;  %v1387_v41 = vadd.f32 %v1383_v53, %v1346_v51  ;;  %v2463_v31 = vadd.s32 4294967294, %v1921_v29  ;;  %vm4107_vm1 = vcmp.ge.s32.totalorder %v2445_v11, 0  ;;  %v4371_v53 = vld [vmem:[#allocation6_spill] sm:$0xff]  ;;  %v4384_v56 = vld [vmem:[#allocation39_spill] sm:$0xff] }
  0xa6   :  { %4306 = vst [vmem:[#allocation49_spill] sm:$0xff] %v2436_v28  ;;  %54 = vrot.lane.b32.xlu1 %v1818_v3, %s1769_s24  ;;  %v1388_v17 = vadd.f32 %v1384_v58, %v1347_v45  ;;  %v1390_v16 = vadd.f32 %v1386_v44, %v1349_v21  ;;  %v1389_v9 = vadd.f32 %v1385_v59, %v1348_v8  ;;  %4309 = vst [vmem:[#allocation52_spill] sm:$0xff] %v2445_v11  ;;  %v4350_v11 = vld [vmem:[#allocation21_spill] sm:$0xff]  ;;  %v4366_v28 = vld [vmem:[#allocation27_spill] sm:$0xff] }
  0xa7   :  { %52 = vrot.lane.b32.xlu0 %v1804_v0, %s1769_s24  ;;  %4312 = vst [vmem:[#allocation9_spill] sm:$0xff] %v2452_v10  ;;  %4317 = vst [vmem:[#allocation56_spill] sm:$0xff] %v2463_v31  ;;  %v2467_v42 = vadd.s32 4294967294, %v1910_v24  ;;  %vm4109_vm11 = vcmp.ge.s32.totalorder %v2449_v34, 0  ;;  %vm4110_vm15 = vcmp.ge.s32.totalorder %v2452_v10, 0  ;;  %v2473_v57 = vadd.s32 4294967294, %v4311_v35 }
  0xa8   :  { %v2440_v38 = vpop.permute.xlu1 %852  ;;  %1460 = vmatprep.subr.mxu0 %v1388_v17  ;;  %1531 = vmatprep.subr.mxu1 %v1390_v16  ;;  %v2442_v18 = vpop.permute.xlu0 %850  ;;  %vm4112_vm4 = vcmp.ge.s32.totalorder %v2456_v22, 0  ;;  %v2478_v54 = vadd.s32 4294967294, %v4313_v25  ;;  %vm2488_vm12 = vmand %vm1977_vm14, %vm4107_vm1  ;;  %vm4114_vm10 = vcmp.ge.s32.totalorder %v2463_v31, 0  ;;  %v2494_v21 = vadd.s32 4294967293, %v1921_v29 }
  0xa9   :  { %4307 = vst [vmem:[#allocation50_spill] sm:$0xff] %v2440_v38  ;;  %4308 = vst [vmem:[#allocation51_spill] sm:$0xff] %v2442_v18  ;;  %1461 = vmatpush1.msra.mxu0 %v1387_v41  ;;  %1532 = vmatpush1.msra.mxu1 %v1389_v9  ;;  %vm4118_vm3 = vcmp.ge.s32.totalorder %v2467_v42, 0  ;;  %v2515_v58 = vadd.s32 4294967293, %v1910_v24  ;;  %v2528_v8 = vadd.s32 4294967293, %v4311_v35  ;;  %v2544_v16 = vadd.s32 4294967293, %v4313_v25 }
  0xaa   :  { %136 = vrot.lane.b32.xlu1 %v1823_v4, %s1770_s25  ;;  %4318 = vst [vmem:[#allocation57_spill] sm:$0xff] %v2467_v42  ;;  %4319 = vst [vmem:[#allocation58_spill] sm:$0xff] %v2473_v57  ;;  %v2556_v41 = vadd.s32 4294967292, %v1921_v29  ;;  %v4341_v31 = vmov 0  ;;  %v2569_v42 = vadd.s32 4294967292, %v1910_v24  ;;  %v4344_v29 = vmov 0 }
  0xab   :  { %134 = vrot.lane.b32.xlu0 %v1809_v1, %s1770_s25  ;;  %4320 = vst [vmem:[#allocation59_spill] sm:$0xff] %v2478_v54  ;;  %4326 = vst [vmem:[#allocation15_spill] sm:$0xff] %v2494_v21  ;;  %v2598_v22 = vadd.s32 4294967292, %v4313_v25  ;;  %v4387_v25 = vld [vmem:[#allocation33_spill] sm:$0xff] }
  0xac   :  { %v2458_v19 = vpop.permute.xlu1 %885  ;;  %v2460_v12 = vpop.permute.xlu0 %883  ;;  %vm2500_vm7 = vmand %vm1950_vm8, %vm4109_vm11  ;;  %4331 = vst [vmem:[#allocation62_spill] sm:$0xff] %v2515_v58 }
  0xad   :  { %4315 = vst [vmem:[#allocation54_spill] sm:$0xff] %v2458_v19  ;;  %4316 = vst [vmem:[#allocation55_spill] sm:$0xff] %v2460_v12  ;;  %v1680_v45 = vsel %vm2500_vm7, 1.0, %v4278_v61  ;;  %v4392_v12 = vld [vmem:[#allocation30_spill] sm:$0xff] }
  0xae   :  { %140 = vrot.lane.b32.xlu1 %v1818_v3, %s1770_s25  ;;  %vm2508_vm1 = vmand %vm1985_vm0, %vm4110_vm15  ;;  %vm4122_vm15 = vcmp.ge.s32.totalorder %v2473_v57, 0  ;;  %4334 = vst [vmem:[#allocation63_spill] sm:$0xff] %v2528_v8  ;;  %v2582_v57 = vadd.s32 4294967292, %v4311_v35  ;;  %v4351_v35 = vld [vmem:[#allocation23_spill] sm:$0xff] }
  0xaf   :  { %138 = vrot.lane.b32.xlu0 %v1804_v0, %s1770_s25  ;;  %vm2521_vm11 = vmand %vm1937_vm5, %vm4112_vm4  ;;  %vm4127_vm4 = vcmp.ge.s32.totalorder %v2478_v54, 0  ;;  %4337 = vst [vmem:[#allocation64_spill] sm:$0xff] %v2544_v16  ;;  %v45_v10 = vadd.f32 %v4351_v35, %v4350_v11  ;;  %v1677_v35 = vsel %vm2488_vm12, 1.0, %v4278_v61 }
  0xb0   :  { %v2480_v37 = vpop.permute.xlu1 %889  ;;  %v2482_v43 = vpop.permute.xlu0 %887  ;;  %vm2534_vm9 = vmand %vm1977_vm14, %vm4114_vm10  ;;  %vm4136_vm10 = vcmp.ge.s32.totalorder %v2494_v21, 0  ;;  %4340 = vst [vmem:[#allocation65_spill] sm:$0xff] %v2556_v41  ;;  %v4353_v21 = vmov 0 }
  0xb1   :  { %4321 = vst [vmem:[#allocation60_spill] sm:$0xff] %v2480_v37  ;;  %4322 = vst [vmem:[#allocation61_spill] sm:$0xff] %v2482_v43  ;;  %v46_v55 = vadd.f32 %v4366_v28, %v45_v10  ;;  %v4385_v43 = vld [vmem:[#allocation3_spill] sm:$0xff]  ;;  %v4390_v37 = vld [vmem:[#allocation42_spill] sm:$0xff] }
  0xb2   :  { %587 = vrot.lane.b32.xlu1 %v1823_v4, %s1771_s26  ;;  %vm2550_vm6 = vmand %vm1950_vm8, %vm4118_vm3  ;;  %4343 = vst [vmem:[#allocation66_spill] sm:$0xff] %v2569_v42 }
  0xb3   :  { %585 = vrot.lane.b32.xlu0 %v1809_v1, %s1771_s26  ;;  %vm2562_vm2 = vmand %vm1985_vm0, %vm4122_vm15  ;;  %4346 = vst [vmem:[#allocation67_spill] sm:$0xff] %v2582_v57  ;;  %vm4352_vm15 = vcmp.ge.s32.totalorder %v2515_v58, 0  ;;  %v1684_v10 = vsel %vm2550_vm6, 1.0, %v4278_v61  ;;  %v2719_v19 = vadd.f32 %v4384_v56, %v46_v55  ;;  %v4386_v56 = vld [vmem:[#allocation29_spill] sm:$0xff] }
  0xb4   :  { %v2539_v51 = vpop.permute.xlu1 %1106  ;;  %v2541_v17 = vpop.permute.xlu0 %1104  ;;  %v4342_v31 = vsel %vm2562_vm2, 4294967295, %v4341_v31  ;;  %vm2575_vm13 = vmand %vm1937_vm5, %vm4127_vm4  ;;  %4349 = vst [vmem:[#allocation68_spill] sm:$0xff] %v2598_v22  ;;  %vm4355_vm4 = vcmp.ge.s32.totalorder %v2528_v8, 0  ;;  %vm4363_vm2 = vcmp.ge.s32.totalorder %v2556_v41, 0  ;;  %v1679_v41 = vsel %vm2521_vm11, 1.0, %v4278_v61 }
  0xb5   :  { %v4345_v29 = vsel %vm2575_vm13, 4294967295, %v4344_v29  ;;  %vm2588_vm3 = vmand %vm1977_vm14, %vm4136_vm10  ;;  %vm4370_vm7 = vnez %v4342_v31  ;;  %vm4372_vm11 = vcmp.ge.s32.totalorder %v2582_v57, 0  ;;  %v4376_v31 = vld [vmem:[#allocation4_spill] sm:$0xff] }
  0xb6   :  { %591 = vrot.lane.b32.xlu1 %v1818_v3, %s1771_s26  ;;  %vm2606_vm10 = vmand %vm1950_vm8, %vm4352_vm15  ;;  %vm4358_vm15 = vcmp.ge.s32.totalorder %v2544_v16, 0  ;;  %v1682_v50 = vsel %vm4370_vm7, 1.0, %v4278_v61  ;;  %vm4375_vm6 = vnez %v4345_v29 }
  0xb7   :  { %589 = vrot.lane.b32.xlu0 %v1804_v0, %s1771_s26  ;;  %v4354_v21 = vsel %vm2606_vm10, 4294967295, %v4353_v21  ;;  %vm2615_vm13 = vmand %vm1985_vm0, %vm4355_vm4  ;;  %vm4161_vm4 = vcmp.ge.s32.totalorder %v2598_v22, 0  ;;  %v2689_v59 = vsel %vm4375_vm6, 1.0, %v4278_v61 }
  0xb8   :  { %v2592_v54 = vpop.permute.xlu1 %1110  ;;  %v2595_v34 = vpop.permute.xlu0 %1108  ;;  %vm2625_vm10 = vmand %vm1937_vm5, %vm4358_vm15  ;;  %v1686_v22 = vsel %vm2615_vm13, 1.0, %v4278_v61  ;;  %vm4388_vm13 = vcmp.lt.s32.totalorder %v1877_v6, 113 }
  0xb9   :  { %vm2643_vm15 = vmand %vm1977_vm14, %vm4363_vm2  ;;  %vm4367_vm2 = vcmp.ge.s32.totalorder %v2569_v42, 0  ;;  %v4379_v42 = vld [vmem:[#allocation7_spill] sm:$0xff] }
  0xba   :  { %210 = vrot.lane.b32.xlu1 %v1823_v4, %s1772_s27  ;;  %vm2665_vm12 = vmand %vm1950_vm8, %vm4367_vm2  ;;  %vm660_vm6 = vcmp.lt.s32.totalorder %v4379_v42, 16  ;;  %v2730_v24 = vsel %vm2643_vm15, 1.0, %v4278_v61 }
  0xbb   :  { %208 = vrot.lane.b32.xlu0 %v1809_v1, %s1772_s27  ;;  %vm2682_vm2 = vmand %vm1985_vm0, %vm4372_vm11  ;;  %v1692_v55 = vsel %vm2665_vm12, 1.0, %v4278_v61 }
  0xbc   :  { %v2635_v58 = vpop.permute.xlu1 %926  ;;  %v2637_v8 = vpop.permute.xlu0 %924  ;;  %vm2699_vm11 = vmand %vm1937_vm5, %vm4161_vm4  ;;  %vm657_vm4 = vcmp.ge.s32.totalorder %v4385_v43, 0  ;;  %v2747_v16 = vsel %vm2682_vm2, 1.0, %v4278_v61  ;;  %vm1198_vm2 = vcmp.lt.s32.totalorder %v1877_v6, 112 }
  0xbd   :  { %4361 = vst [vmem:[#allocation21_spill] sm:$0xff] %v2635_v58  ;;  %4362 = vst [vmem:[#allocation23_spill] sm:$0xff] %v2637_v8  ;;  %v1678_v58 = vsel %vm2508_vm1, 1.0, %v4278_v61  ;;  %v1681_v8 = vsel %vm2534_vm9, 1.0, %v4278_v61  ;;  %vm1112_vm9 = vcmp.lt.s32.totalorder %v1877_v6, 115  ;;  %vm4381_vm1 = vnez %v4354_v21 }
  0xbe   :  { %214 = vrot.lane.b32.xlu1 %v1818_v3, %s1772_s27  ;;  %vm4380_vm7 = vmmov %vm2588_vm3  ;;  %v1688_v57 = vsel %vm4381_vm1, 1.0, %v4278_v61  ;;  %vm661_vm3 = vcmp.lt.s32.totalorder %v4385_v43, 16  ;;  %v1687_v21 = vsel %vm2625_vm10, 1.0, %v4278_v61  ;;  %vm1153_vm1 = vcmp.lt.s32.totalorder %v1877_v6, 116  ;;  %v4458_v43 = vld [vmem:[#allocation17_spill] sm:$0xff] }
  0xbf   :  { %212 = vrot.lane.b32.xlu0 %v1804_v0, %s1772_s27  ;;  %v1685_v29 = vsel %vm4380_vm7, 1.0, %v4278_v61  ;;  %vm4391_vm10 = vcmp.lt.s32.totalorder %v1877_v6, 114  ;;  %v2752_v28 = vsel %vm2699_vm11, 1.0, %v4278_v61  ;;  %vm4409_vm7 = vcmp.ge.s32.totalorder %v4371_v53, 0 }
  0xc0   :  { %v2714_v18 = vpop.permute.xlu1 %930  ;;  %v2716_v38 = vpop.permute.xlu0 %928  ;;  %vm4393_vm15 = vmmov %vm4391_vm10 }
  0xc1   :  { %4382 = vst [vmem:[#allocation27_spill] sm:$0xff] %v2714_v18  ;;  %4383 = vst [vmem:[#allocation69_spill] sm:$0xff] %v2716_v38  ;;  %v1022_v38 = vsel %vm4388_vm13, %v4387_v25, %v4386_v56  ;;  %v4389_v18 = vld [vmem:[#allocation41_spill] sm:$0xff]  ;;  %v1055_v56 = vmul.f32 %v1677_v35, %v4392_v12  ;;  %v1075_v2 = vsel %vm4393_vm15, %v2339_v26, %v4390_v37  ;;  %v2768_v12 = vsel %vm1977_vm14, 1.0, %v4278_v61  ;;  %v4397_v35 = vld [vmem:[#allocation19_spill] sm:$0xff] }
  0xc2   :  { %v1074_v11 = vsel %vm4391_vm10, %v4390_v37, %v4389_v18  ;;  %284 = vrot.lane.b32.xlu1 %v1823_v4, %s1773_s28  ;;  %vm4394_vm12 = vmmov %vm4391_vm10  ;;  %4395 = vst [vmem:[#allocation39_spill] sm:$0xff] %v2768_v12  ;;  %v2773_v37 = vsel %vm1950_vm8, 1.0, %v4278_v61  ;;  %v2782_v30 = vrot.slane %v2719_v19, %v4397_v35  ;;  %v1058_v60 = vmul.f32 %v1680_v45, %v1022_v38  ;;  %v4401_v12 = vld [vmem:[#allocation28_spill] sm:$0xff]  ;;  %v4403_v38 = vld [vmem:[#allocation31_spill] sm:$0xff] }
  0xc3   :  { %v1073_v62 = vsel %vm4394_vm12, %v4389_v18, %v2341_v27  ;;  %282 = vrot.lane.b32.xlu0 %v1809_v1, %s1773_s28  ;;  %4396 = vst [vmem:[#allocation29_spill] sm:$0xff] %v2773_v37  ;;  %v2778_v18 = vsel %vm1985_vm0, 1.0, %v4278_v61  ;;  %vm4400_vm14 = vmmov %vm4388_vm13  ;;  %v1092_v37 = vmul.f32 %v1681_v8, %v1074_v11  ;;  %v1095_v52 = vmul.f32 %v1684_v10, %v1075_v2 }
  0xc4   :  { %v1148_v44 = vpop.permute.xlu1 %1147  ;;  %v1146_v9 = vpop.permute.xlu0 %1145  ;;  %4398 = vst [vmem:[#allocation33_spill] sm:$0xff] %v2782_v30  ;;  %v1019_v46 = vsel %vm4400_vm14, %v4399_v20, %v4387_v25  ;;  %vm4402_vm8 = vmmov %vm4388_vm13  ;;  %v1093_v48 = vmul.f32 %v1682_v50, %v1073_v62  ;;  %v2796_v35 = vsel %vm1937_vm5, 1.0, %v4278_v61  ;;  %v2800_v45 = vrot.slane %v2719_v19, %v4403_v38 }
  0xc5   :  { %v1020_v40 = vsel %vm4402_vm8, %v4401_v12, %v4399_v20  ;;  %v1059_v25 = vmul.f32 %v1055_v56, %v2072_v7  ;;  %vm4405_vm0 = vmmov %vm4391_vm10  ;;  %v1115_v2 = vsel %vm1112_vm9, %v2541_v17, %v2539_v51  ;;  %v2814_v62 = vrot.slane %v2719_v19, %v4406_v36 }
  0xc6   :  { %288 = vrot.lane.b32.xlu1 %v1818_v3, %s1773_s28  ;;  %4404 = vst [vmem:[#allocation41_spill] sm:$0xff] %v2800_v45  ;;  %v1072_v20 = vsel %vm4405_vm0, %v2341_v27, %v2339_v26  ;;  %v1056_v8 = vmul.f32 %v1678_v58, %v1020_v40  ;;  %v1057_v10 = vmul.f32 %v1679_v41, %v1019_v46  ;;  %vm4408_vm5 = vcmp.lt.s32.totalorder %v4371_v53, 16  ;;  %vm2869_vm14 = vmand %vm657_vm4, %vm661_vm3  ;;  %v4463_v53 = vld [vmem:[#allocation46_spill] sm:$0xff] }
  0xc7   :  { %286 = vrot.lane.b32.xlu0 %v1804_v0, %s1773_s28  ;;  %4407 = vst [vmem:[#allocation42_spill] sm:$0xff] %v2814_v62  ;;  %v1116_v50 = vsel %vm1112_vm9, %v2592_v54, %v2541_v17  ;;  %v1114_v26 = vsel %vm1112_vm9, %v2539_v51, %v2595_v34  ;;  %v1062_v0 = vmul.f32 %v1058_v60, %v2205_v33  ;;  %vm2830_vm11 = vmand %vm4409_vm7, %vm4408_vm5  ;;  %v4410_v58 = vmov 0 }
  0xc8   :  { %v1152_v27 = vpop.permute.xlu1 %1151  ;;  %v1150_v11 = vpop.permute.xlu0 %1149  ;;  %v1096_v56 = vmul.f32 %v1092_v37, %v2095_v13  ;;  %v4411_v58 = vsel %vm2830_vm11, 4294967295, %v4410_v58  ;;  %v1113_v17 = vsel %vm1112_vm9, %v2595_v34, %v2592_v54  ;;  %v1099_v60 = vmul.f32 %v1095_v52, %v2122_v32 }
  0xc9   :  { %4412 = vst [vmem:[#allocation30_spill] sm:$0xff] %v4411_v58  ;;  %v1157_v51 = vsel %vm1153_vm1, %v1152_v27, %v1146_v9  ;;  %v1094_v41 = vmul.f32 %v2689_v59, %v1072_v20  ;;  %v1097_v12 = vmul.f32 %v1093_v48, %v2248_v63  ;;  %vm4413_vm13 = vcmp.lt.s32.totalorder %v4376_v31, 16 }
  0xca   :  { %vm4414_vm10 = vcmp.ge.s32.totalorder %v4376_v31, 0  ;;  %v4415_v37 = vmov 0  ;;  %v1133_v46 = vmul.f32 %v1685_v29, %v1115_v2  ;;  %362 = vrot.lane.b32.xlu1 %v1823_v4, %s1774_s29  ;;  %vm4418_vm9 = vcmp.ge.s32.totalorder %v4379_v42, 0 }
  0xcb   :  { %vm2847_vm15 = vmand %vm4414_vm10, %vm4413_vm13  ;;  %v4419_v52 = vmov 0  ;;  %v1136_v34 = vmul.f32 %v1688_v57, %v1116_v50  ;;  %v1134_v54 = vmul.f32 %v1686_v22, %v1114_v26  ;;  %v1155_v59 = vsel %vm1153_vm1, %v1148_v44, %v1150_v11  ;;  %360 = vrot.lane.b32.xlu0 %v1809_v1, %s1774_s29  ;;  %v4424_v50 = vld [vmem:[#allocation11_spill] sm:$0xff] }
  0xcc   :  { %v4416_v37 = vsel %vm2847_vm15, 4294967295, %v4415_v37  ;;  %vm2857_vm12 = vmand %vm4418_vm9, %vm660_vm6  ;;  %v1135_v29 = vmul.f32 %v1687_v21, %v1113_v17  ;;  %v1156_v40 = vsel %vm1153_vm1, %v1146_v9, %v1148_v44  ;;  %v1177_v57 = vmul.f32 %v1692_v55, %v1157_v51  ;;  %v1193_v48 = vpop.permute.xlu1 %1192  ;;  %v1191_v38 = vpop.permute.xlu0 %1190  ;;  %v4428_v55 = vld [vmem:[#allocation18_spill] sm:$0xff] }
  0xcd   :  { %4417 = vst [vmem:[#allocation19_spill] sm:$0xff] %v4416_v37  ;;  %v4420_v52 = vsel %vm2857_vm12, 4294967295, %v4419_v52  ;;  %v1154_v22 = vsel %vm1153_vm1, %v1150_v11, %v1152_v27  ;;  %v1775_v20 = vmov 0   ;;  %v1060_v1 = vmul.f32 %v1056_v8, %v2243_v47  ;;  %v4430_v27 = vld [vmem:[#allocation10_spill] sm:$0xff]  ;;  %v4434_v8 = vld [vmem:[#allocation12_spill] sm:$0xff]  ;;  %v4513_v37 = vld [vmem:[#allocation69_spill] sm:$0xff] }
  0xce   :  { %4421 = vst [vmem:[#allocation34_spill] sm:$0xff] %v4420_v52  ;;  %1743 = vset.pattern.permute.xlu0 %v1775_v20  ;;  %v1061_v2 = vmul.f32 %v1057_v10, %v2067_v5  ;;  %v1100_v36 = vadd.f32 %v1096_v56, %v1059_v25  ;;  %vm4425_vm3 = vcmp.lt.s32.totalorder %v4424_v50, 16  ;;  %v2889_v44 = vrot.slane %v2719_v19, %v4428_v55  ;;  %v4438_v56 = vld [vmem:[#allocation8_spill] sm:$0xff]  ;;  %v4447_v55 = vld [vmem:[#allocation14_spill] sm:$0xff] }
  0xcf   :  { %vm2883_vm4 = vmand %vm2830_vm11, %vm4425_vm3  ;;  %v1103_v9 = vadd.f32 %v1099_v60, %v1062_v0  ;;  %v1098_v26 = vmul.f32 %v1094_v41, %v2100_v15  ;;  %vm4431_vm6 = vcmp.lt.s32.totalorder %v4430_v27, 16  ;;  %vm4435_vm8 = vcmp.lt.s32.totalorder %v4434_v8, 16  ;;  %366 = vrot.lane.b32.xlu1 %v1818_v3, %s1774_s29  ;;  %v2927_v41 = vld [vmem:[%s4032_s0 + $0x10] sm:$0xff]  ;;  %v4456_v50 = vld [vmem:[#allocation44_spill] sm:$0xff] }
  0xd0   :  { %4429 = vst [vmem:[#allocation28_spill] sm:$0xff] %v2889_v44  ;;  %vm2896_vm1 = vmand %vm2847_vm15, %vm4431_vm6  ;;  %v1175_v19 = vmul.f32 %v2747_v16, %v1155_v59  ;;  %v1201_v11 = vsel %vm1198_vm2, %v1191_v38, %v1193_v48  ;;  %v1101_v0 = vadd.f32 %v1097_v12, %v1060_v1  ;;  %vm4439_vm5 = vcmp.lt.s32.totalorder %v4438_v56, 16  ;;  %364 = vrot.lane.b32.xlu0 %v2927_v41, %s1774_s29  ;;  %v4442_v3 = vld [vmem:[#allocation13_spill] sm:$0xff]  ;;  %v1195_v20 = vpop.permute.xlu0 %1194  ;;  %v1432_v1 = vld [vmem:[%s4034_s3] sm:$0xf] }
  0xd1   :  { %vm2904_vm0 = vmand %vm2857_vm12, %vm4435_vm8  ;;  %v1138_v51 = vmul.f32 %v1134_v54, %v2262_v14  ;;  %v1174_v60 = vmul.f32 %v2730_v24, %v1156_v40  ;;  %v1176_v16 = vmul.f32 %v2752_v28, %v1154_v22  ;;  %vm4443_vm13 = vcmp.lt.s32.totalorder %v4442_v3, 16  ;;  %v4446_v59 = vld [vmem:[#allocation45_spill] sm:$0xff]  ;;  %v1197_v22 = vpop.permute.xlu1 %1196  ;;  %v4452_v56 = vld [vmem:[#allocation16_spill] sm:$0xff] }
  0xd2   :  { %vm2917_vm7 = vmand %vm2869_vm14, %vm4439_vm5  ;;  %v1137_v24 = vmul.f32 %v1133_v46, %v2146_v49  ;;  %v1140_v28 = vmul.f32 %v1136_v34, %v2266_v23  ;;  %v1139_v54 = vmul.f32 %v1135_v29, %v2183_v39  ;;  %v1181_v40 = vmul.f32 %v1177_v57, %v4446_v59  ;;  %v4451_v46 = vld [vmem:[#allocation39_spill] sm:$0xff] }
  0xd3   :  { %vm2935_vm10 = vmand %vm2830_vm11, %vm4443_vm13  ;;  %vm4448_vm9 = vcmp.lt.s32.totalorder %v4447_v55, 16  ;;  %v1219_v34 = vmul.f32 %v4451_v46, %v1201_v11  ;;  %v1202_v29 = vsel %vm1198_vm2, %v1197_v22, %v1191_v38  ;;  %v1199_v57 = vsel %vm1198_vm2, %v1195_v20, %v1197_v22  ;;  %v4457_v11 = vld [vmem:[#allocation29_spill] sm:$0xff] }
  0xd4   :  { %vm2950_vm3 = vmand %vm2847_vm15, %vm4448_vm9  ;;  %v1200_v27 = vsel %vm1198_vm2, %v1193_v48, %v1195_v20  ;;  %vm4453_vm6 = vcmp.lt.s32.totalorder %v4452_v56, 16  ;;  %v1179_v8 = vmul.f32 %v1175_v19, %v4456_v50  ;;  %v1222_v46 = vmul.f32 %v4457_v11, %v1202_v29  ;;  %v4462_v20 = vld [vmem:[#allocation43_spill] sm:$0xff]  ;;  %1435 = vperm.xlu0 %1743, %v1432_v1   ;;  %v4464_v29 = vld [vmem:[#allocation20_spill] sm:$0xff] }
  0xd5   :  { %vm2965_vm8 = vmand %vm2857_vm12, %vm4453_vm6  ;;  %v1220_v38 = vmul.f32 %v2778_v18, %v1200_v27  ;;  %v1221_v31 = vmul.f32 %v2796_v35, %v1199_v57  ;;  %v1102_v22 = vadd.f32 %v1098_v26, %v1061_v2  ;;  %vm4459_vm5 = vcmp.lt.s32.totalorder %v4458_v43, 16  ;;  %v2991_v35 = vpop.permute.xlu1 %644  ;;  %v2993_v2 = vpop.permute.xlu0 %642  ;;  %v4496_v55 = vld [vmem:[#allocation37_spill] sm:$0xff]  ;;  %v4508_v43 = vld [vmem:[#allocation51_spill] sm:$0xff] }
  0xd6   :  { %vm2977_vm2 = vmand %vm2869_vm14, %vm4459_vm5  ;;  %v1178_v56 = vmul.f32 %v1174_v60, %v4462_v20  ;;  %v1180_v42 = vmul.f32 %v1176_v16, %v4463_v53  ;;  %v1142_v19 = vadd.f32 %v1138_v51, %v1101_v0  ;;  %vm4465_vm13 = vcmp.lt.s32.totalorder %v4464_v29, 16  ;;  %4468 = vst [vmem:[#allocation31_spill] sm:$0xff] %v2991_v35  ;;  %v4470_v51 = vld [vmem:[#allocation22_spill] sm:$0xff]  ;;  %v4474_v29 = vld [vmem:[#allocation24_spill] sm:$0xff] }
  0xd7   :  { %vm2987_vm9 = vmand %vm2830_vm11, %vm4465_vm13  ;;  %v4466_v18 = vmov 0  ;;  %4469 = vst [vmem:[#allocation26_spill] sm:$0xff] %v2993_v2  ;;  %v1224_v26 = vmul.f32 %v1220_v38, %v2800_v45  ;;  %v1226_v27 = vmul.f32 %v1222_v46, %v2814_v62  ;;  %v1225_v60 = vmul.f32 %v1221_v31, %v2889_v44 }
  0xd8   :  { %v4467_v18 = vsel %vm2987_vm9, 4294967295, %v4466_v18  ;;  %v1144_v0 = vadd.f32 %v1140_v28, %v1103_v9  ;;  %vm4471_vm6 = vcmp.lt.s32.totalorder %v4470_v51, 16  ;;  %v4472_v16 = vmov 0  ;;  %v4478_v28 = vld [vmem:[#allocation25_spill] sm:$0xff] }
  0xd9   :  { %vm3002_vm5 = vmand %vm2847_vm15, %vm4471_vm6  ;;  %v1223_v1 = vmul.f32 %v1219_v34, %v2782_v30  ;;  %v1141_v57 = vadd.f32 %v1137_v24, %v1100_v36  ;;  %v1143_v11 = vadd.f32 %v1139_v54, %v1102_v22  ;;  %vm4475_vm13 = vcmp.lt.s32.totalorder %v4474_v29, 16  ;;  %1462 = vmatprep.subr.mxu0 %v1224_v26  ;;  %1533 = vmatprep.subr.mxu1 %v1226_v27  ;;  %v3026_v38 = vpop.permute.xlu1 %648  ;;  %v1745_v22 = vld [vmem:[%s4032_s0 + $0x8] sm:$0xff] }
  0xda   :  { %v4473_v16 = vsel %vm3002_vm5, 4294967295, %v4472_v16  ;;  %vm3011_vm9 = vmand %vm2857_vm12, %vm4475_vm13  ;;  %v1183_v31 = vadd.f32 %v1179_v8, %v1142_v19  ;;  %v1185_v9 = vadd.f32 %v1181_v40, %v1144_v0  ;;  %vm4479_vm6 = vcmp.lt.s32.totalorder %v4478_v28, 16  ;;  %1534 = vmatpush1.msra.mxu1 %v1225_v60  ;;  %4482 = vst [vmem:[#allocation18_spill] sm:$0xff] %v3026_v38  ;;  %v3028_v8 = vpop.permute.xlu0 %646  ;;  %v4484_v40 = vld [vmem:[#allocation32_spill] sm:$0xff]  ;;  %v4488_v19 = vld [vmem:[#allocation35_spill] sm:$0xff] }
  0xdb   :  { %vm3019_vm5 = vmand %vm2869_vm14, %vm4479_vm6  ;;  %1463 = vmatpush1.msra.mxu0 %v1223_v1  ;;  %v1182_v36 = vadd.f32 %v1178_v56, %v1141_v57  ;;  %v1184_v24 = vadd.f32 %v1180_v42, %v1143_v11  ;;  %v1661_v54 = vsel %vm2883_vm4, 1.0, %v4278_v61  ;;  %4483 = vst [vmem:[#allocation45_spill] sm:$0xff] %v3028_v8  ;;  %vm4485_vm13 = vcmp.lt.s32.totalorder %v4484_v40, 16  ;;  %v4492_v60 = vld [vmem:[#allocation36_spill] sm:$0xff]  ;;  %v4500_v11 = vld [vmem:[#allocation55_spill] sm:$0xff] }
  0xdc   :  { %1464 = vmatprep.subr.mxu0 %v1183_v31  ;;  %1535 = vmatprep.subr.mxu1 %v1185_v9  ;;  %vm3034_vm6 = vmand %vm2830_vm11, %vm4485_vm13  ;;  %v1664_v42 = vsel %vm2896_vm1, 1.0, %v4278_v61  ;;  %v1662_v21 = vsel %vm2904_vm0, 1.0, %v4278_v61  ;;  %v1663_v56 = vsel %vm2917_vm7, 1.0, %v4278_v61  ;;  %vm891_vm4 = vcmp.lt.s32.totalorder %v1877_v6, 126  ;;  %v4501_v31 = vld [vmem:[#allocation60_spill] sm:$0xff]  ;;  %v4502_v9 = vld [vmem:[#allocation61_spill] sm:$0xff] }
  0xdd   :  { %1465 = vmatpush1.msra.mxu0 %v1182_v36  ;;  %1536 = vmatpush1.msra.mxu1 %v1184_v24  ;;  %vm4489_vm13 = vcmp.lt.s32.totalorder %v4488_v19, 16  ;;  %v1665_v25 = vsel %vm2935_vm10, 1.0, %v4278_v61  ;;  %v1668_v10 = vsel %vm2950_vm3, 1.0, %v4278_v61  ;;  %v1666_v17 = vsel %vm2965_vm8, 1.0, %v4278_v61  ;;  %v3092_v1 = vpop.permute.xlu1 %693  ;;  %v4503_v36 = vld [vmem:[#allocation54_spill] sm:$0xff]  ;;  %v4505_v26 = vld [vmem:[#allocation48_spill] sm:$0xff] }
  0xde   :  { %vm3052_vm11 = vmand %vm2847_vm15, %vm4489_vm13  ;;  %v1667_v27 = vsel %vm2977_vm2, 1.0, %v4278_v61  ;;  %vm4493_vm1 = vcmp.lt.s32.totalorder %v4492_v60, 16  ;;  %vm932_vm7 = vcmp.lt.s32.totalorder %v1877_v6, 125  ;;  %vm4494_vm10 = vnez %v4467_v18  ;;  %4498 = vst [vmem:[#allocation39_spill] sm:$0xff] %v3092_v1  ;;  %v4506_v28 = vld [vmem:[#allocation50_spill] sm:$0xff]  ;;  %v4509_v8 = vld [vmem:[#allocation47_spill] sm:$0xff] }
  0xdf   :  { %vm983_vm0 = vmand %vm2857_vm12, %vm4493_vm1  ;;  %v1669_v3 = vsel %vm4494_vm10, 1.0, %v4278_v61  ;;  %vm4495_vm3 = vnez %v4473_v16  ;;  %vm4497_vm8 = vcmp.lt.s32.totalorder %v4496_v55, 16  ;;  %v1658_v48 = vsel %vm2857_vm12, 1.0, %v4278_v61  ;;  %v3094_v16 = vpop.permute.xlu0 %691  ;;  %v4512_v1 = vld [vmem:[#allocation27_spill] sm:$0xff] }
  0xe0   :  { %v1672_v12 = vsel %vm4495_vm3, 1.0, %v4278_v61  ;;  %vm984_vm2 = vmand %vm2869_vm14, %vm4497_vm8  ;;  %v1670_v0 = vsel %vm3011_vm9, 1.0, %v4278_v61  ;;  %v1671_v18 = vsel %vm3019_vm5, 1.0, %v4278_v61  ;;  %4499 = vst [vmem:[#allocation29_spill] sm:$0xff] %v3094_v16  ;;  %vm973_vm13 = vcmp.lt.s32.totalorder %v1877_v6, 124  ;;  %v4511_v16 = vld [vmem:[#allocation23_spill] sm:$0xff] }
  0xe1   :  { %v1673_v57 = vsel %vm3034_vm6, 1.0, %v4278_v61  ;;  %v895_v46 = vsel %vm891_vm4, %v4501_v31, %v4500_v11  ;;  %v893_v34 = vsel %vm891_vm4, %v4503_v36, %v4502_v9  ;;  %v1676_v24 = vsel %vm3052_vm11, 1.0, %v4278_v61  ;;  %v3148_v52 = vpop.permute.xlu1 %697 }
  0xe2   :  { %v1674_v19 = vsel %vm983_vm0, 1.0, %v4278_v61  ;;  %v1675_v55 = vsel %vm984_vm2, 1.0, %v4278_v61  ;;  %v3116_v40 = vmul.f32 %v1745_v22, %v1658_v48  ;;  %vm4504_vm9 = vnez %v4411_v58  ;;  %v4514_v58 = vld [vmem:[#allocation21_spill] sm:$0xff]  ;;  %4515 = vst [vmem:[#allocation43_spill] sm:$0xff] %v3148_v52 }
  0xe3   :  { %v1657_v60 = vsel %vm4504_vm9, 1.0, %v4278_v61  ;;  %v1660_v51 = vsel %vm2847_vm15, 1.0, %v4278_v61  ;;  %vm4507_vm11 = vcmp.lt.s32.totalorder %v1877_v6, 127  ;;  %v894_v48 = vsel %vm891_vm4, %v4500_v11, %v4503_v36  ;;  %v3150_v11 = vpop.permute.xlu0 %695  ;;  %v4517_v36 = vld [vmem:[#allocation49_spill] sm:$0xff] }
  0xe4   :  { %v858_v29 = vsel %vm4507_vm11, %v4506_v28, %v4505_v26  ;;  %vm4510_vm5 = vmmov %vm4507_vm11  ;;  %v892_v22 = vsel %vm891_vm4, %v4502_v9, %v4501_v31  ;;  %v915_v2 = vmul.f32 %v1668_v10, %v895_v46  ;;  %v913_v35 = vmul.f32 %v1666_v17, %v893_v34  ;;  %4516 = vst [vmem:[#allocation46_spill] sm:$0xff] %v3150_v11 }
  0xe5   :  { %v856_v38 = vsel %vm4510_vm5, %v4509_v8, %v4508_v43  ;;  %v936_v26 = vsel %vm932_vm7, %v4512_v1, %v4511_v16  ;;  %v934_v8 = vsel %vm932_vm7, %v4514_v58, %v4513_v37  ;;  %v875_v44 = vmul.f32 %v1661_v54, %v4517_v36  ;;  %vm4518_vm6 = vmmov %vm4510_vm5 }
  0xe6   :  { %v855_v10 = vsel %vm4518_vm6, %v4508_v43, %v4506_v28  ;;  %v933_v17 = vsel %vm932_vm7, %v4513_v37, %v4512_v1  ;;  %v1659_v31 = vsel %vm2869_vm14, 1.0, %v4278_v61  ;;  %v878_v46 = vmul.f32 %v1664_v42, %v858_v29  ;;  %v1746_v28 = vld [vmem:[%s4032_s0] sm:$0xff]  ;;  %v968_v42 = vpop.permute.xlu1 %967 }
  0xe7   :  { %v876_v9 = vmul.f32 %v1662_v21, %v856_v38  ;;  %v914_v34 = vmul.f32 %v1667_v27, %v892_v22  ;;  %v935_v54 = vsel %vm932_vm7, %v4511_v16, %v4514_v58  ;;  %v912_v36 = vmul.f32 %v1665_v25, %v894_v48  ;;  %v966_v21 = vpop.permute.xlu0 %965  ;;  %v1747_v25 = vld [vmem:[%s4032_s0 + $0x18] sm:$0xff] }
  0xe8   :  { %v956_v11 = vmul.f32 %v1672_v12, %v936_v26  ;;  %v954_v43 = vmul.f32 %v1670_v0, %v934_v8  ;;  %v834_v37 = vmul.f32 %v1746_v28, %v1657_v60  ;;  %v877_v1 = vmul.f32 %v1663_v56, %v855_v10 }
  0xe9   :  { %v919_v52 = vmul.f32 %v915_v2, %v2122_v32  ;;  %v917_v29 = vmul.f32 %v913_v35, %v2248_v63  ;;  %v955_v38 = vmul.f32 %v1671_v18, %v933_v17  ;;  %v953_v27 = vmul.f32 %v1669_v3, %v935_v54 }
  0xea   :  { %v976_v58 = vsel %vm973_vm13, %v966_v21, %v968_v42  ;;  %v837_v12 = vmul.f32 %v1747_v25, %v1660_v51  ;;  %v836_v0 = vmul.f32 %v2927_v41, %v1659_v31  ;;  %v879_v56 = vmul.f32 %v875_v44, %v2072_v7  ;;  %v972_v44 = vpop.permute.xlu1 %971 }
  0xeb   :  { %v882_v2 = vmul.f32 %v878_v46, %v2205_v33  ;;  %v880_v35 = vmul.f32 %v876_v9, %v2243_v47  ;;  %v918_v60 = vmul.f32 %v914_v34, %v2100_v15  ;;  %v916_v3 = vmul.f32 %v912_v36, %v2095_v13  ;;  %v970_v8 = vpop.permute.xlu0 %969 }
  0xec   :  { %v960_v18 = vmul.f32 %v956_v11, %v2266_v23  ;;  %v958_v16 = vmul.f32 %v954_v43, %v2262_v14  ;;  %v994_v48 = vmul.f32 %v1673_v57, %v976_v58  ;;  %v881_v22 = vmul.f32 %v877_v1, %v2067_v5 }
  0xed   :  { %v923_v51 = vadd.f32 %v919_v52, %v882_v2  ;;  %v921_v26 = vadd.f32 %v917_v29, %v880_v35  ;;  %v959_v41 = vmul.f32 %v955_v38, %v2183_v39  ;;  %v957_v10 = vmul.f32 %v953_v27, %v2146_v49  ;;  %v4519_v35 = vld [vmem:[#allocation28_spill] sm:$0xff] }
  0xee   :  { %v977_v17 = vsel %vm973_vm13, %v972_v44, %v966_v21  ;;  %v974_v31 = vsel %vm973_vm13, %v970_v8, %v972_v44  ;;  %v975_v11 = vsel %vm973_vm13, %v968_v42, %v970_v8  ;;  %v922_v57 = vadd.f32 %v918_v60, %v881_v22  ;;  %v3199_v38 = vpop.permute.xlu1 %432  ;;  %v4526_v22 = vld [vmem:[#allocation52_spill] sm:$0xff] }
  0xef   :  { %v997_v46 = vmul.f32 %v1676_v24, %v977_v17  ;;  %v995_v9 = vmul.f32 %v1674_v19, %v975_v11  ;;  %v996_v52 = vmul.f32 %v1675_v55, %v974_v31  ;;  %v920_v34 = vadd.f32 %v916_v3, %v879_v56  ;;  %v3201_v27 = vpop.permute.xlu0 %430  ;;  %v4538_v11 = vld [vmem:[#allocation56_spill] sm:$0xff]  ;;  %v4563_v17 = vld [vmem:[#allocation29_spill] sm:$0xff] }
  0xf0   :  { %v998_v54 = vmul.f32 %v994_v48, %v4462_v20  ;;  %v962_v36 = vadd.f32 %v958_v16, %v921_v26  ;;  %v964_v43 = vadd.f32 %v960_v18, %v923_v51  ;;  %v963_v21 = vadd.f32 %v959_v41, %v922_v57  ;;  %v4529_v26 = vld [vmem:[#allocation5_spill] sm:$0xff] }
  0xf1   :  { %v1001_v28 = vmul.f32 %v997_v46, %v4446_v59  ;;  %v999_v1 = vmul.f32 %v995_v9, %v4456_v50  ;;  %v1000_v29 = vmul.f32 %v996_v52, %v4463_v53  ;;  %v961_v42 = vadd.f32 %v957_v10, %v920_v34  ;;  %v4531_v41 = vld [vmem:[#allocation53_spill] sm:$0xff]  ;;  %v4534_v10 = vld [vmem:[#allocation58_spill] sm:$0xff]  ;;  %v4542_v46 = vld [vmem:[#allocation59_spill] sm:$0xff] }
  0xf2   :  { %v839_v19 = vmul.f32 %v3116_v40, %v2800_v45  ;;  %v841_v25 = vmul.f32 %v837_v12, %v2814_v62  ;;  %v838_v2 = vmul.f32 %v834_v37, %v2782_v30  ;;  %v840_v60 = vmul.f32 %v836_v0, %v4519_v35  ;;  %v3208_v3 = vpop.permute.xlu1 %436  ;;  %v4522_v37 = vld [vmem:[#allocation9_spill] sm:$0xff]  ;;  %v4546_v52 = vld [vmem:[#allocation7_spill] sm:$0xff]  ;;  %v4564_v45 = vld [vmem:[#allocation64_spill] sm:$0xff] }
  0xf3   :  { %v1003_v55 = vadd.f32 %v999_v1, %v962_v36  ;;  %v1005_v24 = vadd.f32 %v1001_v28, %v964_v43  ;;  %v1004_v58 = vadd.f32 %v1000_v29, %v963_v21  ;;  %v1002_v56 = vadd.f32 %v998_v54, %v961_v42  ;;  %4520 = vst [vmem:[#allocation55_spill] sm:$0xff] %v3208_v3  ;;  %v3210_v18 = vpop.permute.xlu0 %434  ;;  %v4547_v36 = vld [vmem:[#allocation57_spill] sm:$0xff]  ;;  %v4551_v28 = vld [vmem:[#allocation6_spill] sm:$0xff]  ;;  %v4562_v62 = vld [vmem:[#allocation39_spill] sm:$0xff] }
  0xf4   :  { %4521 = vst [vmem:[#allocation60_spill] sm:$0xff] %v3210_v18  ;;  %vm4523_vm4 = vcmp.ge.s32.totalorder %v4522_v37, 0  ;;  %vm4527_vm0 = vcmp.ge.s32.totalorder %v4526_v22, 0  ;;  %vm4530_vm10 = vcmp.ge.s32.totalorder %v4529_v26, 0  ;;  %vm4532_vm8 = vcmp.ge.s32.totalorder %v4531_v41, 0  ;;  %v4570_v43 = vld [vmem:[#allocation62_spill] sm:$0xff] }
  0xf5   :  { %1466 = vmatprep.subr.mxu0 %v1003_v55  ;;  %1537 = vmatprep.subr.mxu1 %v1005_v24  ;;  %vm668_vm1 = vmand %vm2857_vm12, %vm4523_vm4  ;;  %vm4535_vm13 = vcmp.ge.s32.totalorder %v4534_v10, 0  ;;  %vm4539_vm5 = vcmp.ge.s32.totalorder %v4538_v11, 0  ;;  %vm4543_vm4 = vcmp.ge.s32.totalorder %v4542_v46, 0  ;;  %v3263_v34 = vadd.s32 4294967295, %v4546_v52  ;;  %v4552_v55 = vld [vmem:[#allocation3_spill] sm:$0xff]  ;;  %v4557_v52 = vld [vmem:[#allocation4_spill] sm:$0xff] }
  0xf6   :  { %1467 = vmatpush1.msra.mxu0 %v1002_v56  ;;  %1538 = vmatpush1.msra.mxu1 %v1004_v58  ;;  %v3212_v40 = vpop.permute.xlu1 %481  ;;  %vm667_vm7 = vmand %vm4504_vm9, %vm4527_vm0  ;;  %v1642_v54 = vsel %vm668_vm1, 1.0, %v4278_v61  ;;  %v3277_v1 = vadd.s32 4294967295, %v4551_v28  ;;  %v3283_v24 = vadd.s32 4294967295, %v4552_v55  ;;  %v4553_v58 = vld [vmem:[#allocation63_spill] sm:$0xff]  ;;  %v3300_v28 = vadd.s32 4294967295, %v4557_v52  ;;  %v4576_v22 = vld [vmem:[#allocation18_spill] sm:$0xff] }
  0xf7   :  { %1468 = vmatprep.subr.mxu0 %v839_v19  ;;  %1539 = vmatprep.subr.mxu1 %v841_v25  ;;  %v3214_v12 = vpop.permute.xlu0 %479  ;;  %vm669_vm3 = vmand %vm2869_vm14, %vm4530_vm10  ;;  %vm650_vm10 = vcmp.lt.s32.totalorder %v1877_v6, 1  ;;  %v1641_v21 = vsel %vm667_vm7, 1.0, %v4278_v61  ;;  %vm4554_vm1 = vcmp.ge.s32.totalorder %v4553_v58, 0  ;;  %vm740_vm7 = vcmp.lt.s32.totalorder %v1877_v6, 3  ;;  %v4558_v55 = vld [vmem:[#allocation15_spill] sm:$0xff]  ;;  %v4597_v0 = vld [vmem:[#allocation12_spill] sm:$0xff] }
  0xf8   :  { %1469 = vmatpush1.msra.mxu0 %v838_v2  ;;  %1540 = vmatpush1.msra.mxu1 %v840_v60  ;;  %vm670_vm2 = vmand %vm2847_vm15, %vm4532_vm8  ;;  %vm699_vm8 = vcmp.lt.s32.totalorder %v1877_v6, 2  ;;  %v1643_v42 = vsel %vm669_vm3, 1.0, %v4278_v61  ;;  %vm4559_vm3 = vcmp.ge.s32.totalorder %v4558_v55, 0  ;;  %v4568_v58 = vld [vmem:[#allocation31_spill] sm:$0xff] }
  0xf9   :  { %vm3242_vm11 = vmand %vm2857_vm12, %vm4535_vm13  ;;  %vm4548_vm13 = vcmp.ge.s32.totalorder %v4547_v36, 0  ;;  %v1644_v19 = vsel %vm670_vm2, 1.0, %v4278_v61  ;;  %v702_v30 = vsel %vm699_vm8, %v4563_v17, %v4562_v62  ;;  %v4569_v36 = vld [vmem:[#allocation26_spill] sm:$0xff]  ;;  %v4574_v11 = vld [vmem:[#allocation43_spill] sm:$0xff] }
  0xfa   :  { %v3216_v16 = vpop.permute.xlu1 %485  ;;  %vm3250_vm6 = vmand %vm4504_vm9, %vm4539_vm5  ;;  %v1646_v2 = vsel %vm3242_vm11, 1.0, %v4278_v61  ;;  %v653_v9 = vsel %vm650_vm10, %v4569_v36, %v4568_v58  ;;  %v703_v10 = vsel %vm699_vm8, %v4574_v11, %v4563_v17  ;;  %v654_v37 = vsel %vm650_vm10, %v4576_v22, %v4569_v36  ;;  %v4578_v36 = vld [vmem:[#allocation45_spill] sm:$0xff]  ;;  %v4579_v55 = vld [vmem:[#allocation67_spill] sm:$0xff] }
  0xfb   :  { %v3222_v48 = vpop.permute.xlu0 %483  ;;  %vm3258_vm0 = vmand %vm2869_vm14, %vm4543_vm4  ;;  %v1645_v60 = vsel %vm3250_vm6, 1.0, %v4278_v61  ;;  %vm4565_vm6 = vcmp.ge.s32.totalorder %v4564_v45, 0  ;;  %v721_v17 = vmul.f32 %v1646_v2, %v702_v30  ;;  %v684_v18 = vmul.f32 %v1642_v54, %v653_v9 }
  0xfc   :  { %4525 = vst [vmem:[#allocation61_spill] sm:$0xff] %v3222_v48  ;;  %vm3272_vm5 = vmand %vm2847_vm15, %vm4548_vm13  ;;  %v1647_v57 = vsel %vm3258_vm0, 1.0, %v4278_v61  ;;  %vm70_vm0 = vcmp.lt.s32.totalorder %v3263_v34, 16  ;;  %v4577_v48 = vld [vmem:[#allocation46_spill] sm:$0xff]  ;;  %v652_v35 = vsel %vm650_vm10, %v4568_v58, %v4578_v36  ;;  %v720_v2 = vmul.f32 %v1645_v60, %v703_v10 }
  0xfd   :  { %vm3289_vm4 = vmand %vm2857_vm12, %vm4554_vm1  ;;  %v1648_v52 = vsel %vm3272_vm5, 1.0, %v4278_v61  ;;  %vm69_vm5 = vcmp.lt.s32.totalorder %v3277_v1, 16  ;;  %vm71_vm1 = vcmp.lt.s32.totalorder %v3283_v24, 16  ;;  %v701_v3 = vsel %vm699_vm8, %v4562_v62, %v4577_v48 }
  0xfe   :  { %v3236_v8 = vpop.permute.xlu1 %734  ;;  %vm3307_vm2 = vmand %vm4504_vm9, %vm4559_vm3  ;;  %vm4571_vm3 = vcmp.ge.s32.totalorder %v4570_v43, 0  ;;  %v1650_v43 = vsel %vm3289_vm4, 1.0, %v4278_v61  ;;  %v700_v54 = vsel %vm699_vm8, %v4577_v48, %v4574_v11  ;;  %vm4580_vm4 = vcmp.ge.s32.totalorder %v4579_v55, 0  ;;  %v4581_v48 = vld [vmem:[#allocation65_spill] sm:$0xff]  ;;  %v4585_v11 = vld [vmem:[#allocation68_spill] sm:$0xff] }
  0xff   :  { %v733_v31 = vpop.permute.xlu0 %732  ;;  %vm3326_vm13 = vmand %vm2869_vm14, %vm4565_vm6  ;;  %vm72_vm6 = vcmp.lt.s32.totalorder %v3300_v28, 16  ;;  %v1649_v25 = vsel %vm3307_vm2, 1.0, %v4278_v61  ;;  %v683_v45 = vmul.f32 %v1641_v21, %v654_v37  ;;  %v651_v58 = vsel %vm650_vm10, %v4578_v36, %v4576_v22 }
 0x100   :  { %vm3341_vm11 = vmand %vm2847_vm15, %vm4571_vm3  ;;  %v743_v41 = vsel %vm740_vm7, %v733_v31, %v3236_v8  ;;  %vm68_vm3 = vcmp.ge.s32.totalorder %v3300_v28, 0  ;;  %vm781_vm8 = vcmp.lt.s32.totalorder %v1877_v6, 4  ;;  %v725_v37 = vmul.f32 %v721_v17, %v2248_v63 }
 0x101   :  { %v1652_v30 = vsel %vm3341_vm11, 1.0, %v4278_v61  ;;  %v762_v62 = vmul.f32 %v1650_v43, %v743_v41  ;;  %vm787_vm2 = vmand %vm2857_vm12, %vm4580_vm4  ;;  %vm4582_vm11 = vcmp.ge.s32.totalorder %v4581_v48, 0  ;;  %v722_v41 = vmul.f32 %v1647_v57, %v701_v3 }
 0x102   :  { %v739_v29 = vpop.permute.xlu1 %738  ;;  %vm4586_vm12 = vcmp.ge.s32.totalorder %v4585_v11, 0  ;;  %v688_v21 = vmul.f32 %v684_v18, %v2243_v47  ;;  %v685_v43 = vmul.f32 %v1643_v42, %v652_v35  ;;  %v723_v17 = vmul.f32 %v1648_v52, %v700_v54  ;;  %v4589_v11 = vld [vmem:[#allocation66_spill] sm:$0xff] }
 0x103   :  { %v737_v56 = vpop.permute.xlu0 %736  ;;  %v744_v10 = vsel %vm740_vm7, %v739_v29, %v733_v31  ;;  %vm3421_vm10 = vmand %vm2869_vm14, %vm4586_vm12  ;;  %v1654_v3 = vsel %vm787_vm2, 1.0, %v4278_v61  ;;  %v686_v57 = vmul.f32 %v1644_v19, %v651_v58  ;;  %v766_v36 = vmul.f32 %v762_v62, %v2262_v14 }
 0x104   :  { %v741_v22 = vsel %vm740_vm7, %v737_v56, %v739_v29  ;;  %v742_v31 = vsel %vm740_vm7, %v3236_v8, %v737_v56  ;;  %v724_v29 = vmul.f32 %v720_v2, %v2095_v13  ;;  %v761_v8 = vmul.f32 %v1649_v25, %v744_v10  ;;  %vm3484_vm12 = vmand %vm68_vm3, %vm72_vm6 }
 0x105   :  { %vm4591_vm7 = vcmp.ge.s32.totalorder %v3263_v34, 0  ;;  %v764_v42 = vmul.f32 %v1652_v30, %v741_v22  ;;  %v1655_v44 = vsel %vm3421_vm10, 1.0, %v4278_v61  ;;  %v687_v25 = vmul.f32 %v683_v45, %v2072_v7 }
 0x106   :  { %v3345_v46 = vpop.permute.xlu1 %534  ;;  %vm3437_vm4 = vmand %vm4591_vm7, %vm70_vm0  ;;  %v729_v35 = vadd.f32 %v725_v37, %v688_v21  ;;  %v726_v34 = vmul.f32 %v722_v41, %v2100_v15  ;;  %v727_v30 = vmul.f32 %v723_v17, %v2122_v32  ;;  %v690_v58 = vmul.f32 %v686_v57, %v2205_v33  ;;  %v4690_v37 = vld [vmem:[#allocation53_spill] sm:$0xff] }
 0x107   :  { %v3359_v26 = vpop.permute.xlu0 %532  ;;  %v728_v10 = vadd.f32 %v724_v29, %v687_v25  ;;  %vm4598_vm2 = vcmp.lt.s32.totalorder %v4597_v0, 16  ;;  %v765_v41 = vmul.f32 %v761_v8, %v2146_v49  ;;  %v4606_v29 = vld [vmem:[#allocation11_spill] sm:$0xff]  ;;  %v4610_v25 = vld [vmem:[#allocation8_spill] sm:$0xff] }
 0x108   :  { %4575 = vst [vmem:[#allocation54_spill] sm:$0xff] %v3359_v26  ;;  %v1651_v26 = vsel %vm3326_vm13, 1.0, %v4278_v61  ;;  %vm3407_vm13 = vmand %vm4504_vm9, %vm4582_vm11  ;;  %vm4590_vm9 = vcmp.ge.s32.totalorder %v4589_v11, 0  ;;  %vm4611_vm6 = vcmp.lt.s32.totalorder %v4610_v25, 16 }
 0x109   :  { %vm789_vm14 = vmand %vm2847_vm15, %vm4590_vm9  ;;  %v763_v18 = vmul.f32 %v1651_v26, %v742_v31  ;;  %v1653_v52 = vsel %vm3407_vm13, 1.0, %v4278_v61  ;;  %v689_v26 = vmul.f32 %v685_v43, %v2067_v5  ;;  %vm4594_vm15 = vcmp.ge.s32.totalorder %v3277_v1, 0 }
 0x10a   :  { %v3388_v9 = vpop.permute.xlu1 %538  ;;  %vm3457_vm0 = vmand %vm4594_vm15, %vm69_vm5  ;;  %v1656_v45 = vsel %vm789_vm14, 1.0, %v4278_v61  ;;  %vm4601_vm5 = vcmp.ge.s32.totalorder %v3283_v24, 0  ;;  %v770_v31 = vadd.f32 %v766_v36, %v729_v35  ;;  %v768_v24 = vmul.f32 %v764_v42, %v2266_v23 }
 0x10b   :  { %v3400_v60 = vpop.permute.xlu0 %536  ;;  %vm3467_vm11 = vmand %vm3437_vm4, %vm4598_vm2  ;;  %v767_v21 = vmul.f32 %v763_v18, %v2183_v39  ;;  %v730_v57 = vadd.f32 %v726_v34, %v689_v26  ;;  %v731_v42 = vadd.f32 %v727_v30, %v690_v58  ;;  %v4614_v26 = vld [vmem:[#allocation10_spill] sm:$0xff]  ;;  %v4618_v58 = vld [vmem:[#allocation16_spill] sm:$0xff] }
 0x10c   :  { %vm3475_vm13 = vmand %vm4601_vm5, %vm71_vm1  ;;  %vm4607_vm1 = vcmp.lt.s32.totalorder %v4606_v29, 16  ;;  %vm4615_vm9 = vcmp.lt.s32.totalorder %v4614_v26, 16  ;;  %v4628_v29 = vmov 0 }
 0x10d   :  { %vm3497_vm10 = vmand %vm3457_vm0, %vm4607_vm1 }
 0x10e   :  { %v776_v56 = vpop.permute.xlu1 %775  ;;  %vm3509_vm3 = vmand %vm3475_vm13, %vm4611_vm6  ;;  %v1625_v26 = vsel %vm3497_vm10, 1.0, %v4278_v61 }
 0x10f   :  { %v774_v19 = vpop.permute.xlu0 %773  ;;  %vm3517_vm14 = vmand %vm3484_vm12, %vm4615_vm9 }
 0x110   :  { %v784_v2 = vsel %vm781_vm8, %v774_v19, %v776_v56 }
 0x111   :  { %v803_v62 = vmul.f32 %v1654_v3, %v784_v2 }
 0x112   :  { %v780_v22 = vpop.permute.xlu1 %779 }
 0x113   :  { %v807_v43 = vmul.f32 %v803_v62, %v4456_v50  ;;  %v785_v17 = vsel %vm781_vm8, %v780_v22, %v774_v19  ;;  %v778_v3 = vpop.permute.xlu0 %777  ;;  %v769_v62 = vadd.f32 %v765_v41, %v728_v10  ;;  %v4651_v10 = vld [vmem:[#allocation54_spill] sm:$0xff] }
 0x114   :  { %v802_v36 = vmul.f32 %v1653_v52, %v785_v17  ;;  %v782_v8 = vsel %vm781_vm8, %v778_v3, %v780_v22  ;;  %v783_v18 = vsel %vm781_vm8, %v776_v56, %v778_v3  ;;  %vm4619_vm8 = vcmp.lt.s32.totalorder %v4618_v58, 16  ;;  %v4622_v17 = vld [vmem:[#allocation13_spill] sm:$0xff] }
 0x115   :  { %v804_v35 = vmul.f32 %v1655_v44, %v783_v18  ;;  %v805_v34 = vmul.f32 %v1656_v45, %v782_v8  ;;  %v811_v2 = vadd.f32 %v807_v43, %v770_v31  ;;  %vm3528_vm7 = vmand %vm3437_vm4, %vm4619_vm8  ;;  %v772_v31 = vadd.f32 %v768_v24, %v731_v42  ;;  %v4626_v3 = vld [vmem:[#allocation17_spill] sm:$0xff]  ;;  %v4634_v18 = vld [vmem:[#allocation24_spill] sm:$0xff] }
 0x116   :  { %v806_v56 = vmul.f32 %v802_v36, %v4462_v20  ;;  %v3522_v30 = vpop.permute.xlu1 %50  ;;  %v771_v43 = vadd.f32 %v767_v21, %v730_v57  ;;  %vm4623_vm15 = vcmp.lt.s32.totalorder %v4622_v17, 16  ;;  %vm4627_vm5 = vcmp.lt.s32.totalorder %v4626_v3, 16  ;;  %v4630_v21 = vld [vmem:[#allocation14_spill] sm:$0xff]  ;;  %v4643_v58 = vld [vmem:[#allocation25_spill] sm:$0xff] }
 0x117   :  { %v808_v45 = vmul.f32 %v804_v35, %v4463_v53  ;;  %v809_v0 = vmul.f32 %v805_v34, %v4446_v59  ;;  %v3534_v22 = vpop.permute.xlu0 %48  ;;  %1470 = vmatprep.subr.mxu0 %v811_v2  ;;  %vm3540_vm2 = vmand %vm3457_vm0, %vm4623_vm15  ;;  %vm4631_vm9 = vcmp.lt.s32.totalorder %v4630_v21, 16  ;;  %v4632_v57 = vmov 0  ;;  %v4638_v35 = vld [vmem:[#allocation20_spill] sm:$0xff]  ;;  %v4655_v42 = vld [vmem:[#allocation61_spill] sm:$0xff] }
 0x118   :  { %v810_v41 = vadd.f32 %v806_v56, %v769_v62  ;;  %vm3548_vm1 = vmand %vm3475_vm13, %vm4627_vm5  ;;  %vm438_vm15 = vcmp.lt.s32.totalorder %v1877_v6, 15  ;;  %vm4635_vm5 = vcmp.lt.s32.totalorder %v4634_v18, 16  ;;  %vm4639_vm6 = vcmp.lt.s32.totalorder %v4638_v35, 16 }
 0x119   :  { %v4629_v29 = vsel %vm3548_vm1, 4294967295, %v4628_v29  ;;  %v813_v36 = vadd.f32 %v809_v0, %v772_v31  ;;  %v812_v24 = vadd.f32 %v808_v45, %v771_v43  ;;  %vm3557_vm8 = vmand %vm3484_vm12, %vm4631_vm9  ;;  %v1626_v2 = vsel %vm3467_vm11, 1.0, %v4278_v61  ;;  %v4647_v31 = vld [vmem:[#allocation22_spill] sm:$0xff] }
 0x11a   :  { %v4633_v57 = vsel %vm3557_vm8, 4294967295, %v4632_v57  ;;  %v3561_v8 = vpop.permute.xlu1 %54  ;;  %1471 = vmatpush1.msra.mxu0 %v810_v41  ;;  %vm3568_vm1 = vmand %vm3437_vm4, %vm4635_vm5  ;;  %v1630_v56 = vsel %vm3528_vm7, 1.0, %v4278_v61  ;;  %vm4644_vm5 = vcmp.lt.s32.totalorder %v4643_v58, 16  ;;  %v441_v28 = vsel %vm438_vm15, %v3201_v27, %v3199_v38 }
 0x11b   :  { %1541 = vmatprep.subr.mxu1 %v813_v36  ;;  %v3572_v25 = vpop.permute.xlu0 %52  ;;  %vm3579_vm8 = vmand %vm3457_vm0, %vm4639_vm6  ;;  %vm4642_vm6 = vcmp.lt.s32.totalorder %v1877_v6, 14  ;;  %v1627_v44 = vsel %vm3509_vm3, 1.0, %v4278_v61  ;;  %v1628_v45 = vsel %vm3517_vm14, 1.0, %v4278_v61  ;;  %v1629_v0 = vsel %vm3540_vm2, 1.0, %v4278_v61  ;;  %v4653_v36 = vld [vmem:[#allocation55_spill] sm:$0xff] }
 0x11c   :  { %1542 = vmatpush1.msra.mxu1 %v812_v24  ;;  %v490_v62 = vsel %vm4642_vm6, %v3214_v12, %v3212_v40  ;;  %vm3600_vm9 = vmand %vm3475_vm13, %vm4644_vm5  ;;  %vm4648_vm11 = vcmp.lt.s32.totalorder %v4647_v31, 16  ;;  %vm4650_vm3 = vnez %v4629_v29  ;;  %v1634_v17 = vsel %vm3568_vm1, 1.0, %v4278_v61 }
 0x11d   :  { %vm564_vm10 = vmand %vm3484_vm12, %vm4648_vm11  ;;  %v1631_v52 = vsel %vm4650_vm3, 1.0, %v4278_v61  ;;  %vm4652_vm14 = vcmp.lt.s32.totalorder %v1877_v6, 13  ;;  %v521_v24 = vmul.f32 %v1630_v56, %v490_v62  ;;  %vm4654_vm2 = vnez %v4633_v57  ;;  %v4657_v56 = vld [vmem:[#allocation60_spill] sm:$0xff] }
 0x11e   :  { %v3621_v43 = vpop.permute.xlu1 %136  ;;  %vm4649_vm7 = vmmov %vm4642_vm6  ;;  %v543_v41 = vsel %vm4652_vm14, %v4651_v10, %v3345_v46  ;;  %v1632_v29 = vsel %vm4654_vm2, 1.0, %v4278_v61  ;;  %v1633_v21 = vsel %vm3579_vm8, 1.0, %v4278_v61  ;;  %v472_v18 = vmul.f32 %v1626_v2, %v441_v28 }
 0x11f   :  { %v491_v19 = vsel %vm4649_vm7, %v3216_v16, %v3214_v12  ;;  %v3637_v3 = vpop.permute.xlu0 %134  ;;  %v442_v12 = vsel %vm438_vm15, %v4653_v36, %v3201_v27  ;;  %vm4656_vm1 = vmmov %vm4642_vm6  ;;  %v1635_v58 = vsel %vm3600_vm9, 1.0, %v4278_v61  ;;  %v1636_v27 = vsel %vm564_vm10, 1.0, %v4278_v61 }
 0x120   :  { %v489_v35 = vsel %vm4656_vm1, %v3212_v40, %v4655_v42  ;;  %v440_v57 = vsel %vm438_vm15, %v3199_v38, %v4657_v56  ;;  %v520_v62 = vmul.f32 %v1629_v0, %v491_v19  ;;  %vm4658_vm8 = vmmov %vm4656_vm1  ;;  %v574_v2 = vmul.f32 %v1634_v17, %v543_v41  ;;  %v4659_v40 = vld [vmem:[#allocation36_spill] sm:$0xff] }
 0x121   :  { %v488_v34 = vsel %vm4658_vm8, %v4655_v42, %v3216_v16  ;;  %vm4660_vm6 = vcmp.lt.s32.totalorder %v4659_v40, 16  ;;  %v471_v31 = vmul.f32 %v1625_v26, %v442_v12  ;;  %v439_v38 = vsel %vm438_vm15, %v4657_v56, %v4653_v36  ;;  %vm4663_vm5 = vmmov %vm4652_vm14  ;;  %v4664_v19 = vld [vmem:[#allocation32_spill] sm:$0xff]  ;;  %v4670_v12 = vld [vmem:[#allocation37_spill] sm:$0xff] }
 0x122   :  { %v3665_v28 = vpop.permute.xlu1 %140  ;;  %vm3671_vm9 = vmand %vm3437_vm4, %vm4660_vm6  ;;  %v544_v16 = vsel %vm4663_vm5, %v3388_v9, %v4651_v10  ;;  %vm593_vm11 = vcmp.lt.s32.totalorder %v1877_v6, 12  ;;  %vm4665_vm10 = vcmp.lt.s32.totalorder %v4664_v19, 16  ;;  %v525_v17 = vmul.f32 %v521_v24, %v2248_v63  ;;  %v4674_v56 = vld [vmem:[#allocation9_spill] sm:$0xff]  ;;  %v4682_v19 = vld [vmem:[#allocation35_spill] sm:$0xff] }
 0x123   :  { %v3683_v0 = vpop.permute.xlu0 %138  ;;  %vm3690_vm7 = vmand %vm3457_vm0, %vm4665_vm10  ;;  %v522_v41 = vmul.f32 %v1631_v52, %v489_v35  ;;  %vm4671_vm14 = vcmp.lt.s32.totalorder %v4670_v12, 16  ;;  %v476_v52 = vmul.f32 %v472_v18, %v2243_v47  ;;  %v473_v24 = vmul.f32 %v1627_v44, %v440_v57  ;;  %v4686_v63 = vld [vmem:[#allocation5_spill] sm:$0xff] }
 0x124   :  { %vm4668_vm15 = vmmov %vm4663_vm5  ;;  %v523_v35 = vmul.f32 %v1632_v29, %v488_v34  ;;  %vm4675_vm1 = vcmp.ge.s32.totalorder %v4674_v56, 0  ;;  %v1638_v44 = vsel %vm3671_vm9, 1.0, %v4278_v61  ;;  %v474_v29 = vmul.f32 %v1628_v45, %v439_v38 }
 0x125   :  { %v541_v10 = vsel %vm4668_vm15, %v3400_v60, %v3388_v9  ;;  %vm4669_vm3 = vmmov %vm4663_vm5  ;;  %v524_v18 = vmul.f32 %v520_v62, %v2095_v13  ;;  %v578_v57 = vmul.f32 %v574_v2, %v2262_v14  ;;  %v573_v34 = vmul.f32 %v1633_v21, %v544_v16 }
 0x126   :  { %v542_v36 = vsel %vm4669_vm3, %v3345_v46, %v3400_v60  ;;  %vm3707_vm2 = vmand %vm3475_vm13, %vm4671_vm14  ;;  %v4678_v46 = vld [vmem:[#allocation52_spill] sm:$0xff]  ;;  %v588_v40 = vpop.permute.xlu1 %587  ;;  %vm4683_vm10 = vcmp.lt.s32.totalorder %v4682_v19, 16  ;;  %vm4687_vm3 = vcmp.ge.s32.totalorder %v4686_v63, 0  ;;  %v1637_v62 = vsel %vm3690_vm7, 1.0, %v4278_v61 }
 0x127   :  { %vm3716_vm8 = vmand %vm3437_vm4, %vm4675_vm1  ;;  %vm4679_vm6 = vcmp.ge.s32.totalorder %v4678_v46, 0  ;;  %v575_v56 = vmul.f32 %v1635_v58, %v542_v36  ;;  %v576_v46 = vmul.f32 %v1636_v27, %v541_v10  ;;  %v586_v21 = vpop.permute.xlu0 %585  ;;  %v1639_v2 = vsel %vm3707_vm2, 1.0, %v4278_v61  ;;  %v4694_v36 = vld [vmem:[#allocation58_spill] sm:$0xff]  ;;  %v4698_v19 = vld [vmem:[#allocation56_spill] sm:$0xff] }
 0x128   :  { %vm3724_vm5 = vmand %vm3457_vm0, %vm4679_vm6  ;;  %v475_v58 = vmul.f32 %v471_v31, %v2072_v7  ;;  %v529_v27 = vadd.f32 %v525_v17, %v476_v52  ;;  %v526_v63 = vmul.f32 %v522_v41, %v2100_v15  ;;  %vm4691_vm14 = vcmp.ge.s32.totalorder %v4690_v37, 0 }
 0x129   :  { %vm3737_vm15 = vmand %vm3484_vm12, %vm4683_vm10  ;;  %v596_v16 = vsel %vm593_vm11, %v586_v21, %v588_v40  ;;  %v477_v26 = vmul.f32 %v473_v24, %v2067_v5  ;;  %v527_v10 = vmul.f32 %v523_v35, %v2122_v32  ;;  %vm4695_vm7 = vcmp.ge.s32.totalorder %v4694_v36, 0 }
 0x12a   :  { %vm3745_vm9 = vmand %vm3475_vm13, %vm4687_vm3  ;;  %v627_v17 = vmul.f32 %v1638_v44, %v596_v16  ;;  %v1640_v41 = vsel %vm3737_vm15, 1.0, %v4278_v61  ;;  %v478_v42 = vmul.f32 %v474_v29, %v2205_v33  ;;  %v528_v52 = vadd.f32 %v524_v18, %v475_v58  ;;  %v592_v37 = vpop.permute.xlu1 %591  ;;  %v4702_v16 = vld [vmem:[#allocation59_spill] sm:$0xff] }
 0x12b   :  { %vm3761_vm1 = vmand %vm3484_vm12, %vm4691_vm14  ;;  %v577_v24 = vmul.f32 %v573_v34, %v2146_v49  ;;  %vm4699_vm6 = vcmp.ge.s32.totalorder %v4698_v19, 0  ;;  %v582_v36 = vadd.f32 %v578_v57, %v529_v27  ;;  %v579_v44 = vmul.f32 %v575_v56, %v2183_v39  ;;  %v590_v58 = vpop.permute.xlu0 %589  ;;  %v4706_v57 = vld [vmem:[#allocation57_spill] sm:$0xff] }
 0x12c   :  { %vm3773_vm2 = vmand %vm3437_vm4, %vm4695_vm7  ;;  %v580_v12 = vmul.f32 %v576_v46, %v2266_v23  ;;  %vm4703_vm15 = vcmp.ge.s32.totalorder %v4702_v16, 0  ;;  %v631_v18 = vmul.f32 %v627_v17, %v4456_v50  ;;  %v597_v34 = vsel %vm593_vm11, %v592_v37, %v586_v21  ;;  %v4710_v23 = vld [vmem:[#allocation63_spill] sm:$0xff] }
 0x12d   :  { %vm3786_vm10 = vmand %vm3457_vm0, %vm4699_vm6  ;;  %v530_v19 = vadd.f32 %v526_v63, %v477_v26  ;;  %vm4707_vm14 = vcmp.ge.s32.totalorder %v4706_v57, 0  ;;  %v4708_v56 = vmov 0  ;;  %v626_v46 = vmul.f32 %v1637_v62, %v597_v34 }
 0x12e   :  { %vm3796_vm3 = vmand %vm3475_vm13, %vm4703_vm15  ;;  %v594_v27 = vsel %vm593_vm11, %v590_v58, %v592_v37  ;;  %v595_v17 = vsel %vm593_vm11, %v588_v40, %v590_v58  ;;  %v531_v16 = vadd.f32 %v527_v10, %v478_v42  ;;  %vm4711_vm6 = vcmp.ge.s32.totalorder %v4710_v23, 0  ;;  %v3824_v34 = vpop.permute.xlu1 %210  ;;  %v4714_v37 = vld [vmem:[#allocation15_spill] sm:$0xff] }
 0x12f   :  { %vm3807_vm7 = vmand %vm3484_vm12, %vm4707_vm14  ;;  %v628_v50 = vmul.f32 %v1639_v2, %v595_v17  ;;  %v629_v21 = vmul.f32 %v1640_v41, %v594_v27  ;;  %v4712_v63 = vmov 0  ;;  %v635_v26 = vadd.f32 %v631_v18, %v582_v36  ;;  %v3836_v41 = vpop.permute.xlu0 %208  ;;  %v4718_v36 = vld [vmem:[#allocation64_spill] sm:$0xff] }
 0x130   :  { %v4709_v56 = vsel %vm3807_vm7, 4294967295, %v4708_v56  ;;  %vm3819_vm15 = vmand %vm3437_vm4, %vm4711_vm6  ;;  %v630_v62 = vmul.f32 %v626_v46, %v4462_v20  ;;  %vm4715_vm14 = vcmp.ge.s32.totalorder %v4714_v37, 0  ;;  %v4716_v40 = vmov 0 }
 0x131   :  { %v4713_v63 = vsel %vm3819_vm15, 4294967295, %v4712_v63  ;;  %vm3830_vm11 = vmand %vm3457_vm0, %vm4715_vm14  ;;  %v581_v23 = vadd.f32 %v577_v24, %v528_v52  ;;  %v632_v2 = vmul.f32 %v628_v50, %v4463_v53  ;;  %v633_v10 = vmul.f32 %v629_v21, %v4446_v59  ;;  %1472 = vmatprep.subr.mxu0 %v635_v26  ;;  %v4722_v24 = vld [vmem:[#allocation62_spill] sm:$0xff] }
 0x132   :  { %v4717_v40 = vsel %vm3830_vm11, 4294967295, %v4716_v40  ;;  %v584_v42 = vadd.f32 %v580_v12, %v531_v16  ;;  %vm4719_vm6 = vcmp.ge.s32.totalorder %v4718_v36, 0  ;;  %v583_v58 = vadd.f32 %v579_v44, %v530_v19  ;;  %v215_v27 = vpop.permute.xlu1 %214  ;;  %v4734_v16 = vld [vmem:[#allocation68_spill] sm:$0xff] }
 0x133   :  { %vm3842_vm15 = vmand %vm3475_vm13, %vm4719_vm6  ;;  %vm56_vm14 = vcmp.lt.s32.totalorder %v1877_v6, 17  ;;  %v1606_v50 = vsel %vm3716_vm8, 1.0, %v4278_v61  ;;  %v1605_v52 = vsel %vm3724_vm5, 1.0, %v4278_v61  ;;  %vm4723_vm11 = vcmp.ge.s32.totalorder %v4722_v24, 0  ;;  %v213_v29 = vpop.permute.xlu0 %212 }
 0x134   :  { %vm3857_vm7 = vmand %vm3484_vm12, %vm4723_vm11  ;;  %v634_v57 = vadd.f32 %v630_v62, %v581_v23  ;;  %v1607_v44 = vsel %vm3745_vm9, 1.0, %v4278_v61  ;;  %v1608_v9 = vsel %vm3761_vm1, 1.0, %v4278_v61  ;;  %v637_v19 = vadd.f32 %v633_v10, %v584_v42 }
 0x135   :  { %v636_v60 = vadd.f32 %v632_v2, %v583_v58  ;;  %vm4726_vm8 = vcmp.ge.s32.totalorder %v4579_v55, 0  ;;  %vm142_vm11 = vcmp.lt.s32.totalorder %v1877_v6, 18  ;;  %v1610_v45 = vsel %vm3773_vm2, 1.0, %v4278_v61 }
 0x136   :  { %vm3871_vm5 = vmand %vm3437_vm4, %vm4726_vm8  ;;  %v1609_v38 = vsel %vm3786_vm10, 1.0, %v4278_v61  ;;  %v1611_v55 = vsel %vm3796_vm3, 1.0, %v4278_v61  ;;  %1473 = vmatpush1.msra.mxu0 %v634_v57  ;;  %vm4729_vm9 = vcmp.ge.s32.totalorder %v4581_v48, 0  ;;  %v59_v31 = vsel %vm56_vm14, %v3534_v22, %v3522_v30  ;;  %1543 = vmatprep.subr.mxu1 %v637_v19  ;;  %v285_v2 = vpop.permute.xlu1 %284 }
 0x137   :  { %vm3889_vm1 = vmand %vm3457_vm0, %vm4729_vm9  ;;  %vm4732_vm2 = vnez %v4709_v56  ;;  %vm216_vm10 = vcmp.lt.s32.totalorder %v1877_v6, 19  ;;  %vm4733_vm3 = vnez %v4713_v63  ;;  %vm4735_vm6 = vcmp.ge.s32.totalorder %v4734_v16, 0  ;;  %1544 = vmatpush1.msra.mxu1 %v636_v60  ;;  %v283_v18 = vpop.permute.xlu0 %282  ;;  %v4738_v60 = vld [vmem:[#allocation38_spill] sm:$0xff] }
 0x138   :  { %v1612_v35 = vsel %vm4732_vm2, 1.0, %v4278_v61  ;;  %v1614_v48 = vsel %vm4733_vm3, 1.0, %v4278_v61  ;;  %vm305_vm8 = vmand %vm3475_vm13, %vm4735_vm6  ;;  %v60_v21 = vsel %vm56_vm14, %v3561_v8, %v3534_v22  ;;  %vm4736_vm9 = vnez %v4717_v40 }
 0x139   :  { %v1613_v56 = vsel %vm4736_vm9, 1.0, %v4278_v61  ;;  %v1615_v63 = vsel %vm3842_vm15, 1.0, %v4278_v61  ;;  %v1616_v26 = vsel %vm3857_vm7, 1.0, %v4278_v61  ;;  %vm4737_vm2 = vcmp.ge.s32.totalorder %v4589_v11, 0 }
 0x13a   :  { %vm306_vm3 = vmand %vm3484_vm12, %vm4737_vm2  ;;  %v145_v22 = vsel %vm142_vm11, %v3637_v3, %v3621_v43  ;;  %vm290_vm6 = vcmp.lt.s32.totalorder %v1877_v6, 20  ;;  %v1618_v62 = vsel %vm3871_vm5, 1.0, %v4278_v61  ;;  %v1617_v37 = vsel %vm3889_vm1, 1.0, %v4278_v61  ;;  %v289_v54 = vpop.permute.xlu1 %288 }
 0x13b   :  { %v106_v40 = vmul.f32 %v1606_v50, %v59_v31  ;;  %v58_v11 = vsel %vm56_vm14, %v3522_v30, %v3572_v25  ;;  %v146_v23 = vsel %vm142_vm11, %v3665_v28, %v3637_v3  ;;  %v1619_v10 = vsel %vm305_vm8, 1.0, %v4278_v61 }
 0x13c   :  { %v105_v42 = vmul.f32 %v1605_v52, %v60_v21  ;;  %v143_v36 = vsel %vm142_vm11, %v3683_v0, %v3665_v28  ;;  %v1620_v58 = vsel %vm306_vm3, 1.0, %v4278_v61  ;;  %vm368_vm7 = vcmp.lt.s32.totalorder %v1877_v6, 16 }
 0x13d   :  { %v57_v30 = vsel %vm56_vm14, %v3572_v25, %v3561_v8  ;;  %v176_v3 = vmul.f32 %v1610_v45, %v145_v22  ;;  %v1622_v50 = vsel %vm3437_vm4, 1.0, %v4278_v61  ;;  %v1621_v52 = vsel %vm3457_vm0, 1.0, %v4278_v61 }
 0x13e   :  { %v107_v28 = vmul.f32 %v1607_v44, %v58_v11  ;;  %v175_v24 = vmul.f32 %v1609_v38, %v146_v23  ;;  %v144_v12 = vsel %vm142_vm11, %v3621_v43, %v3683_v0  ;;  %v1623_v8 = vsel %vm3475_vm13, 1.0, %v4278_v61  ;;  %v287_v0 = vpop.permute.xlu0 %286 }
 0x13f   :  { %v131_v25 = vmul.f32 %v2243_v47, %v106_v40  ;;  %v178_v57 = vmul.f32 %v1612_v35, %v143_v36  ;;  %v219_v4 = vsel %vm216_vm10, %v3836_v41, %v3824_v34  ;;  %v1624_v44 = vsel %vm3484_vm12, 1.0, %v4278_v61  ;;  %v363_v35 = vpop.permute.xlu1 %362 }
 0x140   :  { %v130_v19 = vmul.f32 %v2072_v7, %v105_v42  ;;  %v108_v43 = vmul.f32 %v1608_v9, %v57_v30  ;;  %v220_v1 = vsel %vm216_vm10, %v215_v27, %v3836_v41  ;;  %v218_v47 = vsel %vm216_vm10, %v3824_v34, %v213_v29  ;;  %v4739_v42 = vld [vmem:[#allocation40_spill] sm:$0xff] }
 0x141   :  { %v201_v46 = vmul.f32 %v4738_v60, %v176_v3  ;;  %v177_v45 = vmul.f32 %v1611_v55, %v144_v12  ;;  %v217_v38 = vsel %vm216_vm10, %v213_v29, %v215_v27  ;;  %v293_v61 = vsel %vm290_vm6, %v283_v18, %v285_v2  ;;  %v4741_v3 = vld [vmem:[#allocation41_spill] sm:$0xff] }
 0x142   :  { %v132_v7 = vmul.f32 %v2067_v5, %v107_v28  ;;  %v200_v51 = vmul.f32 %v2095_v13, %v175_v24  ;;  %v250_v9 = vmul.f32 %v1614_v48, %v219_v4  ;;  %v294_v41 = vsel %vm290_vm6, %v289_v54, %v283_v18  ;;  %v361_v13 = vpop.permute.xlu0 %360  ;;  %v4740_v18 = vld [vmem:[#allocation44_spill] sm:$0xff]  ;;  %v4742_v4 = vld [vmem:[#allocation33_spill] sm:$0xff] }
 0x143   :  { %v203_v34 = vmul.f32 %v2122_v32, %v178_v57  ;;  %v249_v17 = vmul.f32 %v1613_v56, %v220_v1  ;;  %v251_v31 = vmul.f32 %v1615_v63, %v218_v47  ;;  %v291_v55 = vsel %vm290_vm6, %v287_v0, %v289_v54  ;;  %v4744_v1 = vld [vmem:[#allocation28_spill] sm:$0xff] }
 0x144   :  { %v133_v27 = vmul.f32 %v2205_v33, %v108_v43  ;;  %v252_v29 = vmul.f32 %v1616_v26, %v217_v38  ;;  %v324_v16 = vmul.f32 %v1618_v62, %v293_v61  ;;  %v292_v5 = vsel %vm290_vm6, %v285_v2, %v287_v0  ;;  %v367_v2 = vpop.permute.xlu1 %366 }
 0x145   :  { %v205_v48 = vadd.f32 %v201_v46, %v131_v25  ;;  %v202_v21 = vmul.f32 %v2100_v15, %v177_v45  ;;  %v323_v22 = vmul.f32 %v1617_v37, %v294_v41  ;;  %v371_v32 = vsel %vm368_vm7, %v361_v13, %v363_v35 }
 0x146   :  { %v204_v56 = vadd.f32 %v200_v51, %v130_v19  ;;  %v275_v63 = vmul.f32 %v2262_v14, %v250_v9  ;;  %v326_v40 = vmul.f32 %v1620_v58, %v291_v55  ;;  %v398_v11 = vmul.f32 %v1622_v50, %v371_v32  ;;  %v365_v30 = vpop.permute.xlu0 %364 }
 0x147   :  { %v207_v23 = vadd.f32 %v203_v34, %v133_v27  ;;  %v274_v33 = vmul.f32 %v2146_v49, %v249_v17  ;;  %v276_v26 = vmul.f32 %v2183_v39, %v251_v31  ;;  %v325_v62 = vmul.f32 %v1619_v10, %v292_v5 }
 0x148   :  { %v277_v36 = vmul.f32 %v4739_v42, %v252_v29  ;;  %v349_v15 = vmul.f32 %v4740_v18, %v324_v16  ;;  %v372_v37 = vsel %vm368_vm7, %v367_v2, %v361_v13  ;;  %v423_v28 = vmul.f32 %v4741_v3, %v398_v11 }
 0x149   :  { %v348_v14 = vmul.f32 %v4462_v20, %v323_v22  ;;  %v397_v58 = vmul.f32 %v1621_v52, %v372_v37  ;;  %v369_v49 = vsel %vm368_vm7, %v365_v30, %v367_v2  ;;  %v370_v39 = vsel %vm368_vm7, %v363_v35, %v365_v30  ;;  %v4743_v20 = vld [vmem:[#allocation42_spill] sm:$0xff] }
 0x14a   :  { %v351_v10 = vmul.f32 %v4446_v59, %v326_v40  ;;  %v399_v50 = vmul.f32 %v1623_v8, %v370_v39  ;;  %v400_v24 = vmul.f32 %v1624_v44, %v369_v49  ;;  %1474 = vmatprep.subr.mxu0 %v423_v28  ;;  %v279_v12 = vadd.f32 %v275_v63, %v205_v48  ;;  %v1395_v59 = vld [vmem:[%s4035_s2] sm:$0xf] }
 0x14b   :  { %v206_v25 = vadd.f32 %v202_v21, %v132_v7  ;;  %v350_v57 = vmul.f32 %v4463_v53, %v325_v62  ;;  %v422_v54 = vmul.f32 %v4742_v4, %v397_v58  ;;  %v278_v19 = vadd.f32 %v274_v33, %v204_v56 }
 0x14c   :  { %v425_v52 = vmul.f32 %v4743_v20, %v400_v24  ;;  %v353_v43 = vadd.f32 %v349_v15, %v279_v12  ;;  %v424_v47 = vmul.f32 %v4744_v1, %v399_v50  ;;  %v281_v0 = vadd.f32 %v277_v36, %v207_v23 }
 0x14d   :  { %1475 = vmatpush1.msra.mxu0 %v422_v54  ;;  %v352_v6 = vadd.f32 %v348_v14, %v278_v19  ;;  %vm1442_vm4 = vcmask 588800   ;;  %v280_v8 = vadd.f32 %v276_v26, %v206_v25 }
 0x14e   :  { %1545 = vmatprep.subr.mxu1 %v425_v52  ;;  %1476 = vmatprep.subr.mxu0 %v353_v43  ;;  %v355_v53 = vadd.f32 %v351_v10, %v281_v0 }
 0x14f   :  { %1546 = vmatpush1.msra.mxu1 %v424_v47  ;;  %1477 = vmatpush1.msra.mxu0 %v352_v6  ;;  %v354_v44 = vadd.f32 %v350_v57, %v280_v8  ;;  %v1436_v60 = vpop.permute.xlu0 %1435 }
 0x150   :  { %1547 = vmatprep.subr.mxu1 %v355_v53  ;;  %1713 = vmatmul.mubr.msk.f32.vlgmr.msra.gmra.mxu0 %vm1442_vm4, %v1395_v59  ;;  %v1438_v46 = vmul.f32 %v1436_v60, %v4742_v4  ;;  %v1439_v45 = vmul.f32 %v1436_v60, %v4741_v3  ;;  %v1440_v7 = vmul.f32 %v1436_v60, %v4744_v1 }
 0x151   :  { %1548 = vmatpush1.msra.mxu1 %v354_v44  ;;  %v1441_v51 = vmul.f32 %v1436_v60, %v4743_v20 }
 0x152   :  { %1714 = vmatmul.mubr.msk.f32.vlgmr.msra.gmra.mxu1 %vm1442_vm4, %v1395_v59 }
 0x210   :  { %v1512_v38 = vpop.f32.mrf.mxu0 }
 0x211   :  { %v1513_v61 = vadd.f32 %v1512_v38, %v1438_v46 }
 0x212   :  { %v1583_v9 = vpop.f32.mrf.mxu1  ;;  %v1514_v41 = vpop.f32.mrf.mxu0 }
 0x213   :  { %v1515_v34 = vadd.f32 %v1514_v41, %v1439_v45  ;;  %v1584_v31 = vadd.f32 %v1583_v9, %v1440_v7 }
 0x214   :  { %v1585_v17 = vpop.f32.mrf.mxu1 }
 0x215   :  { %v1592_v55 = vcombine.low %v1513_v61, %v1515_v34  ;;  %v1586_v35 = vadd.f32 %v1585_v17, %v1441_v51 }
 0x217   :  { %1596 = vst [vmem:[%s4036_s4] sm:$0xff] %v1592_v55  ;;  %v1593_v27 = vcombine.low %v1584_v31, %v1586_v35 }
 0x219   :  { %1597 = vst [vmem:[%s4036_s4 + $0x8] sm:$0xff] %v1593_v27 }

</bundles_post_ra>
